<compile_context>
chip_gen: v7x
topology: tpu7x:2x2x1
jax: 0.10.0
libtpu: 0.0.40
codegen_flags: <defaults>
</compile_context>

<pallas_src>
import functools

import jax
import jax.numpy as jnp
from jax import lax
from jax.experimental import pallas as pl
from jax.experimental.pallas import tpu as pltpu


# ---------------------------------------------------------------------------
# In-kernel helpers
# ---------------------------------------------------------------------------

def _swish(y):
    # y * sigmoid(y); the divide runs on the EUP (approx reciprocal) so the
    # VALU only sees a multiply.
    return y * pl.reciprocal(1.0 + jnp.exp(-y), approx=True)


def _group_norm_swish(x, gamma, beta, inv_n, gmat=None, gmat_t=None, eps=1e-5):
    """GroupNorm + Swish on a channel-major [C, S] tile.

    gamma/beta: [C, 1].  When channels_per_group == 1 (gmat is None) the
    per-channel moments already are the group moments, so no MXU work at all;
    otherwise both moments are stacked into [C, 2] so aggregation/broadcast
    costs a single pair of tiny matmuls.
    """
    s1 = jnp.sum(x, axis=1, keepdims=True)                            # [C, 1]
    s2 = jnp.sum(x * x, axis=1, keepdims=True)                        # [C, 1]
    if gmat is not None:
        s = jnp.concatenate([s1, s2], axis=1)                         # [C, 2]
        gs = jnp.dot(gmat, s, preferred_element_type=jnp.float32)     # [G, 2]
        s = jnp.dot(gmat_t, gs, preferred_element_type=jnp.float32)   # [C, 2]
        mean = s[:, 0:1] * inv_n
        msq = s[:, 1:2] * inv_n
    else:
        mean = s1 * inv_n
        msq = s2 * inv_n
    var = jnp.maximum(msq - mean * mean, 0.0)
    inv = lax.rsqrt(var + eps)                                        # [C, 1]
    return _swish((x - mean) * (inv * gamma) + beta)


def _conv3x3_gemm(a, w_mat, masks, W, S):
    """3x3 'same' convolution on a channel-major [C, S] tile as one GEMM.

    The nine shifted taps are built in-register with lane rotations plus
    precomputed edge masks (masks: [9, S] f32).  w_mat: [Cout, 9*C] bf16 with
    rows ordered (ky, kx, c), matching the tap order below.
    """
    taps = []
    for ky in range(3):
        for kx in range(3):
            idx = ky * 3 + kx
            off = (ky - 1) * W + (kx - 1)
            if off == 0:
                tap = a                                   # center tap: mask == 1
            else:
                tap = (pltpu.roll(a, (-off) % S, axis=1)
                       * masks[idx:idx + 1, :])
            taps.append(tap.astype(jnp.bfloat16))
    patch = jnp.concatenate(taps, axis=0)                             # [9C, S]
    return jnp.dot(w_mat, patch, preferred_element_type=jnp.float32)  # [Cout, S]


# ---------------------------------------------------------------------------
# Fused kernel factory
# ---------------------------------------------------------------------------

def _make_down_block_kernel(*, W, S, Cin, Cout, n_groups, n_heads, d_k,
                            has_short, has_attn):
    G = n_groups
    cg_in, cg_out = Cin // G, Cout // G
    inv_n_in = 1.0 / float(cg_in * S)
    inv_n_out = 1.0 / float(cg_out * S)
    hd = n_heads * d_k

    def kernel(*refs):
        refs = list(refs)
        o_ref = refs.pop()
        it = iter(refs)
        x_ref, temb_ref, w1_ref, w2_ref, masks_ref, vin_ref, vout_ref = (
            next(it), next(it), next(it), next(it), next(it), next(it), next(it))
        gmi = gmi_t = gmo = gmo_t = None
        if cg_in > 1:
            gmi, gmi_t = next(it)[...], next(it)[...]
        if cg_out > 1:
            gmo, gmo_t = next(it)[...], next(it)[...]
        ws_ref = next(it) if has_short else None
        if has_attn:
            wp_ref, bp_ref, wo_ref = next(it), next(it), next(it)

        x = x_ref[0]                       # [Cin, S]  f32
        masks = masks_ref[...]             # [9, S]    f32
        vin = vin_ref[...]                 # [Cin, 2]  (gamma1 | beta1)
        vout = vout_ref[...]               # [Cout, 3|4] (gamma2|beta2|bias2[+out_b])

        # ------------------------------ ResidualBlock ------------------------------
        a1 = _group_norm_swish(x, vin[:, 0:1], vin[:, 1:2], inv_n_in, gmi, gmi_t)
        # conv1 bias + time-embedding bias were pre-folded into temb (wrapper).
        h = _conv3x3_gemm(a1, w1_ref[...], masks, W, S) + temb_ref[0]
        a2 = _group_norm_swish(h, vout[:, 0:1], vout[:, 1:2], inv_n_out, gmo, gmo_t)
        h = _conv3x3_gemm(a2, w2_ref[...], masks, W, S) + vout[:, 2:3]
        if has_short:                      # 1x1-conv shortcut
            h = h + jnp.dot(ws_ref[...], x, preferred_element_type=jnp.float32)
        else:                              # identity shortcut: plain add
            h = h + x

        # ------------------------------ AttentionBlock -----------------------------
        # (its GroupNorm is never applied by the reference forward)
        if has_attn:
            h_bf = h.astype(jnp.bfloat16)
            # qkv projection: [3*hd, S]; the 1/sqrt(d_k) scale is folded into
            # the Q rows of wp/bp in the wrapper.
            qkv = jnp.dot(wp_ref[...], h_bf,
                          preferred_element_type=jnp.float32) + bp_ref[...]
            qkv = qkv.reshape(n_heads, 3 * d_k, S)
            q = qkv[:, :d_k, :]                                       # [Hh, dk, S]
            k = qkv[:, d_k:2 * d_k, :].astype(jnp.bfloat16)
            v = qkv[:, 2 * d_k:, :]                                   # stays f32

            q_seq = jnp.transpose(q, (0, 2, 1)).astype(jnp.bfloat16)  # [Hh, S, dk]
            scores = jnp.einsum('hid,hdj->hij', q_seq, k,
                                preferred_element_type=jnp.float32)   # [Hh, S, S]

            # softmax over the *query* axis i (dim=1), exactly as the reference.
            m = jnp.max(scores, axis=1, keepdims=True)                # [Hh, 1, S]
            e = jnp.exp(scores - m)                                   # [Hh, S, S]
            denom = jnp.sum(e, axis=1, keepdims=True)                 # [Hh, 1, S]
            # Fold 1/denom into V ([dk, S]) instead of rescaling the [S, S] map.
            v_scaled = (v * pl.reciprocal(denom, approx=True)).astype(jnp.bfloat16)
            res = jnp.einsum('hdj,hij->hdi', v_scaled, e.astype(jnp.bfloat16),
                             preferred_element_type=jnp.float32)      # [Hh, dk, S]
            res = res.reshape(hd, S).astype(jnp.bfloat16)
            h = (jnp.dot(wo_ref[...], res, preferred_element_type=jnp.float32)
                 + vout[:, 3:4] + h)

        o_ref[0] = h

    return kernel


# ---------------------------------------------------------------------------
# Wrapper
# ---------------------------------------------------------------------------

def _conv_w_as_mat(w):
    """[Cout, Cin, 3, 3] -> [Cout, 9*Cin] matching the in-kernel tap order."""
    co, ci, kh, kw = w.shape
    return jnp.transpose(w, (0, 2, 3, 1)).reshape(co, kh * kw * ci)


def down_block_forward(x, t, params, *, n_groups=32, n_heads=1, d_k=None,
                       has_attn=True):
    """DownBlock forward.  x: [B, Cin, H, W] f32, t: [B, Tc] f32.

    params holds PyTorch-shaped arrays: conv weights [O, I, 3, 3], linear
    weights [out, in], biases [out], norm gamma/beta [C].
    """
    B, Cin, H, W = x.shape
    S = H * W
    Cout = params['conv1_w'].shape[0]
    if d_k is None:
        d_k = Cout
    hd = n_heads * d_k
    G = n_groups
    has_short = 'short_w' in params
    if not has_short and Cin != Cout:
        raise ValueError("identity shortcut requires in_channels == out_channels")

    hi = lax.Precision.HIGHEST
    f32 = jnp.float32

    def col(v):
        return v.reshape(-1, 1).astype(f32)

    # ---- tiny wrapper-side precompute (pure XLA, negligible) ----
    x_cs = x.reshape(B, Cin, S).astype(f32)
    # time-embedding projection + both bias vectors, per batch: [B, Cout, 1]
    temb = (jnp.einsum('bt,ct->bc', t, params['time_w'], precision=hi)
            + params['time_b'] + params['conv1_b']).reshape(B, Cout, 1).astype(f32)

    w1m = _conv_w_as_mat(params['conv1_w']).astype(jnp.bfloat16)       # [Cout, 9Cin]
    w2m = _conv_w_as_mat(params['conv2_w']).astype(jnp.bfloat16)       # [Cout, 9Cout]

    # 3x3 'same'-padding edge masks for the nine taps, [9, S].
    ys = jnp.arange(S, dtype=jnp.int32) // W
    xs = jnp.arange(S, dtype=jnp.int32) % W
    masks = jnp.stack(
        [((ys + dy >= 0) & (ys + dy < H) & (xs + dx >= 0) & (xs + dx < W))
         .astype(f32)
         for dy in (-1, 0, 1) for dx in (-1, 0, 1)], axis=0)

    # packed per-channel vectors
    vec_in = jnp.stack([params['norm1_g'], params['norm1_b']], axis=1).astype(f32)
    bias2 = params['conv2_b'] + (params['short_b'] if has_short else 0.0)
    out_cols = [params['norm2_g'], params['norm2_b'], bias2]
    if has_attn:
        out_cols.append(params['out_b'])
    vec_out = jnp.stack(out_cols, axis=1).astype(f32)
    ncols = vec_out.shape[1]

    args = [x_cs, temb, w1m, w2m, masks, vec_in, vec_out]
    in_specs = [
        pl.BlockSpec((1, Cin, S), lambda b: (b, 0, 0)),
        pl.BlockSpec((1, Cout, 1), lambda b: (b, 0, 0)),
        pl.BlockSpec((Cout, 9 * Cin), lambda b: (0, 0)),
        pl.BlockSpec((Cout, 9 * Cout), lambda b: (0, 0)),
        pl.BlockSpec((9, S), lambda b: (0, 0)),
        pl.BlockSpec((Cin, 2), lambda b: (0, 0)),
        pl.BlockSpec((Cout, ncols), lambda b: (0, 0)),
    ]

    def gmat_for(C):
        cg = C // G
        return (jnp.arange(C)[None, :] // cg
                == jnp.arange(G)[:, None]).astype(f32)                 # [G, C]

    if Cin // G > 1:
        gm = gmat_for(Cin)
        args += [gm, gm.T]
        in_specs += [pl.BlockSpec((G, Cin), lambda b: (0, 0)),
                     pl.BlockSpec((Cin, G), lambda b: (0, 0))]
    if Cout // G > 1:
        gm = gmat_for(Cout)
        args += [gm, gm.T]
        in_specs += [pl.BlockSpec((G, Cout), lambda b: (0, 0)),
                     pl.BlockSpec((Cout, G), lambda b: (0, 0))]
    if has_short:
        args.append(params['short_w'].reshape(Cout, Cin).astype(f32))
        in_specs.append(pl.BlockSpec((Cout, Cin), lambda b: (0, 0)))
    if has_attn:
        # fold the 1/sqrt(d_k) attention scale into the Q rows of the projection
        scale = float(d_k) ** -0.5
        within = jnp.arange(3 * hd) % (3 * d_k)
        qscale = jnp.where(within < d_k, scale, 1.0).astype(f32)[:, None]
        wp_s = (params['proj_w'].astype(f32) * qscale).astype(jnp.bfloat16)
        bp_s = col(params['proj_b']) * qscale                          # stays f32
        wo_bf = params['out_w'].astype(jnp.bfloat16)
        args += [wp_s, bp_s, wo_bf]
        in_specs += [pl.BlockSpec((3 * hd, Cout), lambda b: (0, 0)),
                     pl.BlockSpec((3 * hd, 1), lambda b: (0, 0)),
                     pl.BlockSpec((Cout, hd), lambda b: (0, 0))]

    kernel = _make_down_block_kernel(W=W, S=S, Cin=Cin, Cout=Cout,
                                     n_groups=G, n_heads=n_heads, d_k=d_k,
                                     has_short=has_short, has_attn=has_attn)

    out_cs = pl.pallas_call(
        kernel,
        out_shape=jax.ShapeDtypeStruct((B, Cout, S), f32),
        grid_spec=pltpu.PrefetchScalarGridSpec(
            num_scalar_prefetch=0, grid=(B,),
            in_specs=in_specs,
            out_specs=pl.BlockSpec((1, Cout, S), lambda b: (b, 0, 0))),
        compiler_params=pltpu.CompilerParams(
            dimension_semantics=("parallel",),
            vmem_limit_bytes=32 * 1024 * 1024),
    )(*args)

    return out_cs.reshape(B, Cout, H, W)


# ---------------------------------------------------------------------------
# Pure-JAX float32 reference (faithful to the PyTorch forward)
# ---------------------------------------------------------------------------

def _reference_down_block(x, t, params, *, n_groups=32, n_heads=1, d_k=None,
                          has_attn=True):
    B, Cin, H, W = x.shape
    Cout = params['conv1_w'].shape[0]
    if d_k is None:
        d_k = Cout
    hd = n_heads * d_k
    hi = lax.Precision.HIGHEST
    eps = 1e-5

    def gn(v, gamma, beta):
        b, c, hh, ww = v.shape
        g = v.reshape(b, n_groups, c // n_groups, hh, ww)
        mean = g.mean(axis=(2, 3, 4), keepdims=True)
        var = g.var(axis=(2, 3, 4), keepdims=True)
        g = (g - mean) / jnp.sqrt(var + eps)
        return (g.reshape(b, c, hh, ww) * gamma.reshape(1, c, 1, 1)
                + beta.reshape(1, c, 1, 1))

    def swish(v):
        return v * (1.0 / (1.0 + jnp.exp(-v)))

    def conv3(v, w, b):
        o = lax.conv_general_dilated(v, w, (1, 1), ((1, 1), (1, 1)),
                                     dimension_numbers=('NCHW', 'OIHW', 'NCHW'),
                                     precision=hi)
        return o + b.reshape(1, -1, 1, 1)

    h = conv3(swish(gn(x, params['norm1_g'], params['norm1_b'])),
              params['conv1_w'], params['conv1_b'])
    h = h + (jnp.einsum('bt,ct->bc', t, params['time_w'], precision=hi)
             + params['time_b'])[:, :, None, None]
    h = conv3(swish(gn(h, params['norm2_g'], params['norm2_b'])),
              params['conv2_w'], params['conv2_b'])
    if 'short_w' in params:
        sc = lax.conv_general_dilated(x, params['short_w'], (1, 1),
                                      ((0, 0), (0, 0)),
                                      dimension_numbers=('NCHW', 'OIHW', 'NCHW'),
                                      precision=hi)
        sc = sc + params['short_b'].reshape(1, -1, 1, 1)
    else:
        sc = x
    h = h + sc

    if has_attn:
        S = H * W
        xs = jnp.transpose(h.reshape(B, Cout, S), (0, 2, 1))           # [B, S, C]
        qkv = jnp.einsum('bsc,fc->bsf', xs, params['proj_w'],
                         precision=hi) + params['proj_b']
        qkv = qkv.reshape(B, S, n_heads, 3 * d_k)
        q, k, v = jnp.split(qkv, 3, axis=-1)
        attn = jnp.einsum('bihd,bjhd->bijh', q, k,
                          precision=hi) * (float(d_k) ** -0.5)
        attn = jax.nn.softmax(attn, axis=1)                            # dim=1 (!)
        res = jnp.einsum('bijh,bjhd->bihd', attn, v,
                         precision=hi).reshape(B, S, hd)
        res = jnp.einsum('bsf,cf->bsc', res, params['out_w'],
                         precision=hi) + params['out_b']
        res = res + xs
        h = jnp.transpose(res, (0, 2, 1)).reshape(B, Cout, H, W)
    return h


# ---------------------------------------------------------------------------
# Main
# ---------------------------------------------------------------------------

if __name__ == "__main__":
    B, Cin, Cout, Tc, H, W = 2, 32, 32, 32, 16, 16
    n_groups, n_heads = 32, 1
    d_k = Cout                      # AttentionBlock default: d_k = n_channels
    hd = n_heads * d_k

    key = jax.random.PRNGKey(0)
    ks = jax.random.split(key, 16)
    nrm = jax.random.normal

    params = dict(
        norm1_g=1.0 + 0.1 * nrm(ks[0], (Cin,), jnp.float32),
        norm1_b=0.1 * nrm(ks[1], (Cin,), jnp.float32),
        conv1_w=nrm(ks[2], (Cout, Cin, 3, 3), jnp.float32) / (9 * Cin) ** 0.5,
        conv1_b=0.1 * nrm(ks[3], (Cout,), jnp.float32),
        time_w=nrm(ks[4], (Cout, Tc), jnp.float32) / Tc ** 0.5,
        time_b=0.1 * nrm(ks[5], (Cout,), jnp.float32),
        norm2_g=1.0 + 0.1 * nrm(ks[6], (Cout,), jnp.float32),
        norm2_b=0.1 * nrm(ks[7], (Cout,), jnp.float32),
        conv2_w=nrm(ks[8], (Cout, Cout, 3, 3), jnp.float32) / (9 * Cout) ** 0.5,
        conv2_b=0.1 * nrm(ks[9], (Cout,), jnp.float32),
        # AttentionBlock params (its GroupNorm is never applied by the
        # reference forward, so it carries no parameters here).
        proj_w=nrm(ks[10], (3 * hd, Cout), jnp.float32) / Cout ** 0.5,
        proj_b=0.1 * nrm(ks[11], (3 * hd,), jnp.float32),
        out_w=nrm(ks[12], (Cout, hd), jnp.float32) / hd ** 0.5,
        out_b=0.1 * nrm(ks[13], (Cout,), jnp.float32),
    )
    x = nrm(ks[14], (B, Cin, H, W), jnp.float32)
    t = nrm(ks[15], (B, Tc), jnp.float32)

    fwd = jax.jit(functools.partial(down_block_forward, n_groups=n_groups,
                                    n_heads=n_heads, d_k=d_k, has_attn=True))
    out = jax.block_until_ready(fwd(x, t, params))

    ref = _reference_down_block(x, t, params, n_groups=n_groups,
                                n_heads=n_heads, d_k=d_k, has_attn=True)
    assert out.shape == (B, Cout, H, W)
    # bf16 matmul operands (f32 accumulation) + approx-EUP reciprocals vs. a
    # pure-f32 reference: compare with a max-error tolerance normalized by the
    # reference scale.
    max_err = float(jnp.max(jnp.abs(out - ref)))
    tol = 3e-2 * float(jnp.max(jnp.abs(ref)))
    assert max_err <= tol, f"mismatch vs reference: {max_err} > {tol}"

    print("KERNEL_OK")
</pallas_src>

<mosaic_0001>
module attributes {stable_mosaic.version = 11 : i64} {
  func.func @kernel(%arg0: i32, %arg1: memref<1x32x256xf32, #tpu.memory_space<vmem>>, %arg2: memref<1x32x1xf32, #tpu.memory_space<vmem>>, %arg3: memref<32x288xbf16, #tpu.memory_space<vmem>>, %arg4: memref<32x288xbf16, #tpu.memory_space<vmem>>, %arg5: memref<9x256xf32, #tpu.memory_space<vmem>>, %arg6: memref<32x2xf32, #tpu.memory_space<vmem>>, %arg7: memref<32x4xf32, #tpu.memory_space<vmem>>, %arg8: memref<96x32xbf16, #tpu.memory_space<vmem>>, %arg9: memref<96x1xf32, #tpu.memory_space<vmem>>, %arg10: memref<32x32xbf16, #tpu.memory_space<vmem>>, %arg11: memref<1x32x256xf32, #tpu.memory_space<vmem>>) attributes {dimension_semantics = [#tpu.dimension_semantics<parallel>], iteration_bounds = array<i64: 2>, scalar_prefetch = 0 : i64, scratch_operands = 0 : i64, tpu.core_type = #tpu.core_type<tc>, window_params = [{transform_indices = @transform_0, window_bounds = array<i64: 1, 32, 256>}, {transform_indices = @transform_1, window_bounds = array<i64: 1, 32, 1>}, {pipeline_mode = #tpu.pipeline_mode<synchronous>, transform_indices = @transform_2, window_bounds = array<i64: 32, 288>}, {pipeline_mode = #tpu.pipeline_mode<synchronous>, transform_indices = @transform_3, window_bounds = array<i64: 32, 288>}, {pipeline_mode = #tpu.pipeline_mode<synchronous>, transform_indices = @transform_4, window_bounds = array<i64: 9, 256>}, {pipeline_mode = #tpu.pipeline_mode<synchronous>, transform_indices = @transform_5, window_bounds = array<i64: 32, 2>}, {pipeline_mode = #tpu.pipeline_mode<synchronous>, transform_indices = @transform_6, window_bounds = array<i64: 32, 4>}, {pipeline_mode = #tpu.pipeline_mode<synchronous>, transform_indices = @transform_7, window_bounds = array<i64: 96, 32>}, {pipeline_mode = #tpu.pipeline_mode<synchronous>, transform_indices = @transform_8, window_bounds = array<i64: 96, 1>}, {pipeline_mode = #tpu.pipeline_mode<synchronous>, transform_indices = @transform_9, window_bounds = array<i64: 32, 32>}, {transform_indices = @transform_10, window_bounds = array<i64: 1, 32, 256>}]} {
    %c0 = arith.constant 0 : index
    %c0_0 = arith.constant 0 : index
    %c0_1 = arith.constant 0 : index
    %0 = vector.load %arg1[%c0, %c0_0, %c0_1] : memref<1x32x256xf32, #tpu.memory_space<vmem>>, vector<1x32x256xf32>
    %1 = vector.shape_cast %0 : vector<1x32x256xf32> to vector<32x256xf32>
    %c0_2 = arith.constant 0 : index
    %c0_3 = arith.constant 0 : index
    %2 = vector.load %arg5[%c0_2, %c0_3] : memref<9x256xf32, #tpu.memory_space<vmem>>, vector<9x256xf32>
    %c0_4 = arith.constant 0 : index
    %c0_5 = arith.constant 0 : index
    %3 = vector.load %arg6[%c0_4, %c0_5] : memref<32x2xf32, #tpu.memory_space<vmem>>, vector<32x2xf32>
    %c0_6 = arith.constant 0 : index
    %c0_7 = arith.constant 0 : index
    %4 = vector.load %arg7[%c0_6, %c0_7] : memref<32x4xf32, #tpu.memory_space<vmem>>, vector<32x4xf32>
    %5 = vector.extract_strided_slice %3 {offsets = [0, 0], sizes = [32, 1], strides = [1, 1]} : vector<32x2xf32> to vector<32x1xf32>
    %6 = vector.extract_strided_slice %3 {offsets = [0, 1], sizes = [32, 1], strides = [1, 1]} : vector<32x2xf32> to vector<32x1xf32>
    %cst = arith.constant dense<0.000000e+00> : vector<32xf32>
    %7 = vector.multi_reduction <add>, %1, %cst [1] : vector<32x256xf32> to vector<32xf32>
    %8 = vector.shape_cast %7 : vector<32xf32> to vector<32x1xf32>
    %9 = arith.mulf %1, %1 : vector<32x256xf32>
    %cst_8 = arith.constant dense<0.000000e+00> : vector<32xf32>
    %10 = vector.multi_reduction <add>, %9, %cst_8 [1] : vector<32x256xf32> to vector<32xf32>
    %11 = vector.shape_cast %10 : vector<32xf32> to vector<32x1xf32>
    %cst_9 = arith.constant 3.906250e-03 : f32
    %12 = vector.broadcast %cst_9 : f32 to vector<32x1xf32>
    %13 = arith.mulf %8, %12 : vector<32x1xf32>
    %cst_10 = arith.constant 3.906250e-03 : f32
    %14 = vector.broadcast %cst_10 : f32 to vector<32x1xf32>
    %15 = arith.mulf %11, %14 : vector<32x1xf32>
    %16 = arith.mulf %13, %13 : vector<32x1xf32>
    %17 = arith.subf %15, %16 : vector<32x1xf32>
    %cst_11 = arith.constant 0.000000e+00 : f32
    %18 = vector.broadcast %cst_11 : f32 to vector<32x1xf32>
    %19 = arith.maximumf %17, %18 : vector<32x1xf32>
    %cst_12 = arith.constant 9.99999974E-6 : f32
    %20 = vector.broadcast %cst_12 : f32 to vector<32x1xf32>
    %21 = arith.addf %19, %20 : vector<32x1xf32>
    %22 = math.rsqrt %21 : vector<32x1xf32>
    %23 = vector.broadcast %13 : vector<32x1xf32> to vector<32x256xf32>
    %24 = arith.subf %1, %23 : vector<32x256xf32>
    %25 = arith.mulf %22, %5 : vector<32x1xf32>
    %26 = vector.broadcast %25 : vector<32x1xf32> to vector<32x256xf32>
    %27 = arith.mulf %24, %26 : vector<32x256xf32>
    %28 = vector.broadcast %6 : vector<32x1xf32> to vector<32x256xf32>
    %29 = arith.addf %27, %28 : vector<32x256xf32>
    %cst_13 = arith.constant 0.000000e+00 : f32
    %30 = vector.broadcast %cst_13 : f32 to vector<32x256xf32>
    %31 = arith.subf %30, %29 : vector<32x256xf32>
    %32 = math.exp %31 : vector<32x256xf32>
    %cst_14 = arith.constant 1.000000e+00 : f32
    %33 = vector.broadcast %cst_14 : f32 to vector<32x256xf32>
    %34 = arith.addf %33, %32 : vector<32x256xf32>
    %35 = tpu.reciprocal %34 {approx = true} : vector<32x256xf32> -> vector<32x256xf32>
    %36 = arith.mulf %29, %35 : vector<32x256xf32>
    %c0_15 = arith.constant 0 : index
    %c0_16 = arith.constant 0 : index
    %37 = vector.load %arg3[%c0_15, %c0_16] : memref<32x288xbf16, #tpu.memory_space<vmem>>, vector<32x288xbf16>
    %c17_i32 = arith.constant 17 : i32
    %38 = tpu.dynamic_rotate %36 by %c17_i32 dim 1 : vector<32x256xf32>, i32 -> vector<32x256xf32>
    %39 = vector.extract_strided_slice %2 {offsets = [0, 0], sizes = [1, 256], strides = [1, 1]} : vector<9x256xf32> to vector<1x256xf32>
    %40 = vector.broadcast %39 : vector<1x256xf32> to vector<32x256xf32>
    %41 = arith.mulf %38, %40 : vector<32x256xf32>
    %42 = arith.truncf %41 : vector<32x256xf32> to vector<32x256xbf16>
    %c16_i32 = arith.constant 16 : i32
    %43 = tpu.dynamic_rotate %36 by %c16_i32 dim 1 : vector<32x256xf32>, i32 -> vector<32x256xf32>
    %44 = vector.extract_strided_slice %2 {offsets = [1, 0], sizes = [1, 256], strides = [1, 1]} : vector<9x256xf32> to vector<1x256xf32>
    %45 = vector.broadcast %44 : vector<1x256xf32> to vector<32x256xf32>
    %46 = arith.mulf %43, %45 : vector<32x256xf32>
    %47 = arith.truncf %46 : vector<32x256xf32> to vector<32x256xbf16>
    %c15_i32 = arith.constant 15 : i32
    %48 = tpu.dynamic_rotate %36 by %c15_i32 dim 1 : vector<32x256xf32>, i32 -> vector<32x256xf32>
    %49 = vector.extract_strided_slice %2 {offsets = [2, 0], sizes = [1, 256], strides = [1, 1]} : vector<9x256xf32> to vector<1x256xf32>
    %50 = vector.broadcast %49 : vector<1x256xf32> to vector<32x256xf32>
    %51 = arith.mulf %48, %50 : vector<32x256xf32>
    %52 = arith.truncf %51 : vector<32x256xf32> to vector<32x256xbf16>
    %c1_i32 = arith.constant 1 : i32
    %53 = tpu.dynamic_rotate %36 by %c1_i32 dim 1 : vector<32x256xf32>, i32 -> vector<32x256xf32>
    %54 = vector.extract_strided_slice %2 {offsets = [3, 0], sizes = [1, 256], strides = [1, 1]} : vector<9x256xf32> to vector<1x256xf32>
    %55 = vector.broadcast %54 : vector<1x256xf32> to vector<32x256xf32>
    %56 = arith.mulf %53, %55 : vector<32x256xf32>
    %57 = arith.truncf %56 : vector<32x256xf32> to vector<32x256xbf16>
    %58 = arith.truncf %36 : vector<32x256xf32> to vector<32x256xbf16>
    %c255_i32 = arith.constant 255 : i32
    %59 = tpu.dynamic_rotate %36 by %c255_i32 dim 1 : vector<32x256xf32>, i32 -> vector<32x256xf32>
    %60 = vector.extract_strided_slice %2 {offsets = [5, 0], sizes = [1, 256], strides = [1, 1]} : vector<9x256xf32> to vector<1x256xf32>
    %61 = vector.broadcast %60 : vector<1x256xf32> to vector<32x256xf32>
    %62 = arith.mulf %59, %61 : vector<32x256xf32>
    %63 = arith.truncf %62 : vector<32x256xf32> to vector<32x256xbf16>
    %c241_i32 = arith.constant 241 : i32
    %64 = tpu.dynamic_rotate %36 by %c241_i32 dim 1 : vector<32x256xf32>, i32 -> vector<32x256xf32>
    %65 = vector.extract_strided_slice %2 {offsets = [6, 0], sizes = [1, 256], strides = [1, 1]} : vector<9x256xf32> to vector<1x256xf32>
    %66 = vector.broadcast %65 : vector<1x256xf32> to vector<32x256xf32>
    %67 = arith.mulf %64, %66 : vector<32x256xf32>
    %68 = arith.truncf %67 : vector<32x256xf32> to vector<32x256xbf16>
    %c240_i32 = arith.constant 240 : i32
    %69 = tpu.dynamic_rotate %36 by %c240_i32 dim 1 : vector<32x256xf32>, i32 -> vector<32x256xf32>
    %70 = vector.extract_strided_slice %2 {offsets = [7, 0], sizes = [1, 256], strides = [1, 1]} : vector<9x256xf32> to vector<1x256xf32>
    %71 = vector.broadcast %70 : vector<1x256xf32> to vector<32x256xf32>
    %72 = arith.mulf %69, %71 : vector<32x256xf32>
    %73 = arith.truncf %72 : vector<32x256xf32> to vector<32x256xbf16>
    %c239_i32 = arith.constant 239 : i32
    %74 = tpu.dynamic_rotate %36 by %c239_i32 dim 1 : vector<32x256xf32>, i32 -> vector<32x256xf32>
    %75 = vector.extract_strided_slice %2 {offsets = [8, 0], sizes = [1, 256], strides = [1, 1]} : vector<9x256xf32> to vector<1x256xf32>
    %76 = vector.broadcast %75 : vector<1x256xf32> to vector<32x256xf32>
    %77 = arith.mulf %74, %76 : vector<32x256xf32>
    %78 = arith.truncf %77 : vector<32x256xf32> to vector<32x256xbf16>
    %79 = tpu.concatenate %42, %47, %52, %57, %58, %63, %68, %73, %78 in 0 : vector<32x256xbf16>, vector<32x256xbf16>, vector<32x256xbf16>, vector<32x256xbf16>, vector<32x256xbf16>, vector<32x256xbf16>, vector<32x256xbf16>, vector<32x256xbf16>, vector<32x256xbf16> -> vector<288x256xbf16>
    %cst_17 = arith.constant dense<0.000000e+00> : vector<32x256xf32>
    %80 = tpu.matmul %37, %79, %cst_17 {dimension_numbers = #tpu.dot_dimension_numbers<[1], [0], [0], [1], [0, 0, 1, 1], [], []>} : vector<32x288xbf16>, vector<288x256xbf16>, vector<32x256xf32> -> vector<32x256xf32>
    %c0_18 = arith.constant 0 : index
    %c0_19 = arith.constant 0 : index
    %c0_20 = arith.constant 0 : index
    %81 = vector.load %arg2[%c0_18, %c0_19, %c0_20] : memref<1x32x1xf32, #tpu.memory_space<vmem>>, vector<1x32x1xf32>
    %82 = vector.shape_cast %81 : vector<1x32x1xf32> to vector<32x1xf32>
    %83 = vector.broadcast %82 : vector<32x1xf32> to vector<32x256xf32>
    %84 = arith.addf %80, %83 : vector<32x256xf32>
    %85 = vector.extract_strided_slice %4 {offsets = [0, 0], sizes = [32, 1], strides = [1, 1]} : vector<32x4xf32> to vector<32x1xf32>
    %86 = vector.extract_strided_slice %4 {offsets = [0, 1], sizes = [32, 1], strides = [1, 1]} : vector<32x4xf32> to vector<32x1xf32>
    %cst_21 = arith.constant dense<0.000000e+00> : vector<32xf32>
    %87 = vector.multi_reduction <add>, %84, %cst_21 [1] : vector<32x256xf32> to vector<32xf32>
    %88 = vector.shape_cast %87 : vector<32xf32> to vector<32x1xf32>
    %89 = arith.mulf %84, %84 : vector<32x256xf32>
    %cst_22 = arith.constant dense<0.000000e+00> : vector<32xf32>
    %90 = vector.multi_reduction <add>, %89, %cst_22 [1] : vector<32x256xf32> to vector<32xf32>
    %91 = vector.shape_cast %90 : vector<32xf32> to vector<32x1xf32>
    %cst_23 = arith.constant 3.906250e-03 : f32
    %92 = vector.broadcast %cst_23 : f32 to vector<32x1xf32>
    %93 = arith.mulf %88, %92 : vector<32x1xf32>
    %cst_24 = arith.constant 3.906250e-03 : f32
    %94 = vector.broadcast %cst_24 : f32 to vector<32x1xf32>
    %95 = arith.mulf %91, %94 : vector<32x1xf32>
    %96 = arith.mulf %93, %93 : vector<32x1xf32>
    %97 = arith.subf %95, %96 : vector<32x1xf32>
    %cst_25 = arith.constant 0.000000e+00 : f32
    %98 = vector.broadcast %cst_25 : f32 to vector<32x1xf32>
    %99 = arith.maximumf %97, %98 : vector<32x1xf32>
    %cst_26 = arith.constant 9.99999974E-6 : f32
    %100 = vector.broadcast %cst_26 : f32 to vector<32x1xf32>
    %101 = arith.addf %99, %100 : vector<32x1xf32>
    %102 = math.rsqrt %101 : vector<32x1xf32>
    %103 = vector.broadcast %93 : vector<32x1xf32> to vector<32x256xf32>
    %104 = arith.subf %84, %103 : vector<32x256xf32>
    %105 = arith.mulf %102, %85 : vector<32x1xf32>
    %106 = vector.broadcast %105 : vector<32x1xf32> to vector<32x256xf32>
    %107 = arith.mulf %104, %106 : vector<32x256xf32>
    %108 = vector.broadcast %86 : vector<32x1xf32> to vector<32x256xf32>
    %109 = arith.addf %107, %108 : vector<32x256xf32>
    %cst_27 = arith.constant 0.000000e+00 : f32
    %110 = vector.broadcast %cst_27 : f32 to vector<32x256xf32>
    %111 = arith.subf %110, %109 : vector<32x256xf32>
    %112 = math.exp %111 : vector<32x256xf32>
    %cst_28 = arith.constant 1.000000e+00 : f32
    %113 = vector.broadcast %cst_28 : f32 to vector<32x256xf32>
    %114 = arith.addf %113, %112 : vector<32x256xf32>
    %115 = tpu.reciprocal %114 {approx = true} : vector<32x256xf32> -> vector<32x256xf32>
    %116 = arith.mulf %109, %115 : vector<32x256xf32>
    %c0_29 = arith.constant 0 : index
    %c0_30 = arith.constant 0 : index
    %117 = vector.load %arg4[%c0_29, %c0_30] : memref<32x288xbf16, #tpu.memory_space<vmem>>, vector<32x288xbf16>
    %c17_i32_31 = arith.constant 17 : i32
    %118 = tpu.dynamic_rotate %116 by %c17_i32_31 dim 1 : vector<32x256xf32>, i32 -> vector<32x256xf32>
    %119 = vector.extract_strided_slice %2 {offsets = [0, 0], sizes = [1, 256], strides = [1, 1]} : vector<9x256xf32> to vector<1x256xf32>
    %120 = vector.broadcast %119 : vector<1x256xf32> to vector<32x256xf32>
    %121 = arith.mulf %118, %120 : vector<32x256xf32>
    %122 = arith.truncf %121 : vector<32x256xf32> to vector<32x256xbf16>
    %c16_i32_32 = arith.constant 16 : i32
    %123 = tpu.dynamic_rotate %116 by %c16_i32_32 dim 1 : vector<32x256xf32>, i32 -> vector<32x256xf32>
    %124 = vector.extract_strided_slice %2 {offsets = [1, 0], sizes = [1, 256], strides = [1, 1]} : vector<9x256xf32> to vector<1x256xf32>
    %125 = vector.broadcast %124 : vector<1x256xf32> to vector<32x256xf32>
    %126 = arith.mulf %123, %125 : vector<32x256xf32>
    %127 = arith.truncf %126 : vector<32x256xf32> to vector<32x256xbf16>
    %c15_i32_33 = arith.constant 15 : i32
    %128 = tpu.dynamic_rotate %116 by %c15_i32_33 dim 1 : vector<32x256xf32>, i32 -> vector<32x256xf32>
    %129 = vector.extract_strided_slice %2 {offsets = [2, 0], sizes = [1, 256], strides = [1, 1]} : vector<9x256xf32> to vector<1x256xf32>
    %130 = vector.broadcast %129 : vector<1x256xf32> to vector<32x256xf32>
    %131 = arith.mulf %128, %130 : vector<32x256xf32>
    %132 = arith.truncf %131 : vector<32x256xf32> to vector<32x256xbf16>
    %c1_i32_34 = arith.constant 1 : i32
    %133 = tpu.dynamic_rotate %116 by %c1_i32_34 dim 1 : vector<32x256xf32>, i32 -> vector<32x256xf32>
    %134 = vector.extract_strided_slice %2 {offsets = [3, 0], sizes = [1, 256], strides = [1, 1]} : vector<9x256xf32> to vector<1x256xf32>
    %135 = vector.broadcast %134 : vector<1x256xf32> to vector<32x256xf32>
    %136 = arith.mulf %133, %135 : vector<32x256xf32>
    %137 = arith.truncf %136 : vector<32x256xf32> to vector<32x256xbf16>
    %138 = arith.truncf %116 : vector<32x256xf32> to vector<32x256xbf16>
    %c255_i32_35 = arith.constant 255 : i32
    %139 = tpu.dynamic_rotate %116 by %c255_i32_35 dim 1 : vector<32x256xf32>, i32 -> vector<32x256xf32>
    %140 = vector.extract_strided_slice %2 {offsets = [5, 0], sizes = [1, 256], strides = [1, 1]} : vector<9x256xf32> to vector<1x256xf32>
    %141 = vector.broadcast %140 : vector<1x256xf32> to vector<32x256xf32>
    %142 = arith.mulf %139, %141 : vector<32x256xf32>
    %143 = arith.truncf %142 : vector<32x256xf32> to vector<32x256xbf16>
    %c241_i32_36 = arith.constant 241 : i32
    %144 = tpu.dynamic_rotate %116 by %c241_i32_36 dim 1 : vector<32x256xf32>, i32 -> vector<32x256xf32>
    %145 = vector.extract_strided_slice %2 {offsets = [6, 0], sizes = [1, 256], strides = [1, 1]} : vector<9x256xf32> to vector<1x256xf32>
    %146 = vector.broadcast %145 : vector<1x256xf32> to vector<32x256xf32>
    %147 = arith.mulf %144, %146 : vector<32x256xf32>
    %148 = arith.truncf %147 : vector<32x256xf32> to vector<32x256xbf16>
    %c240_i32_37 = arith.constant 240 : i32
    %149 = tpu.dynamic_rotate %116 by %c240_i32_37 dim 1 : vector<32x256xf32>, i32 -> vector<32x256xf32>
    %150 = vector.extract_strided_slice %2 {offsets = [7, 0], sizes = [1, 256], strides = [1, 1]} : vector<9x256xf32> to vector<1x256xf32>
    %151 = vector.broadcast %150 : vector<1x256xf32> to vector<32x256xf32>
    %152 = arith.mulf %149, %151 : vector<32x256xf32>
    %153 = arith.truncf %152 : vector<32x256xf32> to vector<32x256xbf16>
    %c239_i32_38 = arith.constant 239 : i32
    %154 = tpu.dynamic_rotate %116 by %c239_i32_38 dim 1 : vector<32x256xf32>, i32 -> vector<32x256xf32>
    %155 = vector.extract_strided_slice %2 {offsets = [8, 0], sizes = [1, 256], strides = [1, 1]} : vector<9x256xf32> to vector<1x256xf32>
    %156 = vector.broadcast %155 : vector<1x256xf32> to vector<32x256xf32>
    %157 = arith.mulf %154, %156 : vector<32x256xf32>
    %158 = arith.truncf %157 : vector<32x256xf32> to vector<32x256xbf16>
    %159 = tpu.concatenate %122, %127, %132, %137, %138, %143, %148, %153, %158 in 0 : vector<32x256xbf16>, vector<32x256xbf16>, vector<32x256xbf16>, vector<32x256xbf16>, vector<32x256xbf16>, vector<32x256xbf16>, vector<32x256xbf16>, vector<32x256xbf16>, vector<32x256xbf16> -> vector<288x256xbf16>
    %cst_39 = arith.constant dense<0.000000e+00> : vector<32x256xf32>
    %160 = tpu.matmul %117, %159, %cst_39 {dimension_numbers = #tpu.dot_dimension_numbers<[1], [0], [0], [1], [0, 0, 1, 1], [], []>} : vector<32x288xbf16>, vector<288x256xbf16>, vector<32x256xf32> -> vector<32x256xf32>
    %161 = vector.extract_strided_slice %4 {offsets = [0, 2], sizes = [32, 1], strides = [1, 1]} : vector<32x4xf32> to vector<32x1xf32>
    %162 = vector.broadcast %161 : vector<32x1xf32> to vector<32x256xf32>
    %163 = arith.addf %160, %162 : vector<32x256xf32>
    %164 = arith.addf %163, %1 : vector<32x256xf32>
    %165 = arith.truncf %164 : vector<32x256xf32> to vector<32x256xbf16>
    %c0_40 = arith.constant 0 : index
    %c0_41 = arith.constant 0 : index
    %166 = vector.load %arg8[%c0_40, %c0_41] : memref<96x32xbf16, #tpu.memory_space<vmem>>, vector<96x32xbf16>
    %cst_42 = arith.constant dense<0.000000e+00> : vector<96x256xf32>
    %167 = tpu.matmul %166, %165, %cst_42 {dimension_numbers = #tpu.dot_dimension_numbers<[1], [0], [0], [1], [0, 0, 1, 1], [], []>} : vector<96x32xbf16>, vector<32x256xbf16>, vector<96x256xf32> -> vector<96x256xf32>
    %c0_43 = arith.constant 0 : index
    %c0_44 = arith.constant 0 : index
    %168 = vector.load %arg9[%c0_43, %c0_44] : memref<96x1xf32, #tpu.memory_space<vmem>>, vector<96x1xf32>
    %169 = vector.broadcast %168 : vector<96x1xf32> to vector<96x256xf32>
    %170 = arith.addf %167, %169 : vector<96x256xf32>
    %171 = vector.shape_cast %170 : vector<96x256xf32> to vector<1x96x256xf32>
    %172 = vector.extract_strided_slice %171 {offsets = [0, 0, 0], sizes = [1, 32, 256], strides = [1, 1, 1]} : vector<1x96x256xf32> to vector<1x32x256xf32>
    %173 = vector.extract_strided_slice %171 {offsets = [0, 32, 0], sizes = [1, 32, 256], strides = [1, 1, 1]} : vector<1x96x256xf32> to vector<1x32x256xf32>
    %174 = arith.truncf %173 : vector<1x32x256xf32> to vector<1x32x256xbf16>
    %175 = vector.extract_strided_slice %171 {offsets = [0, 64, 0], sizes = [1, 32, 256], strides = [1, 1, 1]} : vector<1x96x256xf32> to vector<1x32x256xf32>
    %176 = tpu.transpose %172, [0, 2, 1] : vector<1x32x256xf32> -> vector<1x256x32xf32>
    %177 = arith.truncf %176 : vector<1x256x32xf32> to vector<1x256x32xbf16>
    "tpu.trace_start"() <{level = 10 : i32, message = "hid,hdj->hij"}> : () -> ()
    %cst_45 = arith.constant dense<0.000000e+00> : vector<1x256x256xf32>
    %178 = tpu.matmul %177, %174, %cst_45 {dimension_numbers = #tpu.dot_dimension_numbers<[2], [1], [1], [2], [0, 0, 0, 1, 1, 2], [0], [0]>} : vector<1x256x32xbf16>, vector<1x32x256xbf16>, vector<1x256x256xf32> -> vector<1x256x256xf32>
    "tpu.trace_stop"() : () -> ()
    %cst_46 = arith.constant dense<0xFF800000> : vector<1x256xf32>
    %179 = vector.multi_reduction <maximumf>, %178, %cst_46 [1] : vector<1x256x256xf32> to vector<1x256xf32>
    %180 = vector.shape_cast %179 : vector<1x256xf32> to vector<1x1x256xf32>
    %181 = vector.broadcast %180 : vector<1x1x256xf32> to vector<1x256x256xf32>
    %182 = arith.subf %178, %181 : vector<1x256x256xf32>
    %183 = math.exp %182 : vector<1x256x256xf32>
    %cst_47 = arith.constant dense<0.000000e+00> : vector<1x256xf32>
    %184 = vector.multi_reduction <add>, %183, %cst_47 [1] : vector<1x256x256xf32> to vector<1x256xf32>
    %185 = vector.shape_cast %184 : vector<1x256xf32> to vector<1x1x256xf32>
    %186 = tpu.reciprocal %185 {approx = true} : vector<1x1x256xf32> -> vector<1x1x256xf32>
    %187 = vector.broadcast %186 : vector<1x1x256xf32> to vector<1x32x256xf32>
    %188 = arith.mulf %175, %187 : vector<1x32x256xf32>
    %189 = arith.truncf %188 : vector<1x32x256xf32> to vector<1x32x256xbf16>
    %190 = arith.truncf %183 : vector<1x256x256xf32> to vector<1x256x256xbf16>
    "tpu.trace_start"() <{level = 10 : i32, message = "hdj,hij->hdi"}> : () -> ()
    %cst_48 = arith.constant dense<0.000000e+00> : vector<1x32x256xf32>
    %191 = tpu.matmul %189, %190, %cst_48 {dimension_numbers = #tpu.dot_dimension_numbers<[2], [2], [1], [1], [0, 0, 0, 1, 1, 1], [0], [0]>} : vector<1x32x256xbf16>, vector<1x256x256xbf16>, vector<1x32x256xf32> -> vector<1x32x256xf32>
    "tpu.trace_stop"() : () -> ()
    %192 = vector.shape_cast %191 : vector<1x32x256xf32> to vector<32x256xf32>
    %193 = arith.truncf %192 : vector<32x256xf32> to vector<32x256xbf16>
    %c0_49 = arith.constant 0 : index
    %c0_50 = arith.constant 0 : index
    %194 = vector.load %arg10[%c0_49, %c0_50] : memref<32x32xbf16, #tpu.memory_space<vmem>>, vector<32x32xbf16>
    %cst_51 = arith.constant dense<0.000000e+00> : vector<32x256xf32>
    %195 = tpu.matmul %194, %193, %cst_51 {dimension_numbers = #tpu.dot_dimension_numbers<[1], [0], [0], [1], [0, 0, 1, 1], [], []>} : vector<32x32xbf16>, vector<32x256xbf16>, vector<32x256xf32> -> vector<32x256xf32>
    %196 = vector.extract_strided_slice %4 {offsets = [0, 3], sizes = [32, 1], strides = [1, 1]} : vector<32x4xf32> to vector<32x1xf32>
    %197 = vector.broadcast %196 : vector<32x1xf32> to vector<32x256xf32>
    %198 = arith.addf %195, %197 : vector<32x256xf32>
    %199 = arith.addf %198, %164 : vector<32x256xf32>
    %c0_52 = arith.constant 0 : index
    %c0_53 = arith.constant 0 : index
    %c0_54 = arith.constant 0 : index
    %200 = vector.load %arg11[%c0_52, %c0_53, %c0_54] : memref<1x32x256xf32, #tpu.memory_space<vmem>>, vector<1x32x256xf32>
    %201 = vector.shape_cast %200 : vector<1x32x256xf32> to vector<32x256xf32>
    %202 = vector.shape_cast %199 : vector<32x256xf32> to vector<1x32x256xf32>
    tpu.vector_store %arg11[%c0_52, %c0_53, %c0_54], %202 {strides = array<i32>} : memref<1x32x256xf32, #tpu.memory_space<vmem>>, vector<1x32x256xf32>,
    return
  }
  func.func @transform_0(%arg0: i32) -> (i32, i32, i32) {
    %c0_i32 = arith.constant 0 : i32
    %c0_i32_0 = arith.constant 0 : i32
    %c0_i32_1 = arith.constant 0 : i32
    return %arg0, %c0_i32, %c0_i32_0 : i32, i32, i32
  }
  func.func @transform_1(%arg0: i32) -> (i32, i32, i32) {
    %c0_i32 = arith.constant 0 : i32
    %c0_i32_0 = arith.constant 0 : i32
    %c0_i32_1 = arith.constant 0 : i32
    return %arg0, %c0_i32, %c0_i32_0 : i32, i32, i32
  }
  func.func @transform_2(%arg0: i32) -> (i32, i32) {
    %c0_i32 = arith.constant 0 : i32
    %c0_i32_0 = arith.constant 0 : i32
    %c0_i32_1 = arith.constant 0 : i32
    return %c0_i32, %c0_i32_0 : i32, i32
  }
  func.func @transform_3(%arg0: i32) -> (i32, i32) {
    %c0_i32 = arith.constant 0 : i32
    %c0_i32_0 = arith.constant 0 : i32
    %c0_i32_1 = arith.constant 0 : i32
    return %c0_i32, %c0_i32_0 : i32, i32
  }
  func.func @transform_4(%arg0: i32) -> (i32, i32) {
    %c0_i32 = arith.constant 0 : i32
    %c0_i32_0 = arith.constant 0 : i32
    %c0_i32_1 = arith.constant 0 : i32
    return %c0_i32, %c0_i32_0 : i32, i32
  }
  func.func @transform_5(%arg0: i32) -> (i32, i32) {
    %c0_i32 = arith.constant 0 : i32
    %c0_i32_0 = arith.constant 0 : i32
    %c0_i32_1 = arith.constant 0 : i32
    return %c0_i32, %c0_i32_0 : i32, i32
  }
  func.func @transform_6(%arg0: i32) -> (i32, i32) {
    %c0_i32 = arith.constant 0 : i32
    %c0_i32_0 = arith.constant 0 : i32
    %c0_i32_1 = arith.constant 0 : i32
    return %c0_i32, %c0_i32_0 : i32, i32
  }
  func.func @transform_7(%arg0: i32) -> (i32, i32) {
    %c0_i32 = arith.constant 0 : i32
    %c0_i32_0 = arith.constant 0 : i32
    %c0_i32_1 = arith.constant 0 : i32
    return %c0_i32, %c0_i32_0 : i32, i32
  }
  func.func @transform_8(%arg0: i32) -> (i32, i32) {
    %c0_i32 = arith.constant 0 : i32
    %c0_i32_0 = arith.constant 0 : i32
    %c0_i32_1 = arith.constant 0 : i32
    return %c0_i32, %c0_i32_0 : i32, i32
  }
  func.func @transform_9(%arg0: i32) -> (i32, i32) {
    %c0_i32 = arith.constant 0 : i32
    %c0_i32_0 = arith.constant 0 : i32
    %c0_i32_1 = arith.constant 0 : i32
    return %c0_i32, %c0_i32_0 : i32, i32
  }
  func.func @transform_10(%arg0: i32) -> (i32, i32, i32) {
    %c0_i32 = arith.constant 0 : i32
    %c0_i32_0 = arith.constant 0 : i32
    %c0_i32_1 = arith.constant 0 : i32
    return %arg0, %c0_i32, %c0_i32_0 : i32, i32, i32
  }
}

</mosaic_0001>

<bundles_post_ra>
// kernel: down_block_forward.1
= control target key start
LH: loop header
LB: loop body
LE: loop exit
PB: predicated region body
PF: predicated region fallthrough
CT: control target
= control target key end

     0   :  { %s3390_s13 = smov 0   ;;  %s5467_s0 = inlined_call_operand.vmem [shape: f32[2,32,256], index: 0, kind: input, shape index: {}]   ;;  %s5468_s1 = inlined_call_operand.vmem [shape: f32[2,32,1], index: 1, kind: input, shape index: {}]   ;;  %s5469_s2 = inlined_call_operand.vmem [shape: bf16[32,288], index: 2, kind: input, shape index: {}]   ;;  %s5470_s3 = inlined_call_operand.vmem [shape: bf16[32,288], index: 3, kind: input, shape index: {}]   ;;  %s5471_s4 = inlined_call_operand.vmem [shape: f32[9,256], index: 4, kind: input, shape index: {}]   ;;  %s5472_s5 = inlined_call_operand.vmem [shape: f32[32,2], index: 5, kind: input, shape index: {}]   ;;  %s5473_s6 = inlined_call_operand.vmem [shape: f32[32,4], index: 6, kind: input, shape index: {}]   ;;  %s5474_s7 = inlined_call_operand.vmem [shape: bf16[96,32], index: 7, kind: input, shape index: {}]   ;;  %s5475_s8 = inlined_call_operand.vmem [shape: f32[96,1], index: 8, kind: input, shape index: {}]   ;;  %s5476_s9 = inlined_call_operand.vmem [shape: bf16[32,32], index: 9, kind: input, shape index: {}]   ;;  %s5477_s10 = inlined_call_operand.vmem [shape: f32[2,32,256], index: 10, kind: output, shape index: {}]  }
   0x1 LB: > { %s2929_s14 = sadd.s32 4294967295, %s3321_s13   ;;  %p2933_p0 = scmp.ge.s32.totalorder %s3321_s13, 1  ;;  %s3321_s13 = sphi %s3390_s13, %s20_s13  }
   0x2   : > { %p322_p1 = scmp.lt.s32.totalorder %s3321_s13, 3 }
   0x4   : > { %p323_p2 = pnand %p2933_p0, %p322_p1 }
   0x6   : > { %326 = sbr.rel (%p323_p2) target bundleno = 2976 (0xba0), region = 60 }
   0xd   : > { %p365_p3 = scmp.lt.s32.totalorder %s2929_s14, 1  ;;  %v3323_v24 = vmov 1   ;;  %v393_v25 = vld [vmem:[%s5472_s5] sm:$0xff]  ;;  %v394_v26 = vld [vmem:[%s5472_s5 + $0x8] sm:$0xff]  ;;  %v395_v27 = vld [vmem:[%s5472_s5 + $0x10] sm:$0xff]  ;;  %v5478_v28 = vmov 0  }
   0xe   : > { %3049 = vset.pattern.permute.xlu1 %v3323_v24  ;;  %3048 = vset.pattern.permute.xlu0 %v5478_v28  ;;  %s3325_s27 = smov 17   ;;  %s3326_s28 = smov 16   ;;  %vm1005_vm8 = vcmask 261120  }
   0xf   : > { %s5670_s14 = smov (!%p365_p3, %s2929_s14), 1  ;;  %s3327_s29 = smov 15  }
  0x10   : > { %s2992_s15 = sshll.u32 %s5670_s14, 6  ;;  %s3328_s30 = smov 1  }
  0x11   : > { %s3406_s18 = scalar_lea.vmem %s5467_s0, %s2992_s15  ;;  %s3329_s11 = smov 127  }
  0x12   : > { %v3409_v0 = vld [vmem:[%s3406_s18 + $0x30] sm:$0xff]  ;;  %v3412_v1 = vld [vmem:[%s3406_s18 + $0x38] sm:$0xff]  ;;  %v3415_v2 = vld [vmem:[%s3406_s18] sm:$0xff]  ;;  %s3330_s12 = smov 113   ;;  %s3331_s16 = smov 112  }
  0x13   : > { %v410_v3 = vadd.f32 %v3412_v1, %v3409_v0  ;;  %v3420_v4 = vld [vmem:[%s3406_s18 + $0x8] sm:$0xff]  ;;  %v413_v5 = vmul.f32 %v3415_v2, %v3415_v2  ;;  %v3425_v6 = vld [vmem:[%s3406_s18 + $0x10] sm:$0xff]  ;;  %v3428_v7 = vld [vmem:[%s3406_s18 + $0x18] sm:$0xff]  ;;  %v419_v17 = vmul.f32 %v3409_v0, %v3409_v0  ;;  %v420_v18 = vmul.f32 %v3412_v1, %v3412_v1  ;;  %s3332_s20 = smov 111   ;;  %s2993_s25 = sshll.u32 %s5670_s14, 5 }
  0x14   : > { %v401_v8 = vadd.f32 %v3420_v4, %v3415_v2  ;;  %v414_v9 = vmul.f32 %v3420_v4, %v3420_v4  ;;  %v415_v10 = vmul.f32 %v3425_v6, %v3425_v6  ;;  %v416_v11 = vmul.f32 %v3428_v7, %v3428_v7  ;;  %v3439_v12 = vld [vmem:[%s3406_s18 + $0x20] sm:$0xff]  ;;  %v3442_v13 = vld [vmem:[%s3406_s18 + $0x28] sm:$0xff]  ;;  %s3696_s19 = scalar_lea.vmem %s5468_s1, %s2993_s25 }
  0x15   : > { %411 = vadd.xlane.f32.xlu1 %v410_v3  ;;  %v404_v15 = vadd.f32 %v3428_v7, %v3425_v6  ;;  %v407_v19 = vadd.f32 %v3442_v13, %v3439_v12  ;;  %v417_v20 = vmul.f32 %v3439_v12, %v3439_v12  ;;  %v418_v21 = vmul.f32 %v3442_v13, %v3442_v13 }
  0x16   : > { %402 = vadd.xlane.f32.xlu0 %v401_v8  ;;  %v421_v14 = vadd.f32 %v414_v9, %v413_v5  ;;  %v424_v16 = vadd.f32 %v416_v11, %v415_v10  ;;  %v430_v22 = vadd.f32 %v420_v18, %v419_v17  ;;  %v396_v10 = vld [vmem:[%s5472_s5 + $0x18] sm:$0xff] }
  0x17   : > { %v427_v23 = vadd.f32 %v418_v21, %v417_v20 }
  0x19   : > { %422 = vadd.xlane.f32.xlu1 %v421_v14 }
  0x1a   : > { %405 = vadd.xlane.f32.xlu0 %v404_v15 }
  0x1d   : > { %425 = vadd.xlane.f32.xlu1 %v424_v16 }
  0x1e   : > { %408 = vadd.xlane.f32.xlu0 %v407_v19 }
  0x21   : > { %431 = vadd.xlane.f32.xlu1 %v430_v22 }
  0x22   : > { %428 = vadd.xlane.f32.xlu0 %v427_v23 }
  0x32   : > { %503 = vperm.xlu1 %3049, %v393_v25  }
  0x36   : > { %508 = vperm.xlu1 %3049, %v394_v26  }
  0x3a   : > { %513 = vperm.xlu1 %3049, %v395_v27  }
  0x3e   : > { %3050 = vset.pattern.permute.xlu1 %v5478_v28 }
  0xa2   : > { %v412_v29 = vpop.xlane.xlu1 %411 }
  0xa3   : > { %v403_v30 = vpop.xlane.xlu0 %402  ;;  %v3468_v39 = vmul.f32 0.00390625, %v412_v29 }
  0xa4   : > { %v433_v31 = vmul.f32 0.00390625, %v403_v30 }
  0xa5   : > { %v444_v49 = vmul.f32 %v3468_v39, %v3468_v39 }
  0xa6   : > { %v423_v32 = vpop.xlane.xlu1 %422  ;;  %v441_v34 = vmul.f32 %v433_v31, %v433_v31  ;;  %v461_v16 = vsub.f32 %v3415_v2, %v433_v31  ;;  %v462_v17 = vsub.f32 %v3420_v4, %v433_v31 }
  0xa7   : > { %v437_v33 = vmul.f32 0.00390625, %v423_v32  ;;  %v406_v35 = vpop.xlane.xlu0 %405 }
  0xa8   : > { %v434_v36 = vmul.f32 0.00390625, %v406_v35 }
  0xa9   : > { %v445_v37 = vsub.f32 %v437_v33, %v441_v34 }
  0xaa   : > { %v426_v38 = vpop.xlane.xlu1 %425  ;;  %v442_v42 = vmul.f32 %v434_v36, %v434_v36 }
  0xab   : > { %v449_v40 = vmax.f32 %v445_v37, 0.0  ;;  %v438_v41 = vmul.f32 0.00390625, %v426_v38  ;;  %v409_v43 = vpop.xlane.xlu0 %408 }
  0xac   : > { %v3470_v44 = vmul.f32 0.00390625, %v409_v43 }
  0xad   : > { %v453_v45 = vadd.f32 1e-05, %v449_v40  ;;  %v446_v46 = vsub.f32 %v438_v41, %v442_v42 }
  0xae   : > { %v432_v47 = vpop.xlane.xlu1 %431  ;;  %v443_v52 = vmul.f32 %v3470_v44, %v3470_v44  ;;  %v465_v35 = vsub.f32 %v3439_v12, %v3470_v44 }
  0xaf   : > { %3089 = vrsqrt.f32 %v453_v45  ;;  %v450_v48 = vmax.f32 %v446_v46, 0.0  ;;  %v440_v50 = vmul.f32 0.00390625, %v432_v47  ;;  %v429_v51 = vpop.xlane.xlu0 %428  ;;  %v468_v47 = vsub.f32 %v3412_v1, %v3468_v39 }
  0xb0   : > { %v439_v53 = vmul.f32 0.00390625, %v429_v51 }
  0xb1   : > { %v454_v54 = vadd.f32 1e-05, %v450_v48  ;;  %v448_v55 = vsub.f32 %v440_v50, %v444_v49 }
  0xb2   : > { %v447_v56 = vsub.f32 %v439_v53, %v443_v52  ;;  %v504_v14 = vpop.permute.xlu1 %503 }
  0xb3   : > { %3091 = vrsqrt.f32 %v454_v54  ;;  %v452_v57 = vmax.f32 %v448_v55, 0.0 }
  0xb4   : > { %v451_v58 = vmax.f32 %v447_v56, 0.0 }
  0xb5   : > { %v456_v59 = vadd.f32 1e-05, %v452_v57 }
  0xb6   : > { %v455_v60 = vadd.f32 1e-05, %v451_v58  ;;  %v509_v15 = vpop.permute.xlu1 %508 }
  0xb8   : > { %3093 = vrsqrt.f32 %v455_v60 }
  0xb9   : > { %v3090_v61 = vpop.eup %3089  ;;  %3095 = vrsqrt.f32 %v456_v59 }
  0xba   : > { %v469_v62 = vmul.f32 %v3090_v61, %v393_v25  ;;  %v514_v18 = vpop.permute.xlu1 %513  ;;  %v463_v25 = vsub.f32 %v3425_v6, %v434_v36  ;;  %v466_v6 = vsub.f32 %v3442_v13, %v3470_v44  ;;  %v467_v44 = vsub.f32 %v3409_v0, %v3468_v39 }
  0xbc   : > { %475 = vperm.xlu0 %3048, %v469_v62  }
  0xbd   : > { %v3092_v63 = vpop.eup %3091 }
  0xbe   : > { %v470_v3 = vmul.f32 %v3092_v63, %v394_v26  ;;  %v464_v26 = vsub.f32 %v3428_v7, %v434_v36 }
  0xc0   : > { %480 = vperm.xlu1 %3050, %v470_v3  }
  0xc2   : > { %v3094_v5 = vpop.eup %3093 }
  0xc3   : > { %v471_v8 = vmul.f32 %v3094_v5, %v395_v27  ;;  %v3096_v9 = vpop.eup %3095 }
  0xc4   : > { %v472_v11 = vmul.f32 %v3096_v9, %v396_v10 }
  0xc5   : > { %485 = vperm.xlu1 %3050, %v471_v8  }
  0xc9   : > { %490 = vperm.xlu1 %3050, %v472_v11  }
  0xcd   : > { %3051 = vset.pattern.permute.xlu1 %v3323_v24 }
  0xce   : > { %518 = vperm.xlu1 %3051, %v396_v10  }
  0xd2   : > { %3052 = vset.pattern.permute.xlu1 %v5478_v28 }
 0x13b   : > { %v476_v19 = vpop.permute.xlu0 %475 }
 0x13c   : > { %v493_v20 = vmul.f32 %v476_v19, %v461_v16  ;;  %v494_v21 = vmul.f32 %v476_v19, %v462_v17 }
 0x13e   : > { %v3483_v22 = vadd.f32 %v504_v14, %v493_v20  ;;  %v3485_v23 = vadd.f32 %v504_v14, %v494_v21 }
 0x13f   : > { %v481_v27 = vpop.permute.xlu1 %480 }
 0x140   : > { %v529_v29 = vsub.f32 0.0, %v3483_v22  ;;  %v530_v30 = vsub.f32 0.0, %v3485_v23  ;;  %v495_v2 = vmul.f32 %v481_v27, %v463_v25  ;;  %v496_v32 = vmul.f32 %v481_v27, %v464_v26 }
 0x142   : > { %v537_v4 = vmul.f32 1.442695, %v529_v29  ;;  %v539_v31 = vmul.f32 1.442695, %v530_v30  ;;  %v3491_v33 = vadd.f32 %v509_v15, %v495_v2  ;;  %v3493_v34 = vadd.f32 %v509_v15, %v496_v32 }
 0x144   : > { %3097 = vpow2.f32 %v537_v4  ;;  %v531_v7 = vsub.f32 0.0, %v3491_v33  ;;  %v532_v36 = vsub.f32 0.0, %v3493_v34  ;;  %v486_v37 = vpop.permute.xlu1 %485 }
 0x145   : > { %3099 = vpow2.f32 %v539_v31  ;;  %v497_v38 = vmul.f32 %v486_v37, %v465_v35  ;;  %v498_v40 = vmul.f32 %v486_v37, %v466_v6  ;;  %v601_v31 = vlaneseq  ;;  %v3661_v37 = vld [vmem:[%s5471_s4 + $0x8] sm:$0xff] }
 0x146   : > { %v541_v41 = vmul.f32 1.442695, %v531_v7  ;;  %v543_v42 = vmul.f32 1.442695, %v532_v36  ;;  %v3656_v36 = vld [vmem:[%s5471_s4] sm:$0xff] }
 0x147   : > { %v525_v43 = vadd.f32 %v514_v18, %v497_v38  ;;  %v3501_v45 = vadd.f32 %v514_v18, %v498_v40  ;;  %v3646_v6 = vand.u32 127, %v601_v31 }
 0x148   : > { %3101 = vpow2.f32 %v541_v41  ;;  %v491_v46 = vpop.permute.xlu1 %490 }
 0x149   : > { %3103 = vpow2.f32 %v543_v42  ;;  %v533_v12 = vsub.f32 0.0, %v525_v43  ;;  %v534_v13 = vsub.f32 0.0, %v3501_v45  ;;  %v499_v50 = vmul.f32 %v491_v46, %v467_v44 }
 0x14a   : > { %v500_v51 = vmul.f32 %v491_v46, %v468_v47  ;;  %vm603_vm0 = vcmp.lt.s32.totalorder %v3646_v6, 17  ;;  %vm648_vm1 = vcmp.lt.s32.totalorder %v3646_v6, 16  ;;  %vm693_vm2 = vcmp.lt.s32.totalorder %v3646_v6, 15 }
 0x14b   : > { %v545_v48 = vmul.f32 1.442695, %v533_v12  ;;  %v547_v49 = vmul.f32 1.442695, %v534_v13  ;;  %vm738_vm3 = vcmp.lt.s32.totalorder %v3646_v6, 1  ;;  %vm787_vm4 = vcmp.lt.s32.totalorder %v3646_v6, 127 }
 0x14c   : > { %vm832_vm5 = vcmp.lt.s32.totalorder %v3646_v6, 113  ;;  %vm877_vm6 = vcmp.lt.s32.totalorder %v3646_v6, 112  ;;  %vm922_vm7 = vcmp.lt.s32.totalorder %v3646_v6, 111  ;;  %v3080_v6 = vld [vmem:[%s5470_s3 + $0x20] ss:$12 sps:$4 sm:$0xff]  }
 0x14d   : > { %3105 = vpow2.f32 %v545_v48  ;;  %v519_v52 = vpop.permute.xlu1 %518 }
 0x14e   : > { %v3098_v53 = vpop.eup %3097  ;;  %3107 = vpow2.f32 %v547_v49  ;;  %v527_v54 = vadd.f32 %v519_v52, %v499_v50  ;;  %v528_v55 = vadd.f32 %v519_v52, %v500_v51 }
 0x14f   : > { %v3100_v56 = vpop.eup %3099  ;;  %v553_v57 = vadd.f32 1.0, %v3098_v53 }
 0x150   : > { %v554_v58 = vadd.f32 1.0, %v3100_v56  ;;  %v535_v59 = vsub.f32 0.0, %v527_v54  ;;  %v536_v60 = vsub.f32 0.0, %v528_v55 }
 0x151   : > { %3109 = vrcp.f32 %v553_v57 }
 0x152   : > { %v3102_v0 = vpop.eup %3101  ;;  %v549_v61 = vmul.f32 1.442695, %v535_v59  ;;  %3111 = vrcp.f32 %v554_v58  ;;  %v551_v39 = vmul.f32 1.442695, %v536_v60  ;;  %v952_v58 = vld [vmem:[%s3696_s19 + $0x8] sm:$0xff] }
 0x153   : > { %v3104_v62 = vpop.eup %3103  ;;  %v555_v1 = vadd.f32 1.0, %v3102_v0 }
 0x154   : > { %v556_v63 = vadd.f32 1.0, %v3104_v62  ;;  %3113 = vpow2.f32 %v549_v61 }
 0x155   : > { %3115 = vrcp.f32 %v555_v1 }
 0x156   : > { %3117 = vrcp.f32 %v556_v63 }
 0x157   : > { %v3106_v3 = vpop.eup %3105  ;;  %3119 = vpow2.f32 %v551_v39 }
 0x158   : > { %v3108_v5 = vpop.eup %3107  ;;  %v557_v8 = vadd.f32 1.0, %v3106_v3 }
 0x159   : > { %v558_v9 = vadd.f32 1.0, %v3108_v5  ;;  %v954_v5 = vld [vmem:[%s3696_s19 + $0x18] sm:$0xff] }
 0x15a   : > { %3121 = vrcp.f32 %v557_v8 }
 0x15b   : > { %v3110_v10 = vpop.eup %3109  ;;  %3123 = vrcp.f32 %v558_v9 }
 0x15c   : > { %v3509_v11 = vmul.f32 %v3110_v10, %v3483_v22  ;;  %v3112_v14 = vpop.eup %3111 }
 0x15d   : > { %v3514_v19 = vmul.f32 %v3112_v14, %v3485_v23 }
 0x15e   : > { %v3114_v15 = vpop.eup %3113  ;;  %585 = vrot.lane.b32.xlu1 %v3509_v11, %s3325_s27 }
 0x15f   : > { %v3116_v16 = vpop.eup %3115  ;;  %v559_v17 = vadd.f32 1.0, %v3114_v15  ;;  %v951_v15 = vld [vmem:[%s3696_s19] sm:$0xff] }
 0x160   : > { %v3118_v18 = vpop.eup %3117  ;;  %v3517_v20 = vmul.f32 %v3116_v16, %v3491_v33  ;;  %v3639_v33 = vshrl.u32 %v601_v31, 7 }
 0x161   : > { %v3120_v21 = vpop.eup %3119  ;;  %3125 = vrcp.f32 %v559_v17  ;;  %v3524_v26 = vmul.f32 %v3118_v18, %v3493_v34  ;;  %v3067_v34 = vld [vmem:[%s5469_s2 + $0x4] ss:$12 sps:$4 sm:$0xff]  }
 0x162   : > { %v560_v22 = vadd.f32 1.0, %v3120_v21  ;;  %587 = vrot.lane.b32.xlu0 %v3517_v20, %s3325_s27  ;;  %593 = vrot.lane.b32.xlu1 %v3514_v19, %s3325_s27  ;;  %v614_v7 = vsub.s32 0, %v3639_v33  ;;  %v659_v61 = vsub.s32 1, %v3639_v33 }
 0x163   : > { %1044 = vmatprep.mubr.bf16.mxu0 %v3067_v34 }
 0x164   : > { %v3122_v25 = vpop.eup %3121  ;;  %3127 = vrcp.f32 %v560_v22  ;;  %v3667_v41 = vrot.slane %v3656_v36, %v614_v7  ;;  %v3670_v42 = vrot.slane %v3661_v37, %v614_v7  ;;  %v3718_v16 = vrot.slane %v3656_v36, %v659_v61 }
 0x165   : > { %v3526_v27 = vmul.f32 %v3122_v25, %v525_v43  ;;  %v3124_v23 = vpop.eup %3123  ;;  %v3721_v17 = vrot.slane %v3661_v37, %v659_v61  ;;  %v953_v25 = vld [vmem:[%s3696_s19 + $0x10] sm:$0xff] }
 0x166   : > { %595 = vrot.lane.b32.xlu0 %v3524_v26, %s3325_s27  ;;  %v3533_v29 = vmul.f32 %v3124_v23, %v3501_v45 }
 0x167   : > { %589 = vrot.lane.b32.xlu1 %v3526_v27, %s3325_s27 }
 0x16b   : > { %v3126_v30 = vpop.eup %3125  ;;  %597 = vrot.lane.b32.xlu1 %v3533_v29, %s3325_s27 }
 0x16c   : > { %v3537_v2 = vmul.f32 %v3126_v30, %v527_v54 }
 0x16e   : > { %v3128_v32 = vpop.eup %3127  ;;  %591 = vrot.lane.b32.xlu0 %v3537_v2, %s3325_s27 }
 0x16f   : > { %632 = vrot.lane.b32.xlu1 %v3509_v11, %s3326_s28  ;;  %v3543_v4 = vmul.f32 %v3128_v32, %v528_v55 }
 0x172   : > { %599 = vrot.lane.b32.xlu0 %v3543_v4, %s3325_s27 }
 0x173   : > { %640 = vrot.lane.b32.xlu1 %v3514_v19, %s3326_s28 }
 0x176   : > { %634 = vrot.lane.b32.xlu0 %v3517_v20, %s3326_s28 }
 0x177   : > { %636 = vrot.lane.b32.xlu1 %v3526_v27, %s3326_s28 }
 0x17a   : > { %642 = vrot.lane.b32.xlu0 %v3524_v26, %s3326_s28 }
 0x17b   : > { %644 = vrot.lane.b32.xlu1 %v3533_v29, %s3326_s28 }
 0x17e   : > { %638 = vrot.lane.b32.xlu0 %v3537_v2, %s3326_s28 }
 0x17f   : > { %677 = vrot.lane.b32.xlu1 %v3509_v11, %s3327_s29 }
 0x182   : > { %646 = vrot.lane.b32.xlu0 %v3543_v4, %s3326_s28 }
 0x183   : > { %685 = vrot.lane.b32.xlu1 %v3514_v19, %s3327_s29 }
 0x186   : > { %679 = vrot.lane.b32.xlu0 %v3517_v20, %s3327_s29 }
 0x187   : > { %681 = vrot.lane.b32.xlu1 %v3526_v27, %s3327_s29 }
 0x18a   : > { %687 = vrot.lane.b32.xlu0 %v3524_v26, %s3327_s29 }
 0x18b   : > { %689 = vrot.lane.b32.xlu1 %v3533_v29, %s3327_s29 }
 0x18e   : > { %683 = vrot.lane.b32.xlu0 %v3537_v2, %s3327_s29 }
 0x18f   : > { %722 = vrot.lane.b32.xlu1 %v3509_v11, %s3328_s30 }
 0x192   : > { %691 = vrot.lane.b32.xlu0 %v3543_v4, %s3327_s29 }
 0x193   : > { %730 = vrot.lane.b32.xlu1 %v3514_v19, %s3328_s30 }
 0x196   : > { %724 = vrot.lane.b32.xlu0 %v3517_v20, %s3328_s30 }
 0x197   : > { %726 = vrot.lane.b32.xlu1 %v3526_v27, %s3328_s30 }
 0x19a   : > { %732 = vrot.lane.b32.xlu0 %v3524_v26, %s3328_s30 }
 0x19b   : > { %734 = vrot.lane.b32.xlu1 %v3533_v29, %s3328_s30 }
 0x19e   : > { %728 = vrot.lane.b32.xlu0 %v3537_v2, %s3328_s30 }
 0x19f   : > { %771 = vrot.lane.b32.xlu1 %v3509_v11, %s3329_s11 }
 0x1a2   : > { %736 = vrot.lane.b32.xlu0 %v3543_v4, %s3328_s30 }
 0x1a3   : > { %779 = vrot.lane.b32.xlu1 %v3514_v19, %s3329_s11 }
 0x1a6   : > { %773 = vrot.lane.b32.xlu0 %v3517_v20, %s3329_s11 }
 0x1a7   : > { %775 = vrot.lane.b32.xlu1 %v3526_v27, %s3329_s11 }
 0x1aa   : > { %781 = vrot.lane.b32.xlu0 %v3524_v26, %s3329_s11 }
 0x1ab   : > { %783 = vrot.lane.b32.xlu1 %v3533_v29, %s3329_s11 }
 0x1ae   : > { %777 = vrot.lane.b32.xlu0 %v3537_v2, %s3329_s11 }
 0x1af   : > { %816 = vrot.lane.b32.xlu1 %v3509_v11, %s3330_s12 }
 0x1b2   : > { %785 = vrot.lane.b32.xlu0 %v3543_v4, %s3329_s11 }
 0x1b3   : > { %824 = vrot.lane.b32.xlu1 %v3514_v19, %s3330_s12 }
 0x1b6   : > { %818 = vrot.lane.b32.xlu0 %v3517_v20, %s3330_s12 }
 0x1b7   : > { %820 = vrot.lane.b32.xlu1 %v3526_v27, %s3330_s12 }
 0x1ba   : > { %826 = vrot.lane.b32.xlu0 %v3524_v26, %s3330_s12 }
 0x1bb   : > { %828 = vrot.lane.b32.xlu1 %v3533_v29, %s3330_s12 }
 0x1be   : > { %822 = vrot.lane.b32.xlu0 %v3537_v2, %s3330_s12 }
 0x1bf   : > { %861 = vrot.lane.b32.xlu1 %v3509_v11, %s3331_s16 }
 0x1c2   : > { %830 = vrot.lane.b32.xlu0 %v3543_v4, %s3330_s12 }
 0x1c3   : > { %869 = vrot.lane.b32.xlu1 %v3514_v19, %s3331_s16 }
 0x1c6   : > { %863 = vrot.lane.b32.xlu0 %v3517_v20, %s3331_s16 }
 0x1c7   : > { %865 = vrot.lane.b32.xlu1 %v3526_v27, %s3331_s16 }
 0x1ca   : > { %871 = vrot.lane.b32.xlu0 %v3524_v26, %s3331_s16 }
 0x1cb   : > { %873 = vrot.lane.b32.xlu1 %v3533_v29, %s3331_s16 }
 0x1ce   : > { %867 = vrot.lane.b32.xlu0 %v3537_v2, %s3331_s16 }
 0x1cf   : > { %906 = vrot.lane.b32.xlu1 %v3509_v11, %s3332_s20 }
 0x1d0   : > { %v586_v35 = vpop.permute.xlu1 %585 }
 0x1d2   : > { %875 = vrot.lane.b32.xlu0 %v3543_v4, %s3331_s16 }
 0x1d3   : > { %914 = vrot.lane.b32.xlu1 %v3514_v19, %s3332_s20 }
 0x1d4   : > { %v594_v38 = vpop.permute.xlu1 %593  ;;  %v588_v40 = vpop.permute.xlu0 %587 }
 0x1d5   : > { %v608_v43 = vsel %vm603_vm0, %v594_v38, %v586_v35  ;;  %v604_v45 = vsel %vm603_vm0, %v586_v35, %v594_v38 }
 0x1d6   : > { %908 = vrot.lane.b32.xlu0 %v3517_v20, %s3332_s20  ;;  %v621_v47 = vmul.f32 %v3670_v42, %v604_v45  ;;  %v620_v49 = vmul.f32 %v3667_v41, %v608_v43 }
 0x1d7   : > { %910 = vrot.lane.b32.xlu1 %v3526_v27, %s3332_s20 }
 0x1d8   : > { %v596_v46 = vpop.permute.xlu0 %595 }
 0x1d9   : > { %v590_v12 = vpop.permute.xlu1 %589  ;;  %v609_v13 = vsel %vm603_vm0, %v596_v46, %v588_v40  ;;  %v605_v44 = vsel %vm603_vm0, %v588_v40, %v596_v46 }
 0x1da   : > { %916 = vrot.lane.b32.xlu0 %v3524_v26, %s3332_s20  ;;  %v623_v48 = vmul.f32 %v3670_v42, %v605_v44  ;;  %v622_v50 = vmul.f32 %v3667_v41, %v609_v13 }
 0x1db   : > { %918 = vrot.lane.b32.xlu1 %v3533_v29, %s3332_s20 }
 0x1dc   : > { %v629_v51 = vpack.c.bf16 %v623_v48, %v621_v47  ;;  %v628_v52 = vpack.c.bf16 %v622_v50, %v620_v49  ;;  %v704_v48 = vsub.s32 2, %v3639_v33 }
 0x1dd   : > { %v598_v53 = vpop.permute.xlu1 %597 }
 0x1de   : > { %912 = vrot.lane.b32.xlu0 %v3537_v2, %s3332_s20  ;;  %1012 = vmatprep.subr.bf16.mxu0 %v629_v51  ;;  %v606_v56 = vsel %vm603_vm0, %v590_v12, %v598_v53  ;;  %v610_v57 = vsel %vm603_vm0, %v598_v53, %v590_v12 }
 0x1df   : > { %1013 = vmatpush1.bf16.msra.mxu0 %v628_v52  ;;  %v624_v1 = vmul.f32 %v3667_v41, %v610_v57  ;;  %v625_v39 = vmul.f32 %v3670_v42, %v606_v56  ;;  %957 = vperm.xlu1 %3052, %v951_v15  }
 0x1e0   : > { %v592_v54 = vpop.permute.xlu0 %591 }
 0x1e1   : > { %v633_v55 = vpop.permute.xlu1 %632 }
 0x1e2   : > { %920 = vrot.lane.b32.xlu0 %v3543_v4, %s3332_s20 }
 0x1e3   : > { %967 = vperm.xlu1 %3052, %v953_v25  }
 0x1e4   : > { %v600_v59 = vpop.permute.xlu0 %599 }
 0x1e5   : > { %v607_v60 = vsel %vm603_vm0, %v592_v54, %v600_v59  ;;  %v611_v0 = vsel %vm603_vm0, %v600_v59, %v592_v54  ;;  %v641_v62 = vpop.permute.xlu1 %640  ;;  %v3756_v59 = vrot.slane %v3661_v37, %v704_v48 }
 0x1e6   : > { %v626_v63 = vmul.f32 %v3667_v41, %v611_v0  ;;  %v627_v3 = vmul.f32 %v3670_v42, %v607_v60  ;;  %962 = vperm.xlu0 %3048, %v952_v58   ;;  %v649_v18 = vsel %vm648_vm1, %v633_v55, %v641_v62  ;;  %v653_v21 = vsel %vm648_vm1, %v641_v62, %v633_v55 }
 0x1e7   : > { %v665_v31 = vmul.f32 %v3718_v16, %v653_v21  ;;  %v666_v34 = vmul.f32 %v3721_v17, %v649_v18  ;;  %3053 = vset.pattern.permute.xlu1 %v3323_v24  ;;  %v3753_v58 = vrot.slane %v3656_v36, %v704_v48 }
 0x1e8   : > { %v635_v8 = vpop.permute.xlu0 %634  ;;  %v631_v9 = vpack.c.bf16 %v627_v3, %v625_v39  ;;  %v630_v10 = vpack.c.bf16 %v626_v63, %v624_v1 }
 0x1e9   : > { %v637_v14 = vpop.permute.xlu1 %636 }
 0x1ea   : > { %972 = vperm.xlu0 %3048, %v954_v5   ;;  %1014 = vmatprep.subr.bf16.mxu0 %v631_v9 }
 0x1eb   : > { %1015 = vmatpush1.bf16.msra.mxu0 %v630_v10 }
 0x1ec   : > { %v643_v22 = vpop.permute.xlu0 %642 }
 0x1ed   : > { %v650_v23 = vsel %vm648_vm1, %v635_v8, %v643_v22  ;;  %v654_v30 = vsel %vm648_vm1, %v643_v22, %v635_v8  ;;  %v645_v32 = vpop.permute.xlu1 %644 }
 0x1ee   : > { %v667_v35 = vmul.f32 %v3718_v16, %v654_v30  ;;  %v668_v7 = vmul.f32 %v3721_v17, %v650_v23  ;;  %3054 = vset.pattern.permute.xlu0 %v3323_v24  ;;  %v651_v46 = vsel %vm648_vm1, %v637_v14, %v645_v32  ;;  %v655_v12 = vsel %vm648_vm1, %v645_v32, %v637_v14 }
 0x1ef   : > { %v669_v50 = vmul.f32 %v3718_v16, %v655_v12  ;;  %v670_v51 = vmul.f32 %v3721_v17, %v651_v46  ;;  %v749_v30 = vsub.s32 3, %v3639_v33 }
 0x1f0   : > { %v639_v38 = vpop.permute.xlu0 %638  ;;  %v674_v40 = vpack.c.bf16 %v668_v7, %v666_v34  ;;  %v673_v43 = vpack.c.bf16 %v667_v35, %v665_v31 }
 0x1f1   : > { %v678_v45 = vpop.permute.xlu1 %677  ;;  %v3785_v46 = vrot.slane %v3656_v36, %v749_v30  ;;  %v3788_v12 = vrot.slane %v3661_v37, %v749_v30 }
 0x1f2   : > { %1016 = vmatprep.subr.bf16.mxu0 %v674_v40 }
 0x1f3   : > { %1017 = vmatpush1.bf16.msra.mxu0 %v673_v43 }
 0x1f4   : > { %v647_v13 = vpop.permute.xlu0 %646 }
 0x1f5   : > { %v652_v44 = vsel %vm648_vm1, %v639_v38, %v647_v13  ;;  %v656_v47 = vsel %vm648_vm1, %v647_v13, %v639_v38  ;;  %v686_v49 = vpop.permute.xlu1 %685 }
 0x1f6   : > { %v671_v52 = vmul.f32 %v3718_v16, %v656_v47  ;;  %v672_v53 = vmul.f32 %v3721_v17, %v652_v44  ;;  %v694_v60 = vsel %vm693_vm2, %v678_v45, %v686_v49  ;;  %v698_v0 = vsel %vm693_vm2, %v686_v49, %v678_v45 }
 0x1f7   : > { %v710_v63 = vmul.f32 %v3753_v58, %v698_v0  ;;  %v711_v3 = vmul.f32 %v3756_v59, %v694_v60 }
 0x1f8   : > { %v680_v54 = vpop.permute.xlu0 %679  ;;  %v676_v55 = vpack.c.bf16 %v672_v53, %v670_v51  ;;  %v675_v56 = vpack.c.bf16 %v671_v52, %v669_v50 }
 0x1f9   : > { %v682_v57 = vpop.permute.xlu1 %681 }
 0x1fa   : > { %1018 = vmatprep.subr.bf16.mxu0 %v676_v55 }
 0x1fb   : > { %1019 = vmatpush1.bf16.msra.mxu0 %v675_v56 }
 0x1fc   : > { %v688_v61 = vpop.permute.xlu0 %687 }
 0x1fd   : > { %v695_v62 = vsel %vm693_vm2, %v680_v54, %v688_v61  ;;  %v699_v1 = vsel %vm693_vm2, %v688_v61, %v680_v54  ;;  %v690_v39 = vpop.permute.xlu1 %689 }
 0x1fe   : > { %v712_v5 = vmul.f32 %v3753_v58, %v699_v1  ;;  %v713_v8 = vmul.f32 %v3756_v59, %v695_v62  ;;  %v696_v18 = vsel %vm693_vm2, %v682_v57, %v690_v39  ;;  %v700_v21 = vsel %vm693_vm2, %v690_v39, %v682_v57 }
 0x1ff   : > { %v714_v31 = vmul.f32 %v3753_v58, %v700_v21  ;;  %v715_v34 = vmul.f32 %v3756_v59, %v696_v18 }
 0x200   : > { %v684_v9 = vpop.permute.xlu0 %683  ;;  %v719_v10 = vpack.c.bf16 %v713_v8, %v711_v3  ;;  %v718_v14 = vpack.c.bf16 %v712_v5, %v710_v63 }
 0x201   : > { %v723_v15 = vpop.permute.xlu1 %722 }
 0x202   : > { %1020 = vmatprep.subr.bf16.mxu0 %v719_v10  ;;  %v798_v10 = vsub.s32 5, %v3639_v33 }
 0x203   : > { %1021 = vmatpush1.bf16.msra.mxu0 %v718_v14 }
 0x204   : > { %v692_v22 = vpop.permute.xlu0 %691 }
 0x205   : > { %v697_v25 = vsel %vm693_vm2, %v684_v9, %v692_v22  ;;  %v701_v23 = vsel %vm693_vm2, %v692_v22, %v684_v9  ;;  %v731_v32 = vpop.permute.xlu1 %730  ;;  %v768_v22 = vpack.c.bf16 %v3524_v26, %v3514_v19  ;;  %v770_v26 = vpack.c.bf16 %v3543_v4, %v3533_v29 }
 0x206   : > { %v716_v35 = vmul.f32 %v3753_v58, %v701_v23  ;;  %v717_v7 = vmul.f32 %v3756_v59, %v697_v25  ;;  %v739_v13 = vsel %vm738_vm3, %v723_v15, %v731_v32  ;;  %v743_v44 = vsel %vm738_vm3, %v731_v32, %v723_v15 }
 0x207   : > { %v755_v51 = vmul.f32 %v3785_v46, %v743_v44  ;;  %v756_v52 = vmul.f32 %v3788_v12, %v739_v13  ;;  %v3819_v25 = vrot.slane %v3661_v37, %v798_v10 }
 0x208   : > { %v725_v38 = vpop.permute.xlu0 %724  ;;  %v721_v40 = vpack.c.bf16 %v717_v7, %v715_v34  ;;  %v720_v43 = vpack.c.bf16 %v716_v35, %v714_v31  ;;  %v767_v34 = vpack.c.bf16 %v3517_v20, %v3509_v11  ;;  %v3833_v7 = vrot.slane %v3656_v36, %v798_v10 }
 0x209   : > { %v727_v45 = vpop.permute.xlu1 %726 }
 0x20a   : > { %1022 = vmatprep.subr.bf16.mxu0 %v721_v40 }
 0x20b   : > { %1023 = vmatpush1.bf16.msra.mxu0 %v720_v43 }
 0x20c   : > { %v733_v47 = vpop.permute.xlu0 %732 }
 0x20d   : > { %v740_v48 = vsel %vm738_vm3, %v725_v38, %v733_v47  ;;  %v744_v49 = vsel %vm738_vm3, %v733_v47, %v725_v38  ;;  %v735_v50 = vpop.permute.xlu1 %734 }
 0x20e   : > { %v757_v53 = vmul.f32 %v3785_v46, %v744_v49  ;;  %v758_v54 = vmul.f32 %v3788_v12, %v740_v48  ;;  %v741_v0 = vsel %vm738_vm3, %v727_v45, %v735_v50  ;;  %v745_v61 = vsel %vm738_vm3, %v735_v50, %v727_v45 }
 0x20f   : > { %v759_v3 = vmul.f32 %v3785_v46, %v745_v61  ;;  %v760_v5 = vmul.f32 %v3788_v12, %v741_v0  ;;  %v769_v45 = vpack.c.bf16 %v3537_v2, %v3526_v27  ;;  %v843_v27 = vsub.s32 6, %v3639_v33 }
 0x210   : > { %v729_v55 = vpop.permute.xlu0 %728  ;;  %v764_v56 = vpack.c.bf16 %v758_v54, %v756_v52  ;;  %v763_v57 = vpack.c.bf16 %v757_v53, %v755_v51 }
 0x211   : > { %v772_v60 = vpop.permute.xlu1 %771  ;;  %v3857_v0 = vrot.slane %v3656_v36, %v843_v27  ;;  %v3860_v61 = vrot.slane %v3661_v37, %v843_v27 }
 0x212   : > { %1024 = vmatprep.subr.bf16.mxu0 %v764_v56 }
 0x213   : > { %1025 = vmatpush1.bf16.msra.mxu0 %v763_v57 }
 0x214   : > { %v737_v62 = vpop.permute.xlu0 %736 }
 0x215   : > { %v742_v1 = vsel %vm738_vm3, %v729_v55, %v737_v62  ;;  %v746_v39 = vsel %vm738_vm3, %v737_v62, %v729_v55  ;;  %v780_v63 = vpop.permute.xlu1 %779 }
 0x216   : > { %v761_v8 = vmul.f32 %v3785_v46, %v746_v39  ;;  %v762_v9 = vmul.f32 %v3788_v12, %v742_v1  ;;  %v792_v30 = vsel %vm787_vm4, %v780_v63, %v772_v60  ;;  %v788_v38 = vsel %vm787_vm4, %v772_v60, %v780_v63 }
 0x217   : > { %v805_v40 = vmul.f32 %v3819_v25, %v792_v30  ;;  %v804_v29 = vmul.f32 %v3833_v7, %v788_v38 }
 0x218   : > { %v774_v14 = vpop.permute.xlu0 %773  ;;  %v766_v15 = vpack.c.bf16 %v762_v9, %v760_v5  ;;  %v765_v18 = vpack.c.bf16 %v761_v8, %v759_v3 }
 0x219   : > { %v776_v21 = vpop.permute.xlu1 %775 }
 0x21a   : > { %1026 = vmatprep.subr.bf16.mxu0 %v766_v15 }
 0x21b   : > { %1027 = vmatpush1.bf16.msra.mxu0 %v765_v18 }
 0x21c   : > { %1028 = vmatprep.subr.bf16.mxu0 %v768_v22  ;;  %v782_v23 = vpop.permute.xlu0 %781 }
 0x21d   : > { %v793_v32 = vsel %vm787_vm4, %v782_v23, %v774_v14  ;;  %v784_v31 = vpop.permute.xlu1 %783  ;;  %v789_v35 = vsel %vm787_vm4, %v774_v14, %v782_v23 }
 0x21e   : > { %v807_v19 = vmul.f32 %v3819_v25, %v793_v32  ;;  %v806_v11 = vmul.f32 %v3833_v7, %v789_v35  ;;  %v790_v4 = vsel %vm787_vm4, %v776_v21, %v784_v31  ;;  %v794_v44 = vsel %vm787_vm4, %v784_v31, %v776_v21 }
 0x21f   : > { %1029 = vmatpush1.bf16.msra.mxu0 %v767_v34  ;;  %v808_v51 = vmul.f32 %v3833_v7, %v790_v4  ;;  %v809_v52 = vmul.f32 %v3819_v25, %v794_v44  ;;  %v888_v35 = vsub.s32 7, %v3639_v33 }
 0x220   : > { %1030 = vmatprep.subr.bf16.mxu0 %v770_v26  ;;  %v778_v43 = vpop.permute.xlu0 %777  ;;  %v813_v13 = vpack.c.bf16 %v807_v19, %v805_v40  ;;  %v812_v50 = vpack.c.bf16 %v806_v11, %v804_v29 }
 0x221   : > { %v817_v20 = vpop.permute.xlu1 %816  ;;  %v3889_v29 = vrot.slane %v3656_v36, %v888_v35  ;;  %v3892_v33 = vrot.slane %v3661_v37, %v888_v35 }
 0x223   : > { %1031 = vmatpush1.bf16.msra.mxu0 %v769_v45 }
 0x224   : > { %1032 = vmatprep.subr.bf16.mxu0 %v813_v13  ;;  %v786_v47 = vpop.permute.xlu0 %785 }
 0x225   : > { %v791_v48 = vsel %vm787_vm4, %v778_v43, %v786_v47  ;;  %v795_v49 = vsel %vm787_vm4, %v786_v47, %v778_v43  ;;  %v825_v2 = vpop.permute.xlu1 %824 }
 0x226   : > { %v810_v53 = vmul.f32 %v3833_v7, %v791_v48  ;;  %v811_v54 = vmul.f32 %v3819_v25, %v795_v49  ;;  %v833_v62 = vsel %vm832_vm5, %v817_v20, %v825_v2  ;;  %v837_v1 = vsel %vm832_vm5, %v825_v2, %v817_v20 }
 0x227   : > { %1033 = vmatpush1.bf16.msra.mxu0 %v812_v50  ;;  %v849_v8 = vmul.f32 %v3857_v0, %v833_v62  ;;  %v850_v9 = vmul.f32 %v3860_v61, %v837_v1 }
 0x228   : > { %v819_v55 = vpop.permute.xlu0 %818  ;;  %v815_v56 = vpack.c.bf16 %v811_v54, %v809_v52  ;;  %v814_v57 = vpack.c.bf16 %v810_v53, %v808_v51 }
 0x229   : > { %v821_v60 = vpop.permute.xlu1 %820 }
 0x22a   : > { %1034 = vmatprep.subr.bf16.mxu0 %v815_v56 }
 0x22b   : > { %1035 = vmatpush1.bf16.msra.mxu0 %v814_v57 }
 0x22c   : > { %v827_v39 = vpop.permute.xlu0 %826 }
 0x22d   : > { %v834_v63 = vsel %vm832_vm5, %v819_v55, %v827_v39  ;;  %v838_v3 = vsel %vm832_vm5, %v827_v39, %v819_v55  ;;  %v829_v5 = vpop.permute.xlu1 %828 }
 0x22e   : > { %v851_v10 = vmul.f32 %v3857_v0, %v834_v63  ;;  %v852_v14 = vmul.f32 %v3860_v61, %v838_v3  ;;  %v835_v23 = vsel %vm832_vm5, %v821_v60, %v829_v5  ;;  %v839_v30 = vsel %vm832_vm5, %v829_v5, %v821_v60 }
 0x22f   : > { %v853_v26 = vmul.f32 %v3857_v0, %v835_v23  ;;  %v854_v38 = vmul.f32 %v3860_v61, %v839_v30  ;;  %v3068_v30 = vld [vmem:[%s5469_s2 + $0x1c] ss:$12 sps:$4 sm:$0xff]  }
 0x230   : > { %v823_v15 = vpop.permute.xlu0 %822  ;;  %v858_v18 = vpack.c.bf16 %v852_v14, %v850_v9  ;;  %v857_v21 = vpack.c.bf16 %v851_v10, %v849_v8 }
 0x231   : > { %v862_v22 = vpop.permute.xlu1 %861 }
 0x232   : > { %1036 = vmatprep.subr.bf16.mxu0 %v858_v18  ;;  %v2940_v18 = vld [vmem:[%s5471_s4 + $0x10] ss:$0 sm:$0xff] }
 0x233   : > { %1037 = vmatpush1.bf16.msra.mxu0 %v857_v21  ;;  %v2941_v21 = vld [vmem:[%s5471_s4 + $0x18] ss:$0 sm:$0xff] }
 0x234   : > { %v831_v32 = vpop.permute.xlu0 %830 }
 0x235   : > { %v836_v31 = vsel %vm832_vm5, %v823_v15, %v831_v32  ;;  %v840_v34 = vsel %vm832_vm5, %v831_v32, %v823_v15  ;;  %v870_v19 = vpop.permute.xlu1 %869  ;;  %v3065_v15 = vld [vmem:[%s5469_s2] ss:$12 sps:$4 sm:$0xff]  }
 0x236   : > { %v855_v40 = vmul.f32 %v3857_v0, %v836_v31  ;;  %v856_v43 = vmul.f32 %v3860_v61, %v840_v34  ;;  %v878_v4 = vsel %vm877_vm6, %v862_v22, %v870_v19  ;;  %v882_v44 = vsel %vm877_vm6, %v870_v19, %v862_v22 }
 0x237   : > { %v894_v27 = vmul.f32 %v3889_v29, %v878_v4  ;;  %v895_v37 = vmul.f32 %v3892_v33, %v882_v44 }
 0x238   : > { %v864_v11 = vpop.permute.xlu0 %863  ;;  %v860_v20 = vpack.c.bf16 %v856_v43, %v854_v38  ;;  %v859_v45 = vpack.c.bf16 %v855_v40, %v853_v26 }
 0x239   : > { %v866_v13 = vpop.permute.xlu1 %865 }
 0x23a   : > { %1038 = vmatprep.subr.bf16.mxu0 %v860_v20 }
 0x23b   : > { %1039 = vmatpush1.bf16.msra.mxu0 %v859_v45  ;;  %v3070_v45 = vld [vmem:[%s5469_s2 + $0x18] ss:$12 sps:$4 sm:$0xff]  }
 0x23c   : > { %v872_v47 = vpop.permute.xlu0 %871 }
 0x23d   : > { %v879_v48 = vsel %vm877_vm6, %v864_v11, %v872_v47  ;;  %v883_v49 = vsel %vm877_vm6, %v872_v47, %v864_v11  ;;  %v874_v36 = vpop.permute.xlu1 %873 }
 0x23e   : > { %v896_v2 = vmul.f32 %v3889_v29, %v879_v48  ;;  %v897_v50 = vmul.f32 %v3892_v33, %v883_v49  ;;  %v880_v55 = vsel %vm877_vm6, %v866_v13, %v874_v36  ;;  %v884_v56 = vsel %vm877_vm6, %v874_v36, %v866_v13 }
 0x23f   : > { %v898_v39 = vmul.f32 %v3889_v29, %v880_v55  ;;  %v899_v63 = vmul.f32 %v3892_v33, %v884_v56 }
 0x240   : > { %v868_v51 = vpop.permute.xlu0 %867  ;;  %v903_v52 = vpack.c.bf16 %v897_v50, %v895_v37  ;;  %v902_v53 = vpack.c.bf16 %v896_v2, %v894_v27 }
 0x241   : > { %v907_v54 = vpop.permute.xlu1 %906 }
 0x242   : > { %1040 = vmatprep.subr.bf16.mxu0 %v903_v52  ;;  %v3072_v52 = vld [vmem:[%s5469_s2 + $0x20] ss:$12 sps:$4 sm:$0xff]  }
 0x243   : > { %1041 = vmatpush1.bf16.msra.mxu0 %v902_v53 }
 0x244   : > { %v876_v57 = vpop.permute.xlu0 %875 }
 0x245   : > { %v881_v60 = vsel %vm877_vm6, %v868_v51, %v876_v57  ;;  %v885_v62 = vsel %vm877_vm6, %v876_v57, %v868_v51  ;;  %v915_v1 = vpop.permute.xlu1 %914  ;;  %v3071_v51 = vld [vmem:[%s5469_s2 + $0x8] ss:$12 sps:$4 sm:$0xff]  }
 0x246   : > { %v900_v3 = vmul.f32 %v3889_v29, %v881_v60  ;;  %v901_v5 = vmul.f32 %v3892_v33, %v885_v62  ;;  %v923_v22 = vsel %vm922_vm7, %v907_v54, %v915_v1  ;;  %v927_v23 = vsel %vm922_vm7, %v915_v1, %v907_v54 }
 0x247   : > { %v939_v35 = vmul.f32 %v2940_v18, %v923_v22  ;;  %v940_v19 = vmul.f32 %v2941_v21, %v927_v23 }
 0x248   : > { %v909_v8 = vpop.permute.xlu0 %908  ;;  %v905_v9 = vpack.c.bf16 %v901_v5, %v899_v63  ;;  %v904_v10 = vpack.c.bf16 %v900_v3, %v898_v39 }
 0x249   : > { %v911_v14 = vpop.permute.xlu1 %910 }
 0x24a   : > { %1042 = vmatprep.subr.bf16.mxu0 %v905_v9 }
 0x24b   : > { %1043 = vmatpush1.bf16.msra.mxu0 %v904_v10 }
 0x24c   : > { %v917_v32 = vpop.permute.xlu0 %916 }
 0x24d   : > { %v924_v31 = vsel %vm922_vm7, %v909_v8, %v917_v32  ;;  %v928_v34 = vsel %vm922_vm7, %v917_v32, %v909_v8  ;;  %v919_v43 = vpop.permute.xlu1 %918 }
 0x24e   : > { %v941_v26 = vmul.f32 %v2940_v18, %v924_v31  ;;  %v942_v38 = vmul.f32 %v2941_v21, %v928_v34  ;;  %1045 = vmatmul.mubr.bf16.vlgmr.msra.gmra.mrb[0].mxu0 %v3065_v15  ;;  %v925_v13 = vsel %vm922_vm7, %v911_v14, %v919_v43  ;;  %v929_v4 = vsel %vm922_vm7, %v919_v43, %v911_v14 }
 0x24f   : > { %1054 = vmatprep.mubr.bf16.mxu0 %v3068_v30  ;;  %v943_v49 = vmul.f32 %v2940_v18, %v925_v13  ;;  %v944_v36 = vmul.f32 %v2941_v21, %v929_v4 }
 0x250   : > { %v947_v40 = vpack.c.bf16 %v941_v26, %v939_v35  ;;  %v913_v11 = vpop.permute.xlu0 %912  ;;  %v948_v20 = vpack.c.bf16 %v942_v38, %v940_v19 }
 0x252   : > { %1065 = vmatprep.subr.bf16.mxu0 %v948_v20 }
 0x253   : > { %1066 = vmatpush1.bf16.msra.mxu0 %v947_v40 }
 0x254   : > { %v921_v44 = vpop.permute.xlu0 %920 }
 0x255   : > { %v926_v47 = vsel %vm922_vm7, %v913_v11, %v921_v44  ;;  %v930_v48 = vsel %vm922_vm7, %v921_v44, %v913_v11  ;;  %v4004_v44 = vld [vmem:[%s5473_s6] sm:$0xff] }
 0x256   : > { %v945_v27 = vmul.f32 %v2940_v18, %v926_v47  ;;  %v946_v37 = vmul.f32 %v2941_v21, %v930_v48  ;;  %1055 = vmatmul.mubr.bf16.gmra.mrb[4].mxu0 %v3070_v45  ;;  %v4010_v47 = vld [vmem:[%s5473_s6 + $0x8] sm:$0xff] }
 0x257   : > { %1097 = vmatprep.mubr.bf16.mxu0 %v5478_v28 }
 0x258   : > { %v949_v2 = vpack.c.bf16 %v945_v27, %v943_v49  ;;  %v950_v50 = vpack.c.bf16 %v946_v37, %v944_v36 }
 0x25a   : > { %1067 = vmatprep.subr.bf16.mxu0 %v950_v50 }
 0x25b   : > { %1068 = vmatpush1.bf16.msra.mxu0 %v949_v2 }
 0x25e   : > { %2948 = vmatmul.mubr.msk.bf16.vlgmr.msra.gmra.mrb[0].mxu0 %vm1005_vm8, %v3071_v51  ;;  %v958_v53 = vpop.permute.xlu1 %957 }
 0x25f   : > { %1107 = vmatprep.mubr.bf16.mxu0 %v5478_v28 }
 0x262   : > { %v968_v15 = vpop.permute.xlu1 %967 }
 0x265   : > { %v963_v57 = vpop.permute.xlu0 %962 }
 0x266   : > { %2949 = vmatmul.mubr.msk.bf16.gmra.mrb[4].mxu0 %vm1005_vm8, %v3072_v52 }
 0x267   : > { %1928 = vmatprep.mubr.bf16.mxu0 %v5478_v28 }
 0x269   : > { %v973_v30 = vpop.permute.xlu0 %972 }
 0x331   : > { %v1099_v54 = vpop.f32.mrb[0].mxu0 }
 0x332   : > { %v3961_v55 = vadd.f32 %v1099_v54, %v958_v53  ;;  %v1101_v56 = vpop.f32.mrb[1].mxu0 }
 0x333   : > { %v3963_v60 = vadd.f32 %v1101_v56, %v958_v53  ;;  %v1103_v62 = vpop.f32.mrb[2].mxu0 }
 0x334   : > { %v3965_v1 = vadd.f32 %v1103_v62, %v963_v57  ;;  %v1105_v39 = vpop.f32.mrb[3].mxu0  ;;  %v1130_v10 = vmul.f32 %v3961_v55, %v3961_v55 }
 0x335   : > { %v3967_v63 = vadd.f32 %v1105_v39, %v963_v57  ;;  %v1118_v3 = vadd.f32 %v3963_v60, %v3961_v55  ;;  %v1131_v14 = vmul.f32 %v3963_v60, %v3963_v60 }
 0x336   : > { %v1132_v5 = vmul.f32 %v3965_v1, %v3965_v1 }
 0x337   : > { %1119 = vadd.xlane.f32.xlu1 %v1118_v3  ;;  %v1121_v8 = vadd.f32 %v3967_v63, %v3965_v1  ;;  %v1133_v9 = vmul.f32 %v3967_v63, %v3967_v63  ;;  %v1138_v34 = vadd.f32 %v1131_v14, %v1130_v10 }
 0x339   : > { %v1109_v18 = vpop.f32.mrb[4].mxu0  ;;  %1122 = vadd.xlane.f32.xlu0 %v1121_v8  ;;  %v1141_v21 = vadd.f32 %v1133_v9, %v1132_v5 }
 0x33a   : > { %v3981_v22 = vadd.f32 %v1109_v18, %v968_v15  ;;  %v1111_v23 = vpop.f32.mrb[5].mxu0 }
 0x33b   : > { %v3983_v32 = vadd.f32 %v1111_v23, %v968_v15  ;;  %v1113_v31 = vpop.f32.mrb[6].mxu0  ;;  %1142 = vadd.xlane.f32.xlu1 %v1141_v21 }
 0x33c   : > { %v3985_v35 = vadd.f32 %v1113_v31, %v973_v30  ;;  %v1115_v19 = vpop.f32.mrb[7].mxu0  ;;  %v1134_v40 = vmul.f32 %v3981_v22, %v3981_v22 }
 0x33d   : > { %v3987_v26 = vadd.f32 %v1115_v19, %v973_v30  ;;  %1139 = vadd.xlane.f32.xlu0 %v1138_v34  ;;  %v1124_v38 = vadd.f32 %v3983_v32, %v3981_v22  ;;  %v1135_v11 = vmul.f32 %v3983_v32, %v3983_v32 }
 0x33e   : > { %v1136_v20 = vmul.f32 %v3985_v35, %v3985_v35 }
 0x33f   : > { %v1127_v43 = vadd.f32 %v3987_v26, %v3985_v35  ;;  %v1137_v45 = vmul.f32 %v3987_v26, %v3987_v26  ;;  %v1144_v13 = vadd.f32 %v1135_v11, %v1134_v40 }
 0x341   : > { %1125 = vadd.xlane.f32.xlu0 %v1124_v38  ;;  %1128 = vadd.xlane.f32.xlu1 %v1127_v43  ;;  %v1147_v4 = vadd.f32 %v1137_v45, %v1136_v20 }
 0x345   : > { %1145 = vadd.xlane.f32.xlu0 %v1144_v13  ;;  %1148 = vadd.xlane.f32.xlu1 %v1147_v4  ;;  %v4032_v4 = vld [vmem:[%s5473_s6 + $0x10] sm:$0xff] }
 0x356   : > { %1220 = vperm.xlu1 %3053, %v4004_v44  }
 0x35a   : > { %3057 = vset.pattern.permute.xlu1 %v5478_v28 }
 0x35b   : > { %1225 = vperm.xlu0 %3054, %v4010_v47  }
 0x35f   : > { %3055 = vset.pattern.permute.xlu0 %v5478_v28 }
 0x3c4   : > { %v1120_v48 = vpop.xlane.xlu1 %1119 }
 0x3c5   : > { %v4015_v36 = vmul.f32 0.00390625, %v1120_v48 }
 0x3c6   : > { %v1123_v49 = vpop.xlane.xlu0 %1122 }
 0x3c7   : > { %v1151_v27 = vmul.f32 0.00390625, %v1123_v49  ;;  %v1158_v53 = vmul.f32 %v4015_v36, %v4015_v36 }
 0x3c8   : > { %v1143_v37 = vpop.xlane.xlu1 %1142 }
 0x3c9   : > { %v1155_v2 = vmul.f32 0.00390625, %v1143_v37  ;;  %v1159_v50 = vmul.f32 %v1151_v27, %v1151_v27 }
 0x3ca   : > { %v1140_v51 = vpop.xlane.xlu0 %1139 }
 0x3cb   : > { %v1163_v52 = vsub.f32 %v1155_v2, %v1159_v50  ;;  %v1154_v54 = vmul.f32 0.00390625, %v1140_v51  ;;  %v4040_v2 = vld [vmem:[%s5473_s6 + $0x18] sm:$0xff] }
 0x3cd   : > { %v1167_v56 = vmax.f32 %v1163_v52, 0.0  ;;  %v1162_v57 = vsub.f32 %v1154_v54, %v1158_v53  ;;  %v1180_v53 = vsub.f32 %v3965_v1, %v1151_v27  ;;  %v1181_v54 = vsub.f32 %v3967_v63, %v1151_v27 }
 0x3ce   : > { %v1129_v62 = vpop.xlane.xlu1 %1128  ;;  %v1126_v39 = vpop.xlane.xlu0 %1125 }
 0x3cf   : > { %v1171_v3 = vadd.f32 1e-05, %v1167_v56  ;;  %v1166_v5 = vmax.f32 %v1162_v57, 0.0  ;;  %v4019_v8 = vmul.f32 0.00390625, %v1129_v62  ;;  %v4021_v9 = vmul.f32 0.00390625, %v1126_v39 }
 0x3d0   : > { %v1178_v39 = vsub.f32 %v3961_v55, %v4015_v36 }
 0x3d1   : > { %3129 = vrsqrt.f32 %v1171_v3  ;;  %v1170_v10 = vadd.f32 1e-05, %v1166_v5  ;;  %v1161_v14 = vmul.f32 %v4019_v8, %v4019_v8  ;;  %v1160_v23 = vmul.f32 %v4021_v9, %v4021_v9 }
 0x3d2   : > { %v1149_v15 = vpop.xlane.xlu1 %1148  ;;  %v1146_v18 = vpop.xlane.xlu0 %1145  ;;  %v1179_v3 = vsub.f32 %v3963_v60, %v4015_v36 }
 0x3d3   : > { %3131 = vrsqrt.f32 %v1170_v10  ;;  %v1157_v21 = vmul.f32 0.00390625, %v1149_v15  ;;  %v1156_v30 = vmul.f32 0.00390625, %v1146_v18 }
 0x3d5   : > { %v1165_v31 = vsub.f32 %v1157_v21, %v1161_v14  ;;  %v1164_v34 = vsub.f32 %v1156_v30, %v1160_v23 }
 0x3d6   : > { %v1221_v51 = vpop.permute.xlu1 %1220 }
 0x3d7   : > { %v1169_v19 = vmax.f32 %v1165_v31, 0.0  ;;  %v1168_v38 = vmax.f32 %v1164_v34, 0.0 }
 0x3d9   : > { %v1172_v40 = vadd.f32 1e-05, %v1168_v38  ;;  %v1173_v43 = vadd.f32 1e-05, %v1169_v19 }
 0x3da   : > { %v1226_v52 = vpop.permute.xlu0 %1225 }
 0x3db   : > { %v3130_v11 = vpop.eup %3129  ;;  %3133 = vrsqrt.f32 %v1172_v40 }
 0x3dc   : > { %v1187_v20 = vmul.f32 %v3130_v11, %v4010_v47  ;;  %3135 = vrsqrt.f32 %v1173_v43 }
 0x3dd   : > { %v3132_v45 = vpop.eup %3131 }
 0x3de   : > { %1197 = vperm.xlu1 %3057, %v1187_v20   ;;  %v1186_v13 = vmul.f32 %v3132_v45, %v4004_v44 }
 0x3e0   : > { %1192 = vperm.xlu0 %3055, %v1186_v13  }
 0x3e4   : > { %3056 = vset.pattern.permute.xlu0 %v3323_v24 }
 0x3e5   : > { %1230 = vperm.xlu0 %3056, %v4032_v4   ;;  %v3134_v48 = vpop.eup %3133 }
 0x3e6   : > { %v1188_v49 = vmul.f32 %v3134_v48, %v4032_v4  ;;  %v3136_v37 = vpop.eup %3135 }
 0x3e7   : > { %v1189_v50 = vmul.f32 %v3136_v37, %v4040_v2 }
 0x3e8   : > { %1202 = vperm.xlu1 %3057, %v1188_v49  }
 0x3ec   : > { %1207 = vperm.xlu1 %3057, %v1189_v50  }
 0x3f0   : > { %3058 = vset.pattern.permute.xlu1 %v3323_v24 }
 0x3f1   : > { %1235 = vperm.xlu1 %3058, %v4040_v2  }
 0x45d   : > { %v1198_v56 = vpop.permute.xlu1 %1197 }
 0x45e   : > { %v1212_v57 = vmul.f32 %v1198_v56, %v1180_v53  ;;  %v1213_v62 = vmul.f32 %v1198_v56, %v1181_v54  ;;  %v1184_v53 = vsub.f32 %v3985_v35, %v4019_v8  ;;  %v1185_v35 = vsub.f32 %v3987_v26, %v4019_v8 }
 0x45f   : > { %v1193_v5 = vpop.permute.xlu0 %1192 }
 0x460   : > { %v1240_v10 = vadd.f32 %v1226_v52, %v1212_v57  ;;  %v1241_v24 = vadd.f32 %v1226_v52, %v1213_v62  ;;  %v1210_v14 = vmul.f32 %v1193_v5, %v1178_v39  ;;  %v1211_v15 = vmul.f32 %v1193_v5, %v1179_v3 }
 0x461   : > { %v1182_v52 = vsub.f32 %v3981_v22, %v4021_v9  ;;  %v1183_v22 = vsub.f32 %v3983_v32, %v4021_v9 }
 0x462   : > { %v1248_v18 = vsub.f32 0.0, %v1240_v10  ;;  %v1249_v21 = vsub.f32 0.0, %v1241_v24  ;;  %v1238_v23 = vadd.f32 %v1221_v51, %v1210_v14  ;;  %v1239_v1 = vadd.f32 %v1221_v51, %v1211_v15 }
 0x464   : > { %v1258_v30 = vmul.f32 1.442695, %v1248_v18  ;;  %v1260_v63 = vmul.f32 1.442695, %v1249_v21  ;;  %v1246_v27 = vsub.f32 0.0, %v1238_v23  ;;  %v1247_v31 = vsub.f32 0.0, %v1239_v1  ;;  %v1231_v3 = vpop.permute.xlu0 %1230 }
 0x466   : > { %3137 = vpow2.f32 %v1258_v30  ;;  %v1254_v34 = vmul.f32 1.442695, %v1246_v27  ;;  %v1256_v19 = vmul.f32 1.442695, %v1247_v31 }
 0x467   : > { %3139 = vpow2.f32 %v1260_v63  ;;  %v1203_v45 = vpop.permute.xlu1 %1202 }
 0x468   : > { %3141 = vpow2.f32 %v1254_v34  ;;  %v1214_v62 = vmul.f32 %v1203_v45, %v1182_v52 }
 0x469   : > { %3143 = vpow2.f32 %v1256_v19 }
 0x46a   : > { %v1242_v14 = vadd.f32 %v1231_v3, %v1214_v62 }
 0x46b   : > { %v1208_v13 = vpop.permute.xlu1 %1207 }
 0x46c   : > { %v1216_v39 = vmul.f32 %v1208_v13, %v1184_v53  ;;  %v1217_v15 = vmul.f32 %v1208_v13, %v1185_v35  ;;  %v1250_v32 = vsub.f32 0.0, %v1242_v14 }
 0x470   : > { %v3138_v55 = vpop.eup %3137  ;;  %v1236_v56 = vpop.permute.xlu1 %1235 }
 0x471   : > { %v3140_v60 = vpop.eup %3139  ;;  %v1272_v36 = vadd.f32 1.0, %v3138_v55  ;;  %v1245_v18 = vadd.f32 %v1236_v56, %v1217_v15 }
 0x472   : > { %v3142_v38 = vpop.eup %3141  ;;  %v1273_v40 = vadd.f32 1.0, %v3140_v60 }
 0x473   : > { %v3144_v43 = vpop.eup %3143  ;;  %3145 = vrcp.f32 %v1272_v36  ;;  %v1270_v11 = vadd.f32 1.0, %v3142_v38  ;;  %v1253_v26 = vsub.f32 0.0, %v1245_v18 }
 0x474   : > { %3147 = vrcp.f32 %v1273_v40  ;;  %v1271_v20 = vadd.f32 1.0, %v3144_v43 }
 0x475   : > { %3149 = vrcp.f32 %v1270_v11  ;;  %v1268_v30 = vmul.f32 1.442695, %v1253_v26 }
 0x476   : > { %3151 = vrcp.f32 %v1271_v20 }
 0x47d   : > { %v3146_v48 = vpop.eup %3145 }
 0x47e   : > { %v3148_v49 = vpop.eup %3147  ;;  %v4051_v37 = vmul.f32 %v3146_v48, %v1240_v10  ;;  %v1244_v10 = vadd.f32 %v1236_v56, %v1216_v39 }
 0x47f   : > { %v3150_v50 = vpop.eup %3149  ;;  %v4061_v57 = vmul.f32 %v3148_v49, %v1241_v24  ;;  %v1215_v24 = vmul.f32 %v1203_v45, %v1183_v22 }
 0x480   : > { %v4053_v51 = vmul.f32 %v3150_v50, %v1238_v23  ;;  %1304 = vrot.lane.b32.xlu1 %v4051_v37, %s3325_s27  ;;  %v3152_v54 = vpop.eup %3151  ;;  %v1252_v21 = vsub.f32 0.0, %v1244_v10  ;;  %v3075_v50 = vld [vmem:[%s5470_s3 + $0x4] ss:$12 sps:$4 sm:$0xff]  }
 0x481   : > { %v4065_v5 = vmul.f32 %v3152_v54, %v1239_v1  ;;  %v1243_v23 = vadd.f32 %v1231_v3, %v1215_v24  ;;  %v1262_v1 = vmul.f32 1.442695, %v1250_v32  ;;  %1678 = vmatprep.mubr.bf16.mxu1 %v3075_v50 }
 0x482   : > { %1302 = vrot.lane.b32.xlu0 %v4053_v51, %s3325_s27  ;;  %v1266_v8 = vmul.f32 1.442695, %v1252_v21 }
 0x483   : > { %v1251_v9 = vsub.f32 0.0, %v1243_v23 }
 0x484   : > { %1312 = vrot.lane.b32.xlu1 %v4061_v57, %s3325_s27  ;;  %3153 = vpow2.f32 %v1266_v8 }
 0x485   : > { %3155 = vpow2.f32 %v1262_v1  ;;  %v1264_v63 = vmul.f32 1.442695, %v1251_v9  ;;  %v3333_v9 = vmov 2  }
 0x486   : > { %1310 = vrot.lane.b32.xlu0 %v4065_v5, %s3325_s27  ;;  %3157 = vpow2.f32 %v1268_v30  ;;  %3060 = vset.pattern.permute.xlu1 %v3333_v9 }
 0x487   : > { %3159 = vpow2.f32 %v1264_v63  ;;  %3059 = vset.pattern.permute.xlu0 %v3333_v9 }
 0x488   : > { %1340 = vrot.lane.b32.xlu1 %v4051_v37, %s3326_s28 }
 0x48a   : > { %1338 = vrot.lane.b32.xlu0 %v4053_v51, %s3326_s28 }
 0x48c   : > { %1348 = vrot.lane.b32.xlu1 %v4061_v57, %s3326_s28 }
 0x48e   : > { %1346 = vrot.lane.b32.xlu0 %v4065_v5, %s3326_s28  ;;  %v3154_v27 = vpop.eup %3153 }
 0x48f   : > { %v3156_v31 = vpop.eup %3155  ;;  %v1276_v34 = vadd.f32 1.0, %v3154_v27 }
 0x490   : > { %1376 = vrot.lane.b32.xlu1 %v4051_v37, %s3327_s29  ;;  %v3158_v19 = vpop.eup %3157  ;;  %v1274_v55 = vadd.f32 1.0, %v3156_v31 }
 0x491   : > { %v3160_v60 = vpop.eup %3159  ;;  %v1277_v36 = vadd.f32 1.0, %v3158_v19  ;;  %3161 = vrcp.f32 %v1276_v34 }
 0x492   : > { %1374 = vrot.lane.b32.xlu0 %v4053_v51, %s3327_s29  ;;  %v1275_v38 = vadd.f32 1.0, %v3160_v60  ;;  %3163 = vrcp.f32 %v1274_v55 }
 0x493   : > { %3165 = vrcp.f32 %v1277_v36 }
 0x494   : > { %1384 = vrot.lane.b32.xlu1 %v4061_v57, %s3327_s29  ;;  %3167 = vrcp.f32 %v1275_v38 }
 0x496   : > { %1382 = vrot.lane.b32.xlu0 %v4065_v5, %s3327_s29 }
 0x498   : > { %1412 = vrot.lane.b32.xlu1 %v4051_v37, %s3328_s30 }
 0x49a   : > { %1410 = vrot.lane.b32.xlu0 %v4053_v51, %s3328_s30 }
 0x49b   : > { %v3162_v40 = vpop.eup %3161 }
 0x49c   : > { %1420 = vrot.lane.b32.xlu1 %v4061_v57, %s3328_s30  ;;  %v3164_v43 = vpop.eup %3163  ;;  %v4113_v11 = vmul.f32 %v3162_v40, %v1244_v10 }
 0x49d   : > { %v3166_v20 = vpop.eup %3165  ;;  %v4117_v45 = vmul.f32 %v3164_v43, %v1242_v14 }
 0x49e   : > { %1418 = vrot.lane.b32.xlu0 %v4065_v5, %s3328_s30  ;;  %v3168_v13 = vpop.eup %3167  ;;  %v4121_v48 = vmul.f32 %v3166_v20, %v1245_v18 }
 0x49f   : > { %v4125_v49 = vmul.f32 %v3168_v13, %v1243_v23 }
 0x4a0   : > { %1452 = vrot.lane.b32.xlu1 %v4051_v37, %s3329_s11 }
 0x4a2   : > { %1450 = vrot.lane.b32.xlu0 %v4053_v51, %s3329_s11 }
 0x4a4   : > { %1460 = vrot.lane.b32.xlu1 %v4061_v57, %s3329_s11 }
 0x4a6   : > { %1458 = vrot.lane.b32.xlu0 %v4065_v5, %s3329_s11 }
 0x4a8   : > { %1488 = vrot.lane.b32.xlu1 %v4051_v37, %s3330_s12 }
 0x4aa   : > { %1486 = vrot.lane.b32.xlu0 %v4053_v51, %s3330_s12 }
 0x4ac   : > { %1496 = vrot.lane.b32.xlu1 %v4061_v57, %s3330_s12 }
 0x4ae   : > { %1494 = vrot.lane.b32.xlu0 %v4065_v5, %s3330_s12 }
 0x4b0   : > { %1308 = vrot.lane.b32.xlu1 %v4113_v11, %s3325_s27 }
 0x4b2   : > { %1306 = vrot.lane.b32.xlu0 %v4117_v45, %s3325_s27 }
 0x4b4   : > { %1316 = vrot.lane.b32.xlu1 %v4121_v48, %s3325_s27 }
 0x4b6   : > { %1314 = vrot.lane.b32.xlu0 %v4125_v49, %s3325_s27  ;;  %s5446_s27 = scalar_lea.vmem %s5477_s10, %s2992_s15 }
 0x4b8   : > { %1344 = vrot.lane.b32.xlu1 %v4113_v11, %s3326_s28 }
 0x4ba   : > { %1342 = vrot.lane.b32.xlu0 %v4117_v45, %s3326_s28 }
 0x4bc   : > { %1352 = vrot.lane.b32.xlu1 %v4121_v48, %s3326_s28 }
 0x4be   : > { %1350 = vrot.lane.b32.xlu0 %v4125_v49, %s3326_s28 }
 0x4c0   : > { %1380 = vrot.lane.b32.xlu1 %v4113_v11, %s3327_s29 }
 0x4c2   : > { %1378 = vrot.lane.b32.xlu0 %v4117_v45, %s3327_s29 }
 0x4c4   : > { %1388 = vrot.lane.b32.xlu1 %v4121_v48, %s3327_s29 }
 0x4c6   : > { %1386 = vrot.lane.b32.xlu0 %v4125_v49, %s3327_s29 }
 0x4c8   : > { %1416 = vrot.lane.b32.xlu1 %v4113_v11, %s3328_s30 }
 0x4ca   : > { %1414 = vrot.lane.b32.xlu0 %v4117_v45, %s3328_s30 }
 0x4cc   : > { %1424 = vrot.lane.b32.xlu1 %v4121_v48, %s3328_s30 }
 0x4ce   : > { %1422 = vrot.lane.b32.xlu0 %v4125_v49, %s3328_s30 }
 0x4d0   : > { %1524 = vrot.lane.b32.xlu1 %v4051_v37, %s3331_s16 }
 0x4d2   : > { %1522 = vrot.lane.b32.xlu0 %v4053_v51, %s3331_s16 }
 0x4d4   : > { %1532 = vrot.lane.b32.xlu1 %v4061_v57, %s3331_s16 }
 0x4d6   : > { %1454 = vrot.lane.b32.xlu0 %v4117_v45, %s3329_s11 }
 0x4d8   : > { %1456 = vrot.lane.b32.xlu1 %v4113_v11, %s3329_s11 }
 0x4da   : > { %1462 = vrot.lane.b32.xlu0 %v4125_v49, %s3329_s11 }
 0x4dc   : > { %1464 = vrot.lane.b32.xlu1 %v4121_v48, %s3329_s11 }
 0x4de   : > { %1490 = vrot.lane.b32.xlu0 %v4117_v45, %s3330_s12 }
 0x4e0   : > { %1492 = vrot.lane.b32.xlu1 %v4113_v11, %s3330_s12 }
 0x4e2   : > { %1498 = vrot.lane.b32.xlu0 %v4125_v49, %s3330_s12 }
 0x4e4   : > { %1500 = vrot.lane.b32.xlu1 %v4121_v48, %s3330_s12 }
 0x4e6   : > { %1530 = vrot.lane.b32.xlu0 %v4065_v5, %s3331_s16 }
 0x4e8   : > { %1528 = vrot.lane.b32.xlu1 %v4113_v11, %s3331_s16 }
 0x4ea   : > { %1526 = vrot.lane.b32.xlu0 %v4117_v45, %s3331_s16 }
 0x4ec   : > { %1536 = vrot.lane.b32.xlu1 %v4121_v48, %s3331_s16 }
 0x4ee   : > { %1534 = vrot.lane.b32.xlu0 %v4125_v49, %s3331_s16 }
 0x4f0   : > { %1560 = vrot.lane.b32.xlu1 %v4051_v37, %s3332_s20 }
 0x4f2   : > { %v1305_v52 = vpop.permute.xlu1 %1304  ;;  %1558 = vrot.lane.b32.xlu0 %v4053_v51, %s3332_s20 }
 0x4f4   : > { %1568 = vrot.lane.b32.xlu1 %v4061_v57, %s3332_s20  ;;  %v1303_v53 = vpop.permute.xlu0 %1302 }
 0x4f6   : > { %v1313_v54 = vpop.permute.xlu1 %1312  ;;  %1566 = vrot.lane.b32.xlu0 %v4065_v5, %s3332_s20 }
 0x4f7   : > { %v1319_v56 = vsel %vm603_vm0, %v1305_v52, %v1313_v54  ;;  %v1323_v62 = vsel %vm603_vm0, %v1313_v54, %v1305_v52 }
 0x4f8   : > { %1564 = vrot.lane.b32.xlu1 %v4113_v11, %s3332_s20  ;;  %v1311_v39 = vpop.permute.xlu0 %1310  ;;  %v1328_v35 = vmul.f32 %v1323_v62, %v3667_v41  ;;  %v1329_v15 = vmul.f32 %v1319_v56, %v3670_v42 }
 0x4f9   : > { %v1318_v3 = vsel %vm603_vm0, %v1303_v53, %v1311_v39  ;;  %v1322_v22 = vsel %vm603_vm0, %v1311_v39, %v1303_v53 }
 0x4fa   : > { %v1326_v10 = vmul.f32 %v1322_v22, %v3667_v41  ;;  %v1341_v24 = vpop.permute.xlu1 %1340  ;;  %1562 = vrot.lane.b32.xlu0 %v4117_v45, %s3332_s20  ;;  %v1327_v14 = vmul.f32 %v1318_v3, %v3670_v42 }
 0x4fc   : > { %1572 = vrot.lane.b32.xlu1 %v4121_v48, %s3332_s20  ;;  %v1339_v18 = vpop.permute.xlu0 %1338  ;;  %v1335_v21 = vpack.c.bf16 %v1329_v15, %v1327_v14  ;;  %v1334_v23 = vpack.c.bf16 %v1328_v35, %v1326_v10 }
 0x4fe   : > { %v1349_v32 = vpop.permute.xlu1 %1348  ;;  %1570 = vrot.lane.b32.xlu0 %v4125_v49, %s3332_s20  ;;  %1646 = vmatprep.subr.bf16.mxu1 %v1335_v21 }
 0x4ff   : > { %1647 = vmatpush1.bf16.msra.mxu1 %v1334_v23  ;;  %v1355_v53 = vsel %vm648_vm1, %v1341_v24, %v1349_v32 }
 0x500   : > { %v1347_v26 = vpop.permute.xlu0 %1346  ;;  %1599 = vperm.xlu1 %3060, %v4010_v47   ;;  %v1365_v21 = vmul.f32 %v1355_v53, %v3721_v17 }
 0x501   : > { %v1354_v20 = vsel %vm648_vm1, %v1339_v18, %v1347_v26  ;;  %v1358_v56 = vsel %vm648_vm1, %v1347_v26, %v1339_v18  ;;  %v1359_v18 = vsel %vm648_vm1, %v1349_v32, %v1341_v24 }
 0x502   : > { %v4218_v8 = vpop.permute.xlu1 %1376  ;;  %1595 = vperm.xlu0 %3059, %v4004_v44   ;;  %v1363_v62 = vmul.f32 %v1354_v20, %v3721_v17  ;;  %v1362_v23 = vmul.f32 %v1358_v56, %v3718_v16 }
 0x504   : > { %v1375_v1 = vpop.permute.xlu0 %1374  ;;  %1603 = vperm.xlu1 %3060, %v4032_v4  }
 0x506   : > { %v4222_v30 = vpop.permute.xlu1 %1384  ;;  %1607 = vperm.xlu0 %3059, %v4040_v2  }
 0x507   : > { %v1391_v32 = vsel %vm693_vm2, %v4218_v8, %v4222_v30 }
 0x508   : > { %v1383_v63 = vpop.permute.xlu0 %1382  ;;  %3061 = vset.pattern.permute.xlu1 %v5478_v28 }
 0x509   : > { %v1390_v20 = vsel %vm693_vm2, %v1375_v1, %v1383_v63  ;;  %v1394_v53 = vsel %vm693_vm2, %v1383_v63, %v1375_v1  ;;  %v1395_v1 = vsel %vm693_vm2, %v4222_v30, %v4218_v8  ;;  %v1401_v63 = vmul.f32 %v1391_v32, %v3756_v59 }
 0x50a   : > { %v4226_v27 = vpop.permute.xlu1 %1412  ;;  %3062 = vset.pattern.permute.xlu0 %v5478_v28 }
 0x50c   : > { %v4228_v31 = vpop.permute.xlu0 %1410 }
 0x50e   : > { %v4232_v34 = vpop.permute.xlu1 %1420 }
 0x510   : > { %v4234_v44 = vpop.permute.xlu0 %1418 }
 0x512   : > { %v4236_v47 = vpop.permute.xlu1 %1452 }
 0x514   : > { %v4238_v19 = vpop.permute.xlu0 %1450 }
 0x516   : > { %v4240_v55 = vpop.permute.xlu1 %1460 }
 0x518   : > { %v4242_v4 = vpop.permute.xlu0 %1458 }
 0x51a   : > { %v4244_v2 = vpop.permute.xlu1 %1488 }
 0x51c   : > { %v4246_v60 = vpop.permute.xlu0 %1486 }
 0x51e   : > { %v4248_v36 = vpop.permute.xlu1 %1496 }
 0x520   : > { %v4250_v38 = vpop.permute.xlu0 %1494 }
 0x522   : > { %v1309_v40 = vpop.permute.xlu1 %1308 }
 0x524   : > { %v1307_v43 = vpop.permute.xlu0 %1306 }
 0x526   : > { %v1317_v13 = vpop.permute.xlu1 %1316 }
 0x527   : > { %v1321_v50 = vsel %vm603_vm0, %v1309_v40, %v1317_v13  ;;  %v1325_v52 = vsel %vm603_vm0, %v1317_v13, %v1309_v40 }
 0x528   : > { %v1315_v54 = vpop.permute.xlu0 %1314  ;;  %v1332_v22 = vmul.f32 %v1325_v52, %v3667_v41  ;;  %v1333_v35 = vmul.f32 %v1321_v50, %v3670_v42 }
 0x529   : > { %v1320_v39 = vsel %vm603_vm0, %v1307_v43, %v1315_v54  ;;  %v1324_v3 = vsel %vm603_vm0, %v1315_v54, %v1307_v43  ;;  %v1364_v43 = vmul.f32 %v1359_v18, %v3718_v16  ;;  %v1399_v54 = vmul.f32 %v1390_v20, %v3756_v59 }
 0x52a   : > { %v1330_v10 = vmul.f32 %v1324_v3, %v3667_v41  ;;  %v1331_v14 = vmul.f32 %v1320_v39, %v3670_v42  ;;  %v1345_v15 = vpop.permute.xlu1 %1344  ;;  %v1371_v41 = vpack.c.bf16 %v1365_v21, %v1363_v62  ;;  %v1430_v20 = vsel %vm738_vm3, %v4234_v44, %v4228_v31 }
 0x52b   : > { %v1370_v52 = vpack.c.bf16 %v1364_v43, %v1362_v23  ;;  %v1400_v23 = vmul.f32 %v1395_v1, %v3753_v58 }
 0x52c   : > { %v1343_v26 = vpop.permute.xlu0 %1342  ;;  %v1337_v9 = vpack.c.bf16 %v1333_v35, %v1331_v14  ;;  %v1336_v40 = vpack.c.bf16 %v1332_v22, %v1330_v10  ;;  %v1398_v14 = vmul.f32 %v1394_v53, %v3753_v58 }
 0x52e   : > { %v1353_v13 = vpop.permute.xlu1 %1352  ;;  %1648 = vmatprep.subr.bf16.mxu1 %v1337_v9  ;;  %v1427_v9 = vsel %vm738_vm3, %v4226_v27, %v4232_v34  ;;  %v1406_v43 = vpack.c.bf16 %v1400_v23, %v1398_v14 }
 0x52f   : > { %v1357_v42 = vsel %vm648_vm1, %v1345_v15, %v1353_v13  ;;  %v1361_v24 = vsel %vm648_vm1, %v1353_v13, %v1345_v15  ;;  %1649 = vmatpush1.bf16.msra.mxu1 %v1336_v40 }
 0x530   : > { %1650 = vmatprep.subr.bf16.mxu1 %v1371_v41  ;;  %v1351_v50 = vpop.permute.xlu0 %1350  ;;  %v1368_v39 = vmul.f32 %v1361_v24, %v3718_v16  ;;  %v1369_v3 = vmul.f32 %v1357_v42, %v3721_v17 }
 0x531   : > { %v1356_v56 = vsel %vm648_vm1, %v1343_v26, %v1351_v50  ;;  %v1360_v62 = vsel %vm648_vm1, %v1351_v50, %v1343_v26  ;;  %v1407_v26 = vpack.c.bf16 %v1401_v63, %v1399_v54 }
 0x532   : > { %v1366_v22 = vmul.f32 %v1360_v62, %v3718_v16  ;;  %v1367_v35 = vmul.f32 %v1356_v56, %v3721_v17  ;;  %v1381_v10 = vpop.permute.xlu1 %1380  ;;  %v1426_v16 = vsel %vm738_vm3, %v4228_v31, %v4234_v44  ;;  %v1431_v31 = vsel %vm738_vm3, %v4232_v34, %v4226_v27 }
 0x533   : > { %1651 = vmatpush1.bf16.msra.mxu1 %v1370_v52  ;;  %v1435_v13 = vmul.f32 %v1426_v16, %v3788_v12  ;;  %v1437_v44 = vmul.f32 %v1427_v9, %v3788_v12  ;;  %v1446_v9 = vpack.c.bf16 %v4051_v37, %v4053_v51 }
 0x534   : > { %v1379_v15 = vpop.permute.xlu0 %1378  ;;  %v1373_v18 = vpack.c.bf16 %v1369_v3, %v1367_v35  ;;  %v1372_v21 = vpack.c.bf16 %v1368_v39, %v1366_v22  ;;  %v1434_v39 = vmul.f32 %v1430_v20, %v3785_v46  ;;  %v1467_v20 = vsel %vm787_vm4, %v4236_v47, %v4240_v55 }
 0x535   : > { %v1443_v22 = vpack.c.bf16 %v1437_v44, %v1435_v13 }
 0x536   : > { %v1389_v17 = vpop.permute.xlu1 %1388  ;;  %1652 = vmatprep.subr.bf16.mxu1 %v1373_v18 }
 0x537   : > { %v1393_v8 = vsel %vm693_vm2, %v1381_v10, %v1389_v17  ;;  %v1397_v30 = vsel %vm693_vm2, %v1389_v17, %v1381_v10  ;;  %1653 = vmatpush1.bf16.msra.mxu1 %v1372_v21 }
 0x538   : > { %1654 = vmatprep.subr.bf16.mxu1 %v1407_v26  ;;  %v1387_v40 = vpop.permute.xlu0 %1386  ;;  %v1404_v24 = vmul.f32 %v1397_v30, %v3753_v58  ;;  %v1405_v32 = vmul.f32 %v1393_v8, %v3756_v59  ;;  %v1447_v8 = vpack.c.bf16 %v4061_v57, %v4065_v5  ;;  %v1471_v30 = vsel %vm787_vm4, %v4240_v55, %v4236_v47 }
 0x539   : > { %v1392_v41 = vsel %vm693_vm2, %v1379_v15, %v1387_v40  ;;  %v1396_v42 = vsel %vm693_vm2, %v1387_v40, %v1379_v15  ;;  %v1466_v57 = vsel %vm787_vm4, %v4238_v19, %v4242_v4  ;;  %v1477_v13 = vmul.f32 %v1471_v30, %v3819_v25 }
 0x53a   : > { %v1402_v50 = vmul.f32 %v1396_v42, %v3753_v58  ;;  %v1403_v52 = vmul.f32 %v1392_v41, %v3756_v59  ;;  %v1417_v53 = vpop.permute.xlu1 %1416  ;;  %v1436_v58 = vmul.f32 %v1431_v31, %v3785_v46  ;;  %v1474_v51 = vmul.f32 %v1466_v57, %v3833_v7 }
 0x53b   : > { %1655 = vmatpush1.bf16.msra.mxu1 %v1406_v43  ;;  %v1449_v43 = vpack.c.bf16 %v4121_v48, %v4125_v49  ;;  %v1476_v49 = vmul.f32 %v1467_v20, %v3833_v7  ;;  %v1506_v47 = vsel %vm832_vm5, %v4250_v38, %v4246_v60  ;;  %v1502_v31 = vsel %vm832_vm5, %v4246_v60, %v4250_v38 }
 0x53c   : > { %v1415_v54 = vpop.permute.xlu0 %1414  ;;  %v1409_v56 = vpack.c.bf16 %v1405_v32, %v1403_v52  ;;  %v1408_v62 = vpack.c.bf16 %v1404_v24, %v1402_v50  ;;  %v1442_v1 = vpack.c.bf16 %v1436_v58, %v1434_v39  ;;  %v1507_v50 = vsel %vm832_vm5, %v4248_v36, %v4244_v2 }
 0x53d   : > { %v1511_v44 = vmul.f32 %v1506_v47, %v3860_v61  ;;  %v1513_v39 = vmul.f32 %v1507_v50, %v3860_v61  ;;  %v3301_v50 = vld [vmem:[%s5471_s4 + $0x10] ss:$0 sm:$0xff] }
 0x53e   : > { %v1425_v3 = vpop.permute.xlu1 %1424  ;;  %1656 = vmatprep.subr.bf16.mxu1 %v1409_v56 }
 0x53f   : > { %v1429_v59 = vsel %vm738_vm3, %v1417_v53, %v1425_v3  ;;  %v1433_v35 = vsel %vm738_vm3, %v1425_v3, %v1417_v53  ;;  %1657 = vmatpush1.bf16.msra.mxu1 %v1408_v62  ;;  %v1482_v53 = vpack.c.bf16 %v1476_v49, %v1474_v51  ;;  %v1503_v62 = vsel %vm832_vm5, %v4244_v2, %v4248_v36 }
 0x540   : > { %1658 = vmatprep.subr.bf16.mxu1 %v1443_v22  ;;  %v1423_v27 = vpop.permute.xlu0 %1422  ;;  %v1440_v63 = vmul.f32 %v1433_v35, %v3785_v46  ;;  %v1441_v14 = vmul.f32 %v1429_v59, %v3788_v12  ;;  %v1510_v22 = vmul.f32 %v1502_v31, %v3857_v0  ;;  %v1519_v59 = vpack.c.bf16 %v1513_v39, %v1511_v44 }
 0x541   : > { %v1428_v34 = vsel %vm738_vm3, %v1415_v54, %v1423_v27  ;;  %v1432_v10 = vsel %vm738_vm3, %v1423_v27, %v1415_v54 }
 0x542   : > { %v1438_v15 = vmul.f32 %v1432_v10, %v3785_v46  ;;  %v1439_v18 = vmul.f32 %v1428_v34, %v3788_v12  ;;  %v4348_v21 = vpop.permute.xlu1 %1524  ;;  %v1470_v46 = vsel %vm787_vm4, %v4242_v4, %v4238_v19  ;;  %v1448_v4 = vpack.c.bf16 %v4113_v11, %v4117_v45 }
 0x543   : > { %1659 = vmatpush1.bf16.msra.mxu1 %v1442_v1  ;;  %v1475_v5 = vmul.f32 %v1470_v46, %v3819_v25 }
 0x544   : > { %v4350_v23 = vpop.permute.xlu0 %1522  ;;  %v1445_v16 = vpack.c.bf16 %v1441_v14, %v1439_v18  ;;  %v1444_v17 = vpack.c.bf16 %v1440_v63, %v1438_v15 }
 0x545   : > { %v1483_v48 = vpack.c.bf16 %v1477_v13, %v1475_v5 }
 0x546   : > { %v4352_v26 = vpop.permute.xlu1 %1532  ;;  %1660 = vmatprep.subr.bf16.mxu1 %v1445_v16 }
 0x547   : > { %1661 = vmatpush1.bf16.msra.mxu1 %v1444_v17  ;;  %v1543_v1 = vsel %vm877_vm6, %v4352_v26, %v4348_v21  ;;  %v1539_v46 = vsel %vm877_vm6, %v4348_v21, %v4352_v26 }
 0x548   : > { %1662 = vmatprep.subr.bf16.mxu1 %v1447_v8  ;;  %v1455_v12 = vpop.permute.xlu0 %1454 }
 0x54a   : > { %v1457_v40 = vpop.permute.xlu1 %1456 }
 0x54b   : > { %1663 = vmatpush1.bf16.msra.mxu1 %v1446_v9 }
 0x54c   : > { %1664 = vmatprep.subr.bf16.mxu1 %v1449_v43  ;;  %v1463_v37 = vpop.permute.xlu0 %1462 }
 0x54d   : > { %v1472_v19 = vsel %vm787_vm4, %v1463_v37, %v1455_v12  ;;  %v1468_v24 = vsel %vm787_vm4, %v1455_v12, %v1463_v37  ;;  %v1549_v12 = vmul.f32 %v1543_v1, %v3892_v33  ;;  %v3079_v1 = vld [vmem:[%s5470_s3 + $0x8] ss:$12 sps:$4 sm:$0xff]  }
 0x54e   : > { %v1465_v41 = vpop.permute.xlu1 %1464  ;;  %v1479_v11 = vmul.f32 %v1472_v19, %v3819_v25 }
 0x54f   : > { %v1469_v55 = vsel %vm787_vm4, %v1457_v40, %v1465_v41  ;;  %v1473_v42 = vsel %vm787_vm4, %v1465_v41, %v1457_v40  ;;  %1665 = vmatpush1.bf16.msra.mxu1 %v1448_v4  ;;  %v1548_v40 = vmul.f32 %v1539_v46, %v3889_v29 }
 0x550   : > { %v1481_v45 = vmul.f32 %v1473_v42, %v3819_v25  ;;  %1666 = vmatprep.subr.bf16.mxu1 %v1483_v48  ;;  %v1491_v32 = vpop.permute.xlu0 %1490  ;;  %v1480_v52 = vmul.f32 %v1469_v55, %v3833_v7  ;;  %v1478_v25 = vmul.f32 %v1468_v24, %v3833_v7  ;;  %v1512_v7 = vmul.f32 %v1503_v62, %v3857_v0  ;;  %v3073_v42 = vld [vmem:[%s5470_s3] ss:$12 sps:$4 sm:$0xff]  }
 0x552   : > { %v1493_v54 = vpop.permute.xlu1 %1492  ;;  %v1485_v56 = vpack.c.bf16 %v1481_v45, %v1479_v11  ;;  %v1484_v38 = vpack.c.bf16 %v1480_v52, %v1478_v25  ;;  %v1518_v15 = vpack.c.bf16 %v1512_v7, %v1510_v22  ;;  %v3078_v22 = vld [vmem:[%s5470_s3 + $0x18] ss:$12 sps:$4 sm:$0xff]  }
 0x553   : > { %1667 = vmatpush1.bf16.msra.mxu1 %v1482_v53  ;;  %v3302_v53 = vld [vmem:[%s5471_s4 + $0x18] ss:$0 sm:$0xff] }
 0x554   : > { %1668 = vmatprep.subr.bf16.mxu1 %v1485_v56  ;;  %v1499_v3 = vpop.permute.xlu0 %1498 }
 0x555   : > { %v1508_v60 = vsel %vm832_vm5, %v1499_v3, %v1491_v32  ;;  %v1504_v36 = vsel %vm832_vm5, %v1491_v32, %v1499_v3 }
 0x556   : > { %v1501_v58 = vpop.permute.xlu1 %1500  ;;  %v1515_v27 = vmul.f32 %v1508_v60, %v3860_v61  ;;  %v1514_v8 = vmul.f32 %v1504_v36, %v3857_v0 }
 0x557   : > { %v1505_v35 = vsel %vm832_vm5, %v1493_v54, %v1501_v58  ;;  %v1509_v2 = vsel %vm832_vm5, %v1501_v58, %v1493_v54  ;;  %1669 = vmatpush1.bf16.msra.mxu1 %v1484_v38 }
 0x558   : > { %v1517_v34 = vmul.f32 %v1509_v2, %v3860_v61  ;;  %1670 = vmatprep.subr.bf16.mxu1 %v1519_v59  ;;  %v1531_v10 = vpop.permute.xlu0 %1530  ;;  %v1516_v63 = vmul.f32 %v1505_v35, %v3857_v0 }
 0x559   : > { %v1542_v14 = vsel %vm877_vm6, %v1531_v10, %v4350_v23  ;;  %v1538_v18 = vsel %vm877_vm6, %v4350_v23, %v1531_v10 }
 0x55a   : > { %v1547_v61 = vmul.f32 %v1542_v14, %v3892_v33  ;;  %v1529_v16 = vpop.permute.xlu1 %1528  ;;  %v1521_v17 = vpack.c.bf16 %v1517_v34, %v1515_v27  ;;  %v1546_v9 = vmul.f32 %v1538_v18, %v3889_v29  ;;  %v1520_v57 = vpack.c.bf16 %v1516_v63, %v1514_v8  ;;  %v1776_v63 = vld [vmem:[%s5475_s8] sm:$0xff]  ;;  %v1777_v14 = vld [vmem:[%s5475_s8 + $0x8] sm:$0xff]  ;;  %v1783_v8 = vld [vmem:[%s5475_s8 + $0x38] sm:$0xff] }
 0x55b   : > { %1671 = vmatpush1.bf16.msra.mxu1 %v1518_v15  ;;  %1790 = vperm.xlu1 %3061, %v1776_v63   ;;  %v1778_v15 = vld [vmem:[%s5475_s8 + $0x10] sm:$0xff]  ;;  %v1780_v18 = vld [vmem:[%s5475_s8 + $0x20] sm:$0xff] }
 0x55c   : > { %1672 = vmatprep.subr.bf16.mxu1 %v1521_v17  ;;  %v1527_v30 = vpop.permute.xlu0 %1526  ;;  %v1555_v5 = vpack.c.bf16 %v1549_v12, %v1547_v61  ;;  %v1554_v13 = vpack.c.bf16 %v1548_v40, %v1546_v9  ;;  %1795 = vperm.xlu0 %3062, %v1777_v14   ;;  %v1779_v61 = vld [vmem:[%s5475_s8 + $0x18] sm:$0xff]  ;;  %v1781_v17 = vld [vmem:[%s5475_s8 + $0x28] sm:$0xff] }
 0x55e   : > { %v1537_v23 = vpop.permute.xlu1 %1536 }
 0x55f   : > { %v1541_v0 = vsel %vm877_vm6, %v1529_v16, %v1537_v23  ;;  %v1545_v43 = vsel %vm877_vm6, %v1537_v23, %v1529_v16  ;;  %1673 = vmatpush1.bf16.msra.mxu1 %v1520_v57  ;;  %1800 = vperm.xlu1 %3061, %v1778_v15   ;;  %v1782_v16 = vld [vmem:[%s5475_s8 + $0x30] sm:$0xff] }
 0x560   : > { %1674 = vmatprep.subr.bf16.mxu1 %v1555_v5  ;;  %v1535_v21 = vpop.permute.xlu0 %1534  ;;  %v1552_v37 = vmul.f32 %v1541_v0, %v3889_v29  ;;  %v1553_v51 = vmul.f32 %v1545_v43, %v3892_v33  ;;  %1810 = vperm.xlu0 %3062, %v1780_v18  }
 0x561   : > { %v1540_v26 = vsel %vm877_vm6, %v1527_v30, %v1535_v21  ;;  %v1544_v20 = vsel %vm877_vm6, %v1535_v21, %v1527_v30  ;;  %v3303_v21 = vld [vmem:[%s3406_s18 + $0x10] sm:$0xff] }
 0x562   : > { %v1550_v19 = vmul.f32 %v1540_v26, %v3889_v29  ;;  %v1551_v4 = vmul.f32 %v1544_v20, %v3892_v33  ;;  %v1561_v41 = vpop.permute.xlu1 %1560  ;;  %v3076_v29 = vld [vmem:[%s5470_s3 + $0x1c] ss:$12 sps:$4 sm:$0xff]  }
 0x563   : > { %1675 = vmatpush1.bf16.msra.mxu1 %v1554_v13  ;;  %1805 = vperm.xlu1 %3061, %v1779_v61   ;;  %v3304_v20 = vld [vmem:[%s3406_s18 + $0x8] sm:$0xff] }
 0x564   : > { %v1559_v48 = vpop.permute.xlu0 %1558  ;;  %v1557_v49 = vpack.c.bf16 %v1553_v51, %v1551_v4  ;;  %v1556_v47 = vpack.c.bf16 %v1552_v37, %v1550_v19  ;;  %1820 = vperm.xlu0 %3062, %v1782_v16   ;;  %v3305_v37 = vld [vmem:[%s3406_s18 + $0x18] sm:$0xff]  ;;  %v3306_v19 = vld [vmem:[%s3406_s18] sm:$0xff] }
 0x566   : > { %v1569_v55 = vpop.permute.xlu1 %1568  ;;  %1676 = vmatprep.subr.bf16.mxu1 %v1557_v49 }
 0x567   : > { %v1575_v24 = vsel %vm922_vm7, %v1561_v41, %v1569_v55  ;;  %v1579_v11 = vsel %vm922_vm7, %v1569_v55, %v1561_v41  ;;  %1677 = vmatpush1.bf16.msra.mxu1 %v1556_v47  ;;  %1815 = vperm.xlu1 %3061, %v1781_v17  }
 0x568   : > { %v1567_v33 = vpop.permute.xlu0 %1566  ;;  %v1584_v52 = vmul.f32 %v3301_v50, %v1575_v24  ;;  %v1585_v31 = vmul.f32 %v3302_v53, %v1579_v11 }
 0x569   : > { %v1574_v45 = vsel %vm922_vm7, %v1559_v48, %v1567_v33  ;;  %v1578_v32 = vsel %vm922_vm7, %v1567_v33, %v1559_v48 }
 0x56a   : > { %v1582_v44 = vmul.f32 %v3301_v50, %v1574_v45  ;;  %v1583_v54 = vmul.f32 %v3302_v53, %v1578_v32  ;;  %v1565_v56 = vpop.permute.xlu1 %1564  ;;  %1679 = vmatmul.mubr.bf16.vlgmr.msra.gmra.mrb[0].mxu1 %v3073_v42 }
 0x56b   : > { %1688 = vmatprep.mubr.bf16.mxu1 %v3076_v29  ;;  %1825 = vperm.xlu1 %3061, %v1783_v8  }
 0x56c   : > { %v1590_v25 = vpack.c.bf16 %v1584_v52, %v1582_v44  ;;  %v1563_v62 = vpop.permute.xlu0 %1562  ;;  %v1591_v39 = vpack.c.bf16 %v1585_v31, %v1583_v54  ;;  %v3309_v44 = vld [vmem:[%s3406_s18 + $0x38] sm:$0xff] }
 0x56e   : > { %v1573_v3 = vpop.permute.xlu1 %1572  ;;  %1699 = vmatprep.subr.bf16.mxu1 %v1591_v39 }
 0x56f   : > { %v1577_v60 = vsel %vm922_vm7, %v1565_v56, %v1573_v3  ;;  %v1581_v38 = vsel %vm922_vm7, %v1573_v3, %v1565_v56  ;;  %1700 = vmatpush1.bf16.msra.mxu1 %v1590_v25  ;;  %v3310_v56 = vld [vmem:[%s3406_s18 + $0x20] sm:$0xff] }
 0x570   : > { %v1571_v58 = vpop.permute.xlu0 %1570  ;;  %v1588_v35 = vmul.f32 %v3301_v50, %v1577_v60  ;;  %v1589_v2 = vmul.f32 %v3302_v53, %v1581_v38  ;;  %v3081_v3 = vld [vmem:[%s5474_s7] sm:$0xff]   ;;  %v3083_v60 = vld [vmem:[%s5474_s7 + $0x10] sm:$0xff]   ;;  %v3084_v38 = vld [vmem:[%s5474_s7 + $0x18] sm:$0xff]  }
 0x571   : > { %v1576_v59 = vsel %vm922_vm7, %v1563_v62, %v1571_v58  ;;  %v1580_v7 = vsel %vm922_vm7, %v1571_v58, %v1563_v62  ;;  %v3085_v58 = vld [vmem:[%s5474_s7 + $0x20] sm:$0xff]  }
 0x572   : > { %v1586_v36 = vmul.f32 %v3301_v50, %v1576_v59  ;;  %v1587_v27 = vmul.f32 %v3302_v53, %v1580_v7  ;;  %1689 = vmatmul.mubr.bf16.gmra.mrb[4].mxu1 %v3078_v22  ;;  %v3307_v50 = vld [vmem:[%s3406_s18 + $0x30] sm:$0xff]  ;;  %v3308_v53 = vld [vmem:[%s3406_s18 + $0x28] sm:$0xff] }
 0x573   : > { %1731 = vmatprep.mubr.bf16.mxu1 %v5478_v28  ;;  %v3082_v22 = vld [vmem:[%s5474_s7 + $0x8] sm:$0xff]  }
 0x574   : > { %v1592_v34 = vpack.c.bf16 %v1588_v35, %v1586_v36  ;;  %v1593_v10 = vpack.c.bf16 %v1589_v2, %v1587_v27  ;;  %v3086_v59 = vld [vmem:[%s5474_s7 + $0x28] sm:$0xff]  }
 0x576   : > { %1701 = vmatprep.subr.bf16.mxu1 %v1593_v10 }
 0x577   : > { %1702 = vmatpush1.bf16.msra.mxu1 %v1592_v34 }
 0x57a   : > { %2956 = vmatmul.mubr.msk.bf16.vlgmr.msra.gmra.mrb[0].mxu1 %vm1005_vm8, %v3079_v1 }
 0x57b   : > { %1741 = vmatprep.mubr.bf16.mxu1 %v5478_v28 }
 0x57f   : > { %v1600_v30 = vpop.permute.xlu1 %1599 }
 0x581   : > { %v1596_v46 = vpop.permute.xlu0 %1595 }
 0x582   : > { %2957 = vmatmul.mubr.msk.bf16.gmra.mrb[4].mxu1 %vm1005_vm8, %v3080_v6 }
 0x583   : > { %2153 = vmatprep.mubr.bf16.mxu1 %v5478_v28  ;;  %v1604_v41 = vpop.permute.xlu1 %1603 }
 0x585   : > { %v1608_v42 = vpop.permute.xlu0 %1607 }
 0x5da   : > { %v1791_v7 = vpop.permute.xlu1 %1790 }
 0x5db   : > { %v1796_v1 = vpop.permute.xlu0 %1795 }
 0x5de   : > { %v1801_v6 = vpop.permute.xlu1 %1800 }
 0x5e2   : > { %v1806_v8 = vpop.permute.xlu1 %1805 }
 0x64d   : > { %v1733_v12 = vpop.f32.mrb[0].mxu1 }
 0x64e   : > { %v1735_v9 = vpop.f32.mrb[1].mxu1  ;;  %v3003_v5 = vadd.f32 %v1733_v12, %v1596_v46 }
 0x64f   : > { %v3004_v57 = vadd.f32 %v1735_v9, %v1596_v46  ;;  %v1737_v23 = vpop.f32.mrb[2].mxu1 }
 0x650   : > { %v3005_v40 = vadd.f32 %v1737_v23, %v1600_v30  ;;  %v1739_v0 = vpop.f32.mrb[3].mxu1  ;;  %v4532_v4 = vadd.f32 %v3306_v19, %v3003_v5  ;;  %v1811_v5 = vpop.permute.xlu0 %1810 }
 0x651   : > { %v3006_v43 = vadd.f32 %v1739_v0, %v1600_v30  ;;  %v4526_v13 = vadd.f32 %v3304_v20, %v3004_v57  ;;  %v1816_v57 = vpop.permute.xlu1 %1815 }
 0x652   : > { %v4523_v26 = vadd.f32 %v3303_v21, %v3005_v40  ;;  %5532 = vst [vmem:[#allocation5_spill] sm:$0xff] %v4532_v4 }
 0x653   : > { %5530 = vst [vmem:[#allocation3_spill] sm:$0xff] %v4526_v13  ;;  %v4529_v51 = vadd.f32 %v3305_v37, %v3006_v43 }
 0x654   : > { %5529 = vst [vmem:[#allocation2_spill] sm:$0xff] %v4523_v26  ;;  %v1760_v47 = vpack.c.bf16 %v4523_v26, %v4532_v4 }
 0x655   : > { %5531 = vst [vmem:[#allocation4_spill] sm:$0xff] %v4529_v51  ;;  %v1743_v48 = vpop.f32.mrb[4].mxu1  ;;  %v1761_v49 = vpack.c.bf16 %v4529_v51, %v4526_v13 }
 0x656   : > { %v1745_v55 = vpop.f32.mrb[5].mxu1  ;;  %v3007_v29 = vadd.f32 %v1743_v48, %v1604_v41 }
 0x657   : > { %v3008_v24 = vadd.f32 %v1745_v55, %v1604_v41  ;;  %v1747_v11 = vpop.f32.mrb[6].mxu1  ;;  %1896 = vmatprep.subr.bf16.mxu0 %v1761_v49  ;;  %v1826_v49 = vpop.permute.xlu1 %1825 }
 0x658   : > { %v3009_v33 = vadd.f32 %v1747_v11, %v1608_v42  ;;  %v1749_v45 = vpop.f32.mrb[7].mxu1  ;;  %1897 = vmatpush1.bf16.msra.mxu0 %v1760_v47  ;;  %v4548_v25 = vadd.f32 %v3310_v56, %v3007_v29  ;;  %v1821_v55 = vpop.permute.xlu0 %1820  ;;  %v1785_v56 = vld [vmem:[%s5475_s8 + $0x48] sm:$0xff] }
 0x659   : > { %v3010_v32 = vadd.f32 %v1749_v45, %v1608_v42  ;;  %v4542_v31 = vadd.f32 %v3308_v53, %v3008_v24 }
 0x65a   : > { %v4539_v52 = vadd.f32 %v3307_v50, %v3009_v33  ;;  %5536 = vst [vmem:[#allocation9_spill] sm:$0xff] %v4548_v25 }
 0x65b   : > { %5534 = vst [vmem:[#allocation7_spill] sm:$0xff] %v4542_v31  ;;  %v4545_v54 = vadd.f32 %v3309_v44, %v3010_v32 }
 0x65c   : > { %5533 = vst [vmem:[#allocation6_spill] sm:$0xff] %v4539_v52  ;;  %v1762_v39 = vpack.c.bf16 %v4539_v52, %v4548_v25 }
 0x65d   : > { %5535 = vst [vmem:[#allocation8_spill] sm:$0xff] %v4545_v54  ;;  %v1763_v62 = vpack.c.bf16 %v4545_v54, %v4542_v31 }
 0x65f   : > { %1898 = vmatprep.subr.bf16.mxu0 %v1763_v62 }
 0x660   : > { %1899 = vmatpush1.bf16.msra.mxu0 %v1762_v39 }
 0x663   : > { %2964 = vmatmul.mubr.msk.bf16.vlgmr.msra.gmra.mrb[8].mxu0 %vm1005_vm8, %v3081_v3  ;;  %v1787_v3 = vld [vmem:[%s5475_s8 + $0x58] sm:$0xff] }
 0x664   : > { %1938 = vmatprep.mubr.bf16.mxu0 %v5478_v28 }
 0x66b   : > { %2965 = vmatmul.mubr.msk.bf16.gmra.mrb[12].mxu0 %vm1005_vm8, %v3082_v22 }
 0x66c   : > { %1948 = vmatprep.mubr.bf16.mxu0 %v5478_v28 }
 0x673   : > { %2966 = vmatmul.mubr.msk.bf16.gmra.mrb[16].mxu0 %vm1005_vm8, %v3083_v60 }
 0x674   : > { %1958 = vmatprep.mubr.bf16.mxu0 %v5478_v28 }
 0x67b   : > { %2967 = vmatmul.mubr.msk.bf16.gmra.mrb[20].mxu0 %vm1005_vm8, %v3084_v38 }
 0x67c   : > { %1968 = vmatprep.mubr.bf16.mxu0 %v5478_v28 }
 0x683   : > { %2968 = vmatmul.mubr.msk.bf16.gmra.mrb[24].mxu0 %vm1005_vm8, %v3085_v58 }
 0x684   : > { %1978 = vmatprep.mubr.bf16.mxu0 %v5478_v28 }
 0x68b   : > { %2969 = vmatmul.mubr.msk.bf16.gmra.mrb[28].mxu0 %vm1005_vm8, %v3086_v59  ;;  %v1784_v59 = vld [vmem:[%s5475_s8 + $0x40] sm:$0xff] }
 0x736   : > { %v1930_v35 = vpop.f32.mrb[8].mxu0 }
 0x737   : > { %v1931_v2 = vadd.f32 %v1930_v35, %v1791_v7  ;;  %v1932_v36 = vpop.f32.mrb[9].mxu0 }
 0x738   : > { %v1933_v27 = vadd.f32 %v1932_v36, %v1791_v7  ;;  %v1934_v34 = vpop.f32.mrb[10].mxu0  ;;  %v1786_v7 = vld [vmem:[%s5475_s8 + $0x50] sm:$0xff] }
 0x739   : > { %v1936_v10 = vpop.f32.mrb[11].mxu0  ;;  %1993 = vxpose.xlu0.b32.start [1/4] (short) %v1931_v2, 128  ;;  %v1935_v63 = vadd.f32 %v1934_v34, %v1796_v1 }
 0x73a   : > { %2025 = vxpose.xlu1.b32.start [1/4] (short) %v1933_v27, 128  ;;  %v1937_v14 = vadd.f32 %v1936_v10, %v1796_v1 }
 0x73d   : > { %1994 = vxpose.xlu0.b32.cont [2/4] (short) %v1935_v63, 128 }
 0x73e   : > { %v1940_v15 = vpop.f32.mrb[12].mxu0  ;;  %2026 = vxpose.xlu1.b32.cont [2/4] (short) %v1937_v14, 128 }
 0x73f   : > { %v1941_v18 = vadd.f32 %v1940_v15, %v1801_v6  ;;  %v1942_v61 = vpop.f32.mrb[13].mxu0 }
 0x740   : > { %v1943_v16 = vadd.f32 %v1942_v61, %v1801_v6  ;;  %v1944_v17 = vpop.f32.mrb[14].mxu0 }
 0x741   : > { %v1946_v46 = vpop.f32.mrb[15].mxu0  ;;  %1995 = vxpose.xlu0.b32.cont [3/4] (short) %v1941_v18, 128  ;;  %v1945_v12 = vadd.f32 %v1944_v17, %v1806_v8 }
 0x742   : > { %2027 = vxpose.xlu1.b32.cont [3/4] (short) %v1943_v16, 128  ;;  %v1947_v30 = vadd.f32 %v1946_v46, %v1806_v8 }
 0x745   : > { %1996 = vxpose.xlu0.b32.end [4/4] (short) %v1945_v12, 128 }
 0x746   : > { %v1950_v9 = vpop.f32.mrb[16].mxu0  ;;  %2028 = vxpose.xlu1.b32.end [4/4] (short) %v1947_v30, 128 }
 0x747   : > { %v1952_v23 = vpop.f32.mrb[17].mxu0  ;;  %v1951_v0 = vadd.f32 %v1950_v9, %v1811_v5 }
 0x748   : > { %v1954_v40 = vpop.f32.mrb[18].mxu0  ;;  %v1953_v20 = vadd.f32 %v1952_v23, %v1811_v5 }
 0x749   : > { %v1955_v43 = vadd.f32 %v1954_v40, %v1816_v57  ;;  %v1956_v21 = vpop.f32.mrb[19].mxu0 }
 0x74a   : > { %v1957_v37 = vadd.f32 %v1956_v21, %v1816_v57 }
 0x74b   : > { %v1989_v19 = vpack.c.bf16 %v1955_v43, %v1951_v0 }
 0x74c   : > { %v1990_v41 = vpack.c.bf16 %v1957_v37, %v1953_v20 }
 0x74e   : > { %v1960_v48 = vpop.f32.mrb[20].mxu0  ;;  %2121 = vmatprep.subr.bf16.mxu1 %v1990_v41 }
 0x74f   : > { %v1962_v47 = vpop.f32.mrb[21].mxu0  ;;  %2122 = vmatpush1.bf16.msra.mxu1 %v1989_v19  ;;  %v1961_v24 = vadd.f32 %v1960_v48, %v1821_v55 }
 0x750   : > { %v1964_v42 = vpop.f32.mrb[22].mxu0  ;;  %v1963_v33 = vadd.f32 %v1962_v47, %v1821_v55 }
 0x751   : > { %v1965_v11 = vadd.f32 %v1964_v42, %v1826_v49  ;;  %v1966_v29 = vpop.f32.mrb[23].mxu0 }
 0x752   : > { %v1967_v45 = vadd.f32 %v1966_v29, %v1826_v49 }
 0x753   : > { %v1991_v32 = vpack.c.bf16 %v1965_v11, %v1961_v24 }
 0x754   : > { %v1992_v50 = vpack.c.bf16 %v1967_v45, %v1963_v33 }
 0x756   : > { %2123 = vmatprep.subr.bf16.mxu1 %v1992_v50  ;;  %v4583_v53 = vpop.f32.mrb[24].mxu0 }
 0x757   : > { %2124 = vmatpush1.bf16.msra.mxu1 %v1991_v32  ;;  %5537 = vst [vmem:[#allocation10_spill] sm:$0xff] %v4583_v53  ;;  %v4585_v44 = vpop.f32.mrb[25].mxu0 }
 0x758   : > { %5538 = vst [vmem:[#allocation11_spill] sm:$0xff] %v4585_v44  ;;  %v4590_v62 = vpop.f32.mrb[26].mxu0 }
 0x759   : > { %5539 = vst [vmem:[#allocation12_spill] sm:$0xff] %v4590_v62  ;;  %v4592_v39 = vpop.f32.mrb[27].mxu0 }
 0x75a   : > { %5540 = vst [vmem:[#allocation13_spill] sm:$0xff] %v4592_v39 }
 0x75e   : > { %v4597_v22 = vpop.f32.mrb[28].mxu0 }
 0x75f   : > { %5541 = vst [vmem:[#allocation14_spill] sm:$0xff] %v4597_v22  ;;  %v4599_v60 = vpop.f32.mrb[29].mxu0 }
 0x760   : > { %5542 = vst [vmem:[#allocation15_spill] sm:$0xff] %v4599_v60  ;;  %v4601_v38 = vpop.f32.mrb[30].mxu0 }
 0x761   : > { %5543 = vst [vmem:[#allocation16_spill] sm:$0xff] %v4601_v38  ;;  %v4603_v58 = vpop.f32.mrb[31].mxu0 }
 0x762   : > { %5544 = vst [vmem:[#allocation17_spill] sm:$0xff] %v4603_v58 }
 0x794   : > { %1835 = vperm.xlu1 %3061, %v1785_v56  }
 0x798   : > { %1845 = vperm.xlu1 %3061, %v1787_v3  }
 0x79e   : > { %1830 = vperm.xlu0 %3062, %v1784_v59  }
 0x7a2   : > { %1840 = vperm.xlu0 %3062, %v1786_v7  }
 0x7b9   : > { %v2009_v35 = vpop.trf.xlu0 }
 0x7ba   : > { %v2041_v16 = vpop.trf.xlu1 }
 0x7bd   : > { %v2010_v2 = vpop.trf.xlu0 }
 0x7be   : > { %v2057_v36 = vpack.c.bf16 %v2010_v2, %v2009_v35  ;;  %v2042_v46 = vpop.trf.xlu1 }
 0x7bf   : > { %v2065_v41 = vpack.c.bf16 %v2042_v46, %v2041_v16 }
 0x7c0   : > { %2970 = vmatmul.mubr.msk.bf16.vlgmr.msra.gmra.mrb[8].mxu1 %vm1005_vm8, %v2057_v36 }
 0x7c1   : > { %v2011_v27 = vpop.trf.xlu0  ;;  %2163 = vmatprep.mubr.bf16.mxu1 %v5478_v28 }
 0x7c2   : > { %v2043_v57 = vpop.trf.xlu1 }
 0x7c5   : > { %v2012_v34 = vpop.trf.xlu0 }
 0x7c6   : > { %v2058_v10 = vpack.c.bf16 %v2012_v34, %v2011_v27  ;;  %v2044_v5 = vpop.trf.xlu1 }
 0x7c7   : > { %v2066_v47 = vpack.c.bf16 %v2044_v5, %v2043_v57 }
 0x7c8   : > { %2971 = vmatmul.mubr.msk.bf16.gmra.mrb[12].mxu1 %vm1005_vm8, %v2058_v10 }
 0x7c9   : > { %v2013_v1 = vpop.trf.xlu0  ;;  %2173 = vmatprep.mubr.bf16.mxu1 %v5478_v28 }
 0x7ca   : > { %v2045_v21 = vpop.trf.xlu1 }
 0x7cd   : > { %v2014_v6 = vpop.trf.xlu0 }
 0x7ce   : > { %v2059_v63 = vpack.c.bf16 %v2014_v6, %v2013_v1  ;;  %v2046_v19 = vpop.trf.xlu1 }
 0x7cf   : > { %v2067_v42 = vpack.c.bf16 %v2046_v19, %v2045_v21 }
 0x7d0   : > { %2972 = vmatmul.mubr.msk.bf16.gmra.mrb[16].mxu1 %vm1005_vm8, %v2059_v63 }
 0x7d1   : > { %v2015_v14 = vpop.trf.xlu0  ;;  %2183 = vmatprep.mubr.bf16.mxu1 %v5478_v28 }
 0x7d2   : > { %v2047_v48 = vpop.trf.xlu1 }
 0x7d5   : > { %v2016_v15 = vpop.trf.xlu0 }
 0x7d6   : > { %v2060_v18 = vpack.c.bf16 %v2016_v15, %v2015_v14  ;;  %v2048_v49 = vpop.trf.xlu1 }
 0x7d7   : > { %v2068_v11 = vpack.c.bf16 %v2048_v49, %v2047_v48 }
 0x7d8   : > { %2973 = vmatmul.mubr.msk.bf16.gmra.mrb[20].mxu1 %vm1005_vm8, %v2060_v18 }
 0x7d9   : > { %v2017_v61 = vpop.trf.xlu0  ;;  %2193 = vmatprep.mubr.bf16.mxu1 %v5478_v28 }
 0x7da   : > { %v2049_v55 = vpop.trf.xlu1 }
 0x7dd   : > { %v2018_v17 = vpop.trf.xlu0 }
 0x7de   : > { %v2061_v8 = vpack.c.bf16 %v2018_v17, %v2017_v61  ;;  %v2050_v24 = vpop.trf.xlu1 }
 0x7df   : > { %v2069_v45 = vpack.c.bf16 %v2050_v24, %v2049_v55 }
 0x7e0   : > { %2974 = vmatmul.mubr.msk.bf16.gmra.mrb[24].mxu1 %vm1005_vm8, %v2061_v8 }
 0x7e1   : > { %v2019_v12 = vpop.trf.xlu0  ;;  %2203 = vmatprep.mubr.bf16.mxu1 %v5478_v28 }
 0x7e2   : > { %v2051_v29 = vpop.trf.xlu1 }
 0x7e5   : > { %v2020_v30 = vpop.trf.xlu0 }
 0x7e6   : > { %v2062_v9 = vpack.c.bf16 %v2020_v30, %v2019_v12  ;;  %v2052_v33 = vpop.trf.xlu1 }
 0x7e7   : > { %v2070_v50 = vpack.c.bf16 %v2052_v33, %v2051_v29 }
 0x7e8   : > { %2975 = vmatmul.mubr.msk.bf16.gmra.mrb[28].mxu1 %vm1005_vm8, %v2062_v9 }
 0x7e9   : > { %v2021_v23 = vpop.trf.xlu0  ;;  %2213 = vmatprep.mubr.bf16.mxu1 %v5478_v28 }
 0x7ea   : > { %v2053_v32 = vpop.trf.xlu1 }
 0x7ed   : > { %v2022_v40 = vpop.trf.xlu0 }
 0x7ee   : > { %v2063_v0 = vpack.c.bf16 %v2022_v40, %v2021_v23  ;;  %v2054_v56 = vpop.trf.xlu1 }
 0x7ef   : > { %v2071_v3 = vpack.c.bf16 %v2054_v56, %v2053_v32 }
 0x7f0   : > { %2976 = vmatmul.mubr.msk.bf16.gmra.mrb[32].mxu1 %vm1005_vm8, %v2063_v0 }
 0x7f1   : > { %v2023_v43 = vpop.trf.xlu0  ;;  %2223 = vmatprep.mubr.bf16.mxu1 %v5478_v28 }
 0x7f2   : > { %v2055_v59 = vpop.trf.xlu1 }
 0x7f5   : > { %v2024_v20 = vpop.trf.xlu0 }
 0x7f6   : > { %v2064_v37 = vpack.c.bf16 %v2024_v20, %v2023_v43  ;;  %v2056_v7 = vpop.trf.xlu1 }
 0x7f7   : > { %v2072_v35 = vpack.c.bf16 %v2056_v7, %v2055_v59 }
 0x7f8   : > { %2977 = vmatmul.mubr.msk.bf16.gmra.mrb[36].mxu1 %vm1005_vm8, %v2064_v37 }
 0x7f9   : > { %2233 = vmatprep.mubr.bf16.mxu1 %v5478_v28 }
 0x800   : > { %2978 = vmatmul.mubr.msk.bf16.gmra.mrb[40].mxu1 %vm1005_vm8, %v2065_v41 }
 0x801   : > { %2243 = vmatprep.mubr.bf16.mxu1 %v5478_v28 }
 0x808   : > { %2979 = vmatmul.mubr.msk.bf16.gmra.mrb[44].mxu1 %vm1005_vm8, %v2066_v47 }
 0x809   : > { %2253 = vmatprep.mubr.bf16.mxu1 %v5478_v28 }
 0x810   : > { %2980 = vmatmul.mubr.msk.bf16.gmra.mrb[48].mxu1 %vm1005_vm8, %v2067_v42 }
 0x811   : > { %2263 = vmatprep.mubr.bf16.mxu1 %v5478_v28 }
 0x818   : > { %2981 = vmatmul.mubr.msk.bf16.gmra.mrb[52].mxu1 %vm1005_vm8, %v2068_v11 }
 0x819   : > { %2273 = vmatprep.mubr.bf16.mxu1 %v5478_v28 }
 0x820   : > { %2982 = vmatmul.mubr.msk.bf16.gmra.mrb[56].mxu1 %vm1005_vm8, %v2069_v45 }
 0x821   : > { %2283 = vmatprep.mubr.bf16.mxu1 %v5478_v28 }
 0x828   : > { %2983 = vmatmul.mubr.msk.bf16.gmra.mrb[60].mxu1 %vm1005_vm8, %v2070_v50 }
 0x829   : > { %2293 = vmatprep.mubr.bf16.mxu1 %v5478_v28 }
 0x830   : > { %2984 = vmatmul.mubr.msk.bf16.gmra.mrb[64].mxu1 %vm1005_vm8, %v2071_v3 }
 0x831   : > { %2303 = vmatprep.mubr.bf16.mxu1 %v5478_v28 }
 0x838   : > { %2985 = vmatmul.mubr.msk.bf16.gmra.mrb[68].mxu1 %vm1005_vm8, %v2072_v35 }
 0x839   : > { %2825 = vmatprep.mubr.bf16.mxu1 %v5478_v28 }
 0x893   : > { %v4643_v2 = vpop.f32.mrb[8].mxu1 }
 0x894   : > { %v4645_v36 = vpop.f32.mrb[9].mxu1 }
 0x895   : > { %v4647_v27 = vpop.f32.mrb[10].mxu1 }
 0x896   : > { %v4649_v34 = vpop.f32.mrb[11].mxu1 }
 0x89b   : > { %v4651_v10 = vpop.f32.mrb[12].mxu1 }
 0x89c   : > { %v2314_v1 = vmax.f32 %v4643_v2, %v4651_v10  ;;  %v4655_v6 = vpop.f32.mrb[13].mxu1 }
 0x89d   : > { %v2351_v63 = vmax.f32 %v4645_v36, %v4655_v6  ;;  %v4659_v14 = vpop.f32.mrb[14].mxu1 }
 0x89e   : > { %v2315_v15 = vmax.f32 %v4647_v27, %v4659_v14  ;;  %v4663_v18 = vpop.f32.mrb[15].mxu1 }
 0x89f   : > { %v2352_v61 = vmax.f32 %v4649_v34, %v4663_v18 }
 0x8a3   : > { %v4667_v16 = vpop.f32.mrb[16].mxu1 }
 0x8a4   : > { %v2316_v17 = vmax.f32 %v2314_v1, %v4667_v16  ;;  %v4670_v8 = vpop.f32.mrb[17].mxu1 }
 0x8a5   : > { %v2353_v46 = vmax.f32 %v2351_v63, %v4670_v8  ;;  %v4673_v12 = vpop.f32.mrb[18].mxu1 }
 0x8a6   : > { %v2317_v30 = vmax.f32 %v2315_v15, %v4673_v12  ;;  %v4676_v9 = vpop.f32.mrb[19].mxu1 }
 0x8a7   : > { %v2354_v57 = vmax.f32 %v2352_v61, %v4676_v9 }
 0x8ab   : > { %v4679_v23 = vpop.f32.mrb[20].mxu1 }
 0x8ac   : > { %v2318_v5 = vmax.f32 %v2316_v17, %v4679_v23  ;;  %v4682_v40 = vpop.f32.mrb[21].mxu1 }
 0x8ad   : > { %v2355_v0 = vmax.f32 %v2353_v46, %v4682_v40  ;;  %v4685_v43 = vpop.f32.mrb[22].mxu1 }
 0x8ae   : > { %v2319_v21 = vmax.f32 %v2317_v30, %v4685_v43  ;;  %v4688_v20 = vpop.f32.mrb[23].mxu1 }
 0x8af   : > { %v2356_v37 = vmax.f32 %v2354_v57, %v4688_v20 }
 0x8b3   : > { %v4691_v19 = vpop.f32.mrb[24].mxu1 }
 0x8b4   : > { %v2320_v41 = vmax.f32 %v2318_v5, %v4691_v19  ;;  %v4694_v48 = vpop.f32.mrb[25].mxu1 }
 0x8b5   : > { %v2357_v49 = vmax.f32 %v2355_v0, %v4694_v48  ;;  %v4697_v47 = vpop.f32.mrb[26].mxu1 }
 0x8b6   : > { %v2321_v55 = vmax.f32 %v2319_v21, %v4697_v47  ;;  %v4700_v42 = vpop.f32.mrb[27].mxu1 }
 0x8b7   : > { %v2358_v24 = vmax.f32 %v2356_v37, %v4700_v42 }
 0x8bb   : > { %v4703_v11 = vpop.f32.mrb[28].mxu1 }
 0x8bc   : > { %v2322_v29 = vmax.f32 %v2320_v41, %v4703_v11  ;;  %v4706_v33 = vpop.f32.mrb[29].mxu1 }
 0x8bd   : > { %v2359_v45 = vmax.f32 %v2357_v49, %v4706_v33  ;;  %v4709_v32 = vpop.f32.mrb[30].mxu1 }
 0x8be   : > { %v2323_v50 = vmax.f32 %v2321_v55, %v4709_v32  ;;  %v4712_v56 = vpop.f32.mrb[31].mxu1 }
 0x8bf   : > { %5545 = vst [vmem:[#allocation18_spill] sm:$0xff] %v4712_v56  ;;  %v2360_v3 = vmax.f32 %v2358_v24, %v4712_v56 }
 0x8c3   : > { %v4715_v59 = vpop.f32.mrb[32].mxu1 }
 0x8c4   : > { %v2324_v7 = vmax.f32 %v2322_v29, %v4715_v59  ;;  %v4718_v35 = vpop.f32.mrb[33].mxu1 }
 0x8c5   : > { %5546 = vst [vmem:[#allocation19_spill] sm:$0xff] %v4718_v35  ;;  %v2361_v1 = vmax.f32 %v2359_v45, %v4718_v35  ;;  %v4721_v63 = vpop.f32.mrb[34].mxu1 }
 0x8c6   : > { %v2325_v15 = vmax.f32 %v2323_v50, %v4721_v63  ;;  %v4724_v61 = vpop.f32.mrb[35].mxu1 }
 0x8c7   : > { %5547 = vst [vmem:[#allocation20_spill] sm:$0xff] %v4724_v61  ;;  %v2362_v17 = vmax.f32 %v2360_v3, %v4724_v61 }
 0x8cb   : > { %v4727_v46 = vpop.f32.mrb[36].mxu1 }
 0x8cc   : > { %v2326_v30 = vmax.f32 %v2324_v7, %v4727_v46  ;;  %v4730_v57 = vpop.f32.mrb[37].mxu1 }
 0x8cd   : > { %5548 = vst [vmem:[#allocation21_spill] sm:$0xff] %v4730_v57  ;;  %v2363_v5 = vmax.f32 %v2361_v1, %v4730_v57  ;;  %v4733_v0 = vpop.f32.mrb[38].mxu1 }
 0x8ce   : > { %v2327_v21 = vmax.f32 %v2325_v15, %v4733_v0  ;;  %v4736_v37 = vpop.f32.mrb[39].mxu1 }
 0x8cf   : > { %5549 = vst [vmem:[#allocation22_spill] sm:$0xff] %v4736_v37  ;;  %v2364_v41 = vmax.f32 %v2362_v17, %v4736_v37 }
 0x8d3   : > { %v4739_v49 = vpop.f32.mrb[40].mxu1 }
 0x8d4   : > { %v2328_v55 = vmax.f32 %v2326_v30, %v4739_v49  ;;  %v4742_v24 = vpop.f32.mrb[41].mxu1 }
 0x8d5   : > { %5550 = vst [vmem:[#allocation23_spill] sm:$0xff] %v4742_v24  ;;  %v2365_v29 = vmax.f32 %v2363_v5, %v4742_v24  ;;  %v4745_v45 = vpop.f32.mrb[42].mxu1 }
 0x8d6   : > { %v2329_v50 = vmax.f32 %v2327_v21, %v4745_v45  ;;  %v4748_v3 = vpop.f32.mrb[43].mxu1 }
 0x8d7   : > { %5551 = vst [vmem:[#allocation24_spill] sm:$0xff] %v4748_v3  ;;  %v2366_v7 = vmax.f32 %v2364_v41, %v4748_v3 }
 0x8db   : > { %v4751_v1 = vpop.f32.mrb[44].mxu1 }
 0x8dc   : > { %v2330_v15 = vmax.f32 %v2328_v55, %v4751_v1  ;;  %v4754_v17 = vpop.f32.mrb[45].mxu1 }
 0x8dd   : > { %5552 = vst [vmem:[#allocation25_spill] sm:$0xff] %v4754_v17  ;;  %v2367_v30 = vmax.f32 %v2365_v29, %v4754_v17  ;;  %v4757_v28 = vpop.f32.mrb[46].mxu1 }
 0x8de   : > { %v2331_v5 = vmax.f32 %v2329_v50, %v4757_v28  ;;  %v4760_v54 = vpop.f32.mrb[47].mxu1 }
 0x8df   : > { %5553 = vst [vmem:[#allocation26_spill] sm:$0xff] %v4760_v54  ;;  %v2368_v21 = vmax.f32 %v2366_v7, %v4760_v54 }
 0x8e3   : > { %v4763_v52 = vpop.f32.mrb[48].mxu1 }
 0x8e4   : > { %v2332_v41 = vmax.f32 %v2330_v15, %v4763_v52  ;;  %v4766_v31 = vpop.f32.mrb[49].mxu1 }
 0x8e5   : > { %5554 = vst [vmem:[#allocation27_spill] sm:$0xff] %v4766_v31  ;;  %v2369_v55 = vmax.f32 %v2367_v30, %v4766_v31  ;;  %v4769_v25 = vpop.f32.mrb[50].mxu1 }
 0x8e6   : > { %v2333_v29 = vmax.f32 %v2331_v5, %v4769_v25  ;;  %v4772_v51 = vpop.f32.mrb[51].mxu1 }
 0x8e7   : > { %5555 = vst [vmem:[#allocation28_spill] sm:$0xff] %v4772_v51  ;;  %v2370_v50 = vmax.f32 %v2368_v21, %v4772_v51 }
 0x8eb   : > { %v4775_v26 = vpop.f32.mrb[52].mxu1 }
 0x8ec   : > { %v2334_v7 = vmax.f32 %v2332_v41, %v4775_v26  ;;  %v4778_v13 = vpop.f32.mrb[53].mxu1 }
 0x8ed   : > { %5556 = vst [vmem:[#allocation29_spill] sm:$0xff] %v4778_v13  ;;  %v2371_v15 = vmax.f32 %v2369_v55, %v4778_v13  ;;  %v4781_v4 = vpop.f32.mrb[54].mxu1 }
 0x8ee   : > { %v2335_v30 = vmax.f32 %v2333_v29, %v4781_v4  ;;  %v4784_v60 = vpop.f32.mrb[55].mxu1 }
 0x8ef   : > { %5557 = vst [vmem:[#allocation30_spill] sm:$0xff] %v4784_v60  ;;  %v2372_v5 = vmax.f32 %v2370_v50, %v4784_v60 }
 0x8f3   : > { %v4787_v44 = vpop.f32.mrb[56].mxu1 }
 0x8f4   : > { %v2336_v21 = vmax.f32 %v2334_v7, %v4787_v44  ;;  %v4790_v58 = vpop.f32.mrb[57].mxu1 }
 0x8f5   : > { %5558 = vst [vmem:[#allocation31_spill] sm:$0xff] %v4790_v58  ;;  %v2373_v41 = vmax.f32 %v2371_v15, %v4790_v58  ;;  %v4793_v39 = vpop.f32.mrb[58].mxu1 }
 0x8f6   : > { %v2337_v55 = vmax.f32 %v2335_v30, %v4793_v39  ;;  %v4796_v22 = vpop.f32.mrb[59].mxu1 }
 0x8f7   : > { %5559 = vst [vmem:[#allocation32_spill] sm:$0xff] %v4796_v22  ;;  %v2374_v29 = vmax.f32 %v2372_v5, %v4796_v22 }
 0x8fb   : > { %v4799_v53 = vpop.f32.mrb[60].mxu1 }
 0x8fc   : > { %v2338_v50 = vmax.f32 %v2336_v21, %v4799_v53  ;;  %v4802_v38 = vpop.f32.mrb[61].mxu1 }
 0x8fd   : > { %5560 = vst [vmem:[#allocation33_spill] sm:$0xff] %v4802_v38  ;;  %v2375_v7 = vmax.f32 %v2373_v41, %v4802_v38  ;;  %v4805_v62 = vpop.f32.mrb[62].mxu1 }
 0x8fe   : > { %v2339_v15 = vmax.f32 %v2337_v55, %v4805_v62  ;;  %v4808_v58 = vpop.f32.mrb[63].mxu1 }
 0x8ff   : > { %5561 = vst [vmem:[#allocation34_spill] sm:$0xff] %v4808_v58  ;;  %v2376_v30 = vmax.f32 %v2374_v29, %v4808_v58 }
 0x903   : > { %v4811_v60 = vpop.f32.mrb[64].mxu1 }
 0x904   : > { %v2340_v5 = vmax.f32 %v2338_v50, %v4811_v60  ;;  %v4814_v22 = vpop.f32.mrb[65].mxu1 }
 0x905   : > { %5562 = vst [vmem:[#allocation35_spill] sm:$0xff] %v4814_v22  ;;  %v2377_v21 = vmax.f32 %v2375_v7, %v4814_v22  ;;  %v4817_v13 = vpop.f32.mrb[66].mxu1 }
 0x906   : > { %v2341_v41 = vmax.f32 %v2339_v15, %v4817_v13  ;;  %v4820_v38 = vpop.f32.mrb[67].mxu1 }
 0x907   : > { %5563 = vst [vmem:[#allocation36_spill] sm:$0xff] %v4820_v38  ;;  %v2378_v55 = vmax.f32 %v2376_v30, %v4820_v38 }
 0x90b   : > { %v4823_v51 = vpop.f32.mrb[68].mxu1 }
 0x90c   : > { %v2342_v29 = vmax.f32 %v2340_v5, %v4823_v51  ;;  %v4826_v58 = vpop.f32.mrb[69].mxu1 }
 0x90d   : > { %5564 = vst [vmem:[#allocation37_spill] sm:$0xff] %v4826_v58  ;;  %v2379_v50 = vmax.f32 %v2377_v21, %v4826_v58  ;;  %v4829_v31 = vpop.f32.mrb[70].mxu1 }
 0x90e   : > { %v2343_v7 = vmax.f32 %v2341_v41, %v4829_v31  ;;  %v4832_v22 = vpop.f32.mrb[71].mxu1 }
 0x90f   : > { %5565 = vst [vmem:[#allocation38_spill] sm:$0xff] %v4832_v22  ;;  %v2380_v15 = vmax.f32 %v2378_v55, %v4832_v22 }
 0x910   : > { %v2344_v54 = vmax.f32 %v2342_v29, %v2343_v7 }
 0x911   : > { %v2381_v17 = vmax.f32 %v2379_v50, %v2380_v15 }
 0x912   : > { %v2345_v3 = vrot.slane %v2344_v54, 4 }
 0x913   : > { %v2382_v30 = vrot.slane %v2381_v17, 4 }
 0x914   : > { %v2346_v38 = vmax.f32 %v2344_v54, %v2345_v3 }
 0x915   : > { %v2383_v24 = vmax.f32 %v2381_v17, %v2382_v30 }
 0x916   : > { %v2347_v37 = vrot.slane %v2346_v38, 2 }
 0x917   : > { %v2384_v5 = vrot.slane %v2383_v24, 2 }
 0x918   : > { %v2348_v57 = vmax.f32 %v2346_v38, %v2347_v37  ;;  %v5585_v37 = vld [vmem:[#allocation37_spill] sm:$0xff] }
 0x919   : > { %v2385_v61 = vmax.f32 %v2383_v24, %v2384_v5 }
 0x91a   : > { %v2349_v35 = vrot.slane %v2348_v57, 1 }
 0x91b   : > { %v2386_v21 = vrot.slane %v2385_v61, 1 }
 0x91c   : > { %v4835_v58 = vmax.f32 %v2348_v57, %v2349_v35 }
 0x91d   : > { %v4837_v56 = vmax.f32 %v2385_v61, %v2386_v21 }
 0x91e   : > { %v2388_v41 = vsub.f32 %v4643_v2, %v4835_v58  ;;  %v2390_v55 = vsub.f32 %v4647_v27, %v4835_v58  ;;  %v2392_v54 = vsub.f32 %v4651_v10, %v4835_v58  ;;  %v2394_v3 = vsub.f32 %v4659_v14, %v4835_v58 }
 0x91f   : > { %v2396_v38 = vsub.f32 %v4667_v16, %v4835_v58  ;;  %v2398_v35 = vsub.f32 %v4673_v12, %v4835_v58  ;;  %v2400_v61 = vsub.f32 %v4679_v23, %v4835_v58  ;;  %v2402_v2 = vsub.f32 %v4685_v43, %v4835_v58 }
 0x920   : > { %v2404_v27 = vsub.f32 %v4691_v19, %v4835_v58  ;;  %v2406_v10 = vsub.f32 %v4697_v47, %v4835_v58  ;;  %v2408_v14 = vsub.f32 %v4703_v11, %v4835_v58  ;;  %v2410_v16 = vsub.f32 %v4709_v32, %v4835_v58 }
 0x921   : > { %v2412_v12 = vsub.f32 %v4715_v59, %v4835_v58  ;;  %v2414_v23 = vsub.f32 %v4721_v63, %v4835_v58  ;;  %v2416_v43 = vsub.f32 %v4727_v46, %v4835_v58  ;;  %v2418_v19 = vsub.f32 %v4733_v0, %v4835_v58 }
 0x922   : > { %v2420_v47 = vsub.f32 %v4739_v49, %v4835_v58  ;;  %v2422_v11 = vsub.f32 %v4745_v45, %v4835_v58  ;;  %v2424_v32 = vsub.f32 %v4751_v1, %v4835_v58  ;;  %v2426_v59 = vsub.f32 %v4757_v28, %v4835_v58 }
 0x923   : > { %v2428_v63 = vsub.f32 %v4763_v52, %v4835_v58  ;;  %v2430_v46 = vsub.f32 %v4769_v25, %v4835_v58  ;;  %v2432_v57 = vsub.f32 %v4775_v26, %v4835_v58  ;;  %v2434_v0 = vsub.f32 %v4781_v4, %v4835_v58 }
 0x924   : > { %v2452_v45 = vmul.f32 1.442695, %v2388_v41  ;;  %v2456_v1 = vmul.f32 1.442695, %v2390_v55  ;;  %v2460_v17 = vmul.f32 1.442695, %v2392_v54 }
 0x925   : > { %v2464_v50 = vmul.f32 1.442695, %v2394_v3  ;;  %v2468_v15 = vmul.f32 1.442695, %v2396_v38  ;;  %v2472_v30 = vmul.f32 1.442695, %v2398_v35 }
 0x926   : > { %3169 = vpow2.f32 %v2452_v45  ;;  %v2476_v5 = vmul.f32 1.442695, %v2400_v61  ;;  %v2480_v21 = vmul.f32 1.442695, %v2402_v2  ;;  %v2484_v4 = vmul.f32 1.442695, %v2404_v27 }
 0x927   : > { %3171 = vpow2.f32 %v2456_v1  ;;  %v2488_v24 = vmul.f32 1.442695, %v2406_v10  ;;  %v2492_v41 = vmul.f32 1.442695, %v2408_v14  ;;  %v2496_v55 = vmul.f32 1.442695, %v2410_v16 }
 0x928   : > { %3173 = vpow2.f32 %v2460_v17  ;;  %v2500_v54 = vmul.f32 1.442695, %v2412_v12  ;;  %v2504_v29 = vmul.f32 1.442695, %v2414_v23  ;;  %v2508_v3 = vmul.f32 1.442695, %v2416_v43 }
 0x929   : > { %3175 = vpow2.f32 %v2464_v50  ;;  %v2512_v26 = vmul.f32 1.442695, %v2418_v19  ;;  %v2516_v7 = vmul.f32 1.442695, %v2420_v47  ;;  %v2520_v45 = vmul.f32 1.442695, %v2422_v11 }
 0x92a   : > { %3177 = vpow2.f32 %v2468_v15  ;;  %v2524_v38 = vmul.f32 1.442695, %v2424_v32  ;;  %v2528_v35 = vmul.f32 1.442695, %v2426_v59  ;;  %v2532_v1 = vmul.f32 1.442695, %v2428_v63 }
 0x92b   : > { %3179 = vpow2.f32 %v2472_v30  ;;  %v4907_v61 = vmul.f32 1.442695, %v2430_v46  ;;  %v4909_v2 = vmul.f32 1.442695, %v2432_v57  ;;  %v4911_v27 = vmul.f32 1.442695, %v2434_v0 }
 0x92c   : > { %3181 = vpow2.f32 %v2476_v5  ;;  %v5566_v63 = vld [vmem:[#allocation18_spill] sm:$0xff]  ;;  %v5568_v17 = vld [vmem:[#allocation20_spill] sm:$0xff]  ;;  %v5569_v30 = vld [vmem:[#allocation21_spill] sm:$0xff] }
 0x92d   : > { %3183 = vpow2.f32 %v2480_v21  ;;  %v5570_v21 = vld [vmem:[#allocation22_spill] sm:$0xff]  ;;  %v5572_v59 = vld [vmem:[#allocation24_spill] sm:$0xff]  ;;  %v5573_v32 = vld [vmem:[#allocation25_spill] sm:$0xff] }
 0x92e   : > { %3185 = vpow2.f32 %v2484_v4  ;;  %v5567_v4 = vld [vmem:[#allocation19_spill] sm:$0xff]  ;;  %v5574_v5 = vld [vmem:[#allocation26_spill] sm:$0xff]  ;;  %v5576_v43 = vld [vmem:[#allocation28_spill] sm:$0xff] }
 0x92f   : > { %3187 = vpow2.f32 %v2488_v24  ;;  %v5575_v19 = vld [vmem:[#allocation27_spill] sm:$0xff]  ;;  %v5577_v50 = vld [vmem:[#allocation29_spill] sm:$0xff]  ;;  %v5578_v16 = vld [vmem:[#allocation30_spill] sm:$0xff] }
 0x930   : > { %v4921_v23 = vpop.eup %3169  ;;  %3189 = vpow2.f32 %v2492_v41  ;;  %v5579_v41 = vld [vmem:[#allocation31_spill] sm:$0xff]  ;;  %v5580_v10 = vld [vmem:[#allocation32_spill] sm:$0xff] }
 0x931   : > { %v4929_v11 = vpop.eup %3171  ;;  %3191 = vpow2.f32 %v2496_v55  ;;  %v5571_v55 = vld [vmem:[#allocation23_spill] sm:$0xff] }
 0x932   : > { %v4937_v57 = vpop.eup %3173  ;;  %3193 = vpow2.f32 %v2500_v54  ;;  %v2580_v0 = vadd.f32 %v4929_v11, %v4921_v23  ;;  %v5584_v54 = vld [vmem:[#allocation36_spill] sm:$0xff] }
 0x933   : > { %v4945_v15 = vpop.eup %3175  ;;  %3195 = vpow2.f32 %v2504_v29  ;;  %v5582_v29 = vld [vmem:[#allocation34_spill] sm:$0xff] }
 0x934   : > { %v4953_v46 = vpop.eup %3177  ;;  %3197 = vpow2.f32 %v2508_v3  ;;  %v2581_v24 = vadd.f32 %v4937_v57, %v2580_v0 }
 0x935   : > { %v4960_v47 = vpop.eup %3179  ;;  %3199 = vpow2.f32 %v2512_v26 }
 0x936   : > { %v4968_v12 = vpop.eup %3181  ;;  %3201 = vpow2.f32 %v2516_v7  ;;  %v2582_v0 = vadd.f32 %v4945_v15, %v2581_v24 }
 0x937   : > { %v4975_v14 = vpop.eup %3183  ;;  %3203 = vpow2.f32 %v2520_v45 }
 0x938   : > { %v4983_v52 = vpop.eup %3185  ;;  %3205 = vpow2.f32 %v2524_v38  ;;  %v2583_v24 = vadd.f32 %v4953_v46, %v2582_v0  ;;  %v5586_v0 = vsub.f32 %v4787_v44, %v4835_v58 }
 0x939   : > { %v4990_v49 = vpop.eup %3187  ;;  %3207 = vpow2.f32 %v2528_v35  ;;  %v5587_v35 = vsub.f32 %v4793_v39, %v4835_v58 }
 0x93a   : > { %v4998_v25 = vpop.eup %3189  ;;  %3209 = vpow2.f32 %v2532_v1  ;;  %v2548_v26 = vmul.f32 1.442695, %v5586_v0  ;;  %v2584_v45 = vadd.f32 %v4960_v47, %v2583_v24  ;;  %v5588_v1 = vsub.f32 %v4799_v53, %v4835_v58 }
 0x93b   : > { %v5004_v28 = vpop.eup %3191  ;;  %3211 = vpow2.f32 %v4907_v61  ;;  %v2552_v7 = vmul.f32 1.442695, %v5587_v35  ;;  %v5589_v61 = vsub.f32 %v4805_v62, %v4835_v58  ;;  %v5593_v62 = vsub.f32 %v4823_v51, %v4835_v58 }
 0x93c   : > { %v5010_v3 = vpop.eup %3193  ;;  %3213 = vpow2.f32 %v4909_v2  ;;  %v2556_v38 = vmul.f32 1.442695, %v5588_v1  ;;  %v2585_v44 = vadd.f32 %v4968_v12, %v2584_v45  ;;  %v5590_v2 = vsub.f32 %v4811_v60, %v4835_v58 }
 0x93d   : > { %v5017_v0 = vpop.eup %3195  ;;  %3215 = vpow2.f32 %v4911_v27  ;;  %v2560_v24 = vmul.f32 1.442695, %v5589_v61  ;;  %v5591_v45 = vsub.f32 %v4817_v13, %v4835_v58 }
 0x93e   : > { %v5023_v39 = vpop.eup %3197  ;;  %3217 = vpow2.f32 %v2548_v26  ;;  %v2564_v35 = vmul.f32 1.442695, %v5590_v2  ;;  %v2586_v53 = vadd.f32 %v4975_v14, %v2585_v44  ;;  %v2572_v26 = vmul.f32 1.442695, %v5593_v62 }
 0x93f   : > { %v5029_v1 = vpop.eup %3199  ;;  %3219 = vpow2.f32 %v2552_v7  ;;  %v2568_v27 = vmul.f32 1.442695, %v5591_v45  ;;  %v5594_v44 = vsub.f32 %v4829_v31, %v4835_v58  ;;  %v5597_v31 = vsub.f32 %v4655_v6, %v4837_v56 }
 0x940   : > { %v5034_v22 = vpop.eup %3201  ;;  %3221 = vpow2.f32 %v2556_v38  ;;  %v2587_v61 = vadd.f32 %v4983_v52, %v2586_v53  ;;  %v5595_v38 = vsub.f32 %v4645_v36, %v4837_v56  ;;  %v5596_v53 = vsub.f32 %v4649_v34, %v4837_v56 }
 0x941   : > { %5592 = vst [vmem:[#allocation18_spill] sm:$0xff] %v5034_v22  ;;  %v5040_v60 = vpop.eup %3203  ;;  %3223 = vpow2.f32 %v2560_v24  ;;  %v2576_v7 = vmul.f32 1.442695, %v5594_v44  ;;  %v2462_v58 = vmul.f32 1.442695, %v5597_v31  ;;  %v5598_v36 = vsub.f32 %v4663_v18, %v4837_v56 }
 0x942   : > { %v5045_v2 = vpop.eup %3205  ;;  %3225 = vpow2.f32 %v2564_v35  ;;  %v2588_v13 = vadd.f32 %v4990_v49, %v2587_v61  ;;  %v2454_v45 = vmul.f32 1.442695, %v5595_v38  ;;  %v2458_v24 = vmul.f32 1.442695, %v5596_v53 }
 0x943   : > { %v5051_v51 = vpop.eup %3207  ;;  %3227 = vpow2.f32 %v2568_v27  ;;  %v2466_v61 = vmul.f32 1.442695, %v5598_v36  ;;  %v5599_v27 = vsub.f32 %v4670_v8, %v4837_v56  ;;  %v5600_v34 = vsub.f32 %v4676_v9, %v4837_v56 }
 0x944   : > { %v5059_v62 = vpop.eup %3209  ;;  %3229 = vpow2.f32 %v2572_v26  ;;  %v2589_v35 = vadd.f32 %v4998_v25, %v2588_v13  ;;  %v5601_v26 = vsub.f32 %v4682_v40, %v4837_v56  ;;  %v5602_v13 = vsub.f32 %v4688_v20, %v4837_v56 }
 0x945   : > { %v2470_v44 = vmul.f32 1.442695, %v5599_v27  ;;  %v5068_v38 = vpop.eup %3211  ;;  %3231 = vpow2.f32 %v2576_v7  ;;  %v2474_v6 = vmul.f32 1.442695, %v5600_v34  ;;  %v5603_v7 = vsub.f32 %v4694_v48, %v4837_v56 }
 0x946   : > { %v2478_v53 = vmul.f32 1.442695, %v5601_v26  ;;  %v2482_v18 = vmul.f32 1.442695, %v5602_v13  ;;  %v5079_v31 = vpop.eup %3213  ;;  %v2590_v8 = vadd.f32 %v5004_v28, %v2589_v35  ;;  %3233 = vpow2.f32 %v2454_v45 }
 0x947   : > { %v2486_v36 = vmul.f32 1.442695, %v5603_v7  ;;  %v5604_v9 = vsub.f32 %v4700_v42, %v4837_v56  ;;  %v5088_v34 = vpop.eup %3215  ;;  %3235 = vpow2.f32 %v2458_v24 }
 0x948   : > { %v5096_v35 = vpop.eup %3217  ;;  %v2591_v48 = vadd.f32 %v5010_v3, %v2590_v8  ;;  %3237 = vpow2.f32 %v2462_v58 }
 0x949   : > { %v2490_v27 = vmul.f32 1.442695, %v5604_v9  ;;  %v5103_v26 = vpop.eup %3219  ;;  %3239 = vpow2.f32 %v2466_v61  ;;  %v5605_v61 = vsub.f32 %v4706_v33, %v4837_v56  ;;  %v5606_v9 = vsub.f32 %v5566_v63, %v4837_v56 }
 0x94a   : > { %v5111_v8 = vpop.eup %3221  ;;  %v2592_v58 = vadd.f32 %v5017_v0, %v2591_v48  ;;  %3241 = vpow2.f32 %v2470_v44 }
 0x94b   : > { %v5118_v42 = vpop.eup %3223  ;;  %3243 = vpow2.f32 %v2474_v6  ;;  %v2494_v24 = vmul.f32 1.442695, %v5605_v61  ;;  %v2498_v7 = vmul.f32 1.442695, %v5606_v9 }
 0x94c   : > { %v5126_v48 = vpop.eup %3225  ;;  %v2593_v44 = vadd.f32 %v5023_v39, %v2592_v58  ;;  %3245 = vpow2.f32 %v2478_v53  ;;  %v5607_v53 = vsub.f32 %v5567_v4, %v4837_v56  ;;  %v5612_v4 = vsub.f32 %v5572_v59, %v4837_v56 }
 0x94d   : > { %v5134_v45 = vpop.eup %3227  ;;  %3247 = vpow2.f32 %v2482_v18  ;;  %v5608_v18 = vsub.f32 %v5568_v17, %v4837_v56  ;;  %v5611_v17 = vsub.f32 %v5571_v55, %v4837_v56  ;;  %v5615_v59 = vsub.f32 %v5575_v19, %v4837_v56 }
 0x94e   : > { %v5139_v13 = vpop.eup %3229  ;;  %v2594_v20 = vadd.f32 %v5029_v1, %v2593_v44  ;;  %3249 = vpow2.f32 %v2486_v36  ;;  %v2502_v33 = vmul.f32 1.442695, %v5607_v53  ;;  %v5609_v36 = vsub.f32 %v5569_v30, %v4837_v56 }
 0x94f   : > { %v5147_v61 = vpop.eup %3231  ;;  %3251 = vpow2.f32 %v2490_v27  ;;  %v2506_v63 = vmul.f32 1.442695, %v5608_v18  ;;  %v5610_v27 = vsub.f32 %v5570_v21, %v4837_v56  ;;  %v2518_v18 = vmul.f32 1.442695, %v5611_v17 }
 0x950   : > { %v3234_v9 = vpop.eup %3233  ;;  %v2595_v6 = vadd.f32 %v5034_v22, %v2594_v20  ;;  %3253 = vpow2.f32 %v2494_v24  ;;  %v2510_v44 = vmul.f32 1.442695, %v5609_v36  ;;  %v5613_v21 = vsub.f32 %v5573_v32, %v4837_v56 }
 0x951   : > { %v3236_v53 = vpop.eup %3235  ;;  %3255 = vpow2.f32 %v2498_v7  ;;  %v2514_v58 = vmul.f32 1.442695, %v5610_v27  ;;  %v2522_v7 = vmul.f32 1.442695, %v5612_v4  ;;  %v2534_v4 = vmul.f32 1.442695, %v5615_v59 }
 0x952   : > { %v3238_v40 = vpop.eup %3237  ;;  %v2596_v20 = vadd.f32 %v5040_v60, %v2595_v6  ;;  %3257 = vpow2.f32 %v2502_v33  ;;  %v2617_v24 = vadd.f32 %v3236_v53, %v3234_v9  ;;  %v2669_v30 = vpack.c.bf16 %v3236_v53, %v3234_v9  ;;  %v5622_v59 = vld [vmem:[#allocation33_spill] sm:$0xff] }
 0x953   : > { %v3240_v36 = vpop.eup %3239  ;;  %3259 = vpow2.f32 %v2506_v63  ;;  %v2526_v27 = vmul.f32 1.442695, %v5613_v21  ;;  %v5614_v63 = vsub.f32 %v5574_v5, %v4837_v56  ;;  %v5616_v32 = vpack.c.bf16 %v4929_v11, %v4921_v23 }
 0x954   : > { %v3242_v22 = vpop.eup %3241  ;;  %v2597_v55 = vadd.f32 %v5045_v2, %v2596_v20  ;;  %3261 = vpow2.f32 %v2510_v44  ;;  %v2618_v17 = vadd.f32 %v3238_v40, %v2617_v24  ;;  %2700 = vmatprep.subr.bf16.mxu0 %v2669_v30  ;;  %v2671_v6 = vpack.c.bf16 %v3240_v36, %v3238_v40 }
 0x955   : > { %v3244_v33 = vpop.eup %3243  ;;  %3263 = vpow2.f32 %v2514_v58  ;;  %v2530_v9 = vmul.f32 1.442695, %v5614_v63  ;;  %2701 = vmatpush1.bf16.xpose.msra.mxu0 %v5616_v32  ;;  %v5617_v5 = vsub.f32 %v5576_v43, %v4837_v56  ;;  %v5618_v24 = vsub.f32 %v5577_v50, %v4837_v56 }
 0x956   : > { %v5181_v53 = vpop.eup %3245  ;;  %v2598_v44 = vadd.f32 %v5051_v51, %v2597_v55  ;;  %3265 = vpow2.f32 %v2518_v18  ;;  %v2619_v40 = vadd.f32 %v3240_v36, %v2618_v17  ;;  %2702 = vmatprep.subr.bf16.mxu0 %v2671_v6  ;;  %v2673_v58 = vpack.c.bf16 %v3244_v33, %v3242_v22 }
 0x957   : > { %v5184_v20 = vpop.eup %3247  ;;  %3267 = vpow2.f32 %v2522_v7  ;;  %v2538_v19 = vmul.f32 1.442695, %v5617_v5  ;;  %v2542_v23 = vmul.f32 1.442695, %v5618_v24  ;;  %v5619_v43 = vsub.f32 %v5578_v16, %v4837_v56  ;;  %v5625_v24 = vld [vmem:[#allocation35_spill] sm:$0xff] }
 0x958   : > { %v5192_v11 = vpop.eup %3249  ;;  %v2599_v30 = vadd.f32 %v5059_v62, %v2598_v44  ;;  %3269 = vpow2.f32 %v2526_v27  ;;  %v2620_v18 = vadd.f32 %v3242_v22, %v2619_v40  ;;  %v2675_v36 = vpack.c.bf16 %v5184_v20, %v5181_v53 }
 0x959   : > { %v5197_v21 = vpop.eup %3251  ;;  %3271 = vpow2.f32 %v2530_v9  ;;  %v2546_v7 = vmul.f32 1.442695, %v5619_v43  ;;  %v5620_v50 = vsub.f32 %v5579_v41, %v4837_v56  ;;  %v5621_v16 = vsub.f32 %v5580_v10, %v4837_v56 }
 0x95a   : > { %v5205_v17 = vpop.eup %3253  ;;  %v2600_v6 = vadd.f32 %v5068_v38, %v2599_v30  ;;  %3273 = vpow2.f32 %v2534_v4  ;;  %v2621_v22 = vadd.f32 %v3244_v33, %v2620_v18  ;;  %v2677_v27 = vpack.c.bf16 %v5197_v21, %v5192_v11 }
 0x95b   : > { %v2550_v55 = vmul.f32 1.442695, %v5620_v50  ;;  %v5210_v63 = vpop.eup %3255  ;;  %3275 = vpow2.f32 %v2538_v19  ;;  %v2554_v9 = vmul.f32 1.442695, %v5621_v16  ;;  %v5623_v41 = vsub.f32 %v5622_v59, %v4837_v56 }
 0x95c   : > { %v5218_v44 = vpop.eup %3257  ;;  %v2601_v40 = vadd.f32 %v5079_v31, %v2600_v6  ;;  %3277 = vpow2.f32 %v2542_v23  ;;  %v2622_v33 = vadd.f32 %v5181_v53, %v2621_v22  ;;  %v2679_v4 = vpack.c.bf16 %v5210_v63, %v5205_v17 }
 0x95d   : > { %v2558_v32 = vmul.f32 1.442695, %v5623_v41  ;;  %v5224_v5 = vpop.eup %3259  ;;  %3279 = vpow2.f32 %v2546_v7  ;;  %v5624_v10 = vsub.f32 %v5582_v29, %v4837_v56  ;;  %v5626_v30 = vsub.f32 %v5625_v24, %v4837_v56 }
 0x95e   : > { %v5627_v43 = vpack.c.bf16 %v4945_v15, %v4937_v57  ;;  %v5235_v23 = vpop.eup %3261  ;;  %v2602_v53 = vadd.f32 %v5088_v34, %v2601_v40  ;;  %3281 = vpow2.f32 %v2550_v55  ;;  %v2623_v50 = vadd.f32 %v5184_v20, %v2622_v33 }
 0x95f   : > { %v2562_v19 = vmul.f32 1.442695, %v5624_v10  ;;  %v2566_v18 = vmul.f32 1.442695, %v5626_v30  ;;  %v2681_v29 = vpack.c.bf16 %v5224_v5, %v5218_v44  ;;  %v5241_v7 = vpop.eup %3263  ;;  %3283 = vpow2.f32 %v2554_v9  ;;  %v5630_v9 = vld [vmem:[#allocation38_spill] sm:$0xff] }
 0x960   : > { %2703 = vmatpush1.bf16.xpose.msra.mxu0 %v5627_v43  ;;  %v5628_v6 = vsub.f32 %v5584_v54, %v4837_v56  ;;  %v5629_v57 = vsub.f32 %v5585_v37, %v4837_v56  ;;  %v5249_v16 = vpop.eup %3265  ;;  %v2603_v55 = vadd.f32 %v5096_v35, %v2602_v53  ;;  %3285 = vpow2.f32 %v2558_v32 }
 0x961   : > { %2704 = vmatprep.subr.bf16.mxu0 %v2673_v58  ;;  %v2624_v58 = vadd.f32 %v5192_v11, %v2623_v50  ;;  %v2683_v20 = vpack.c.bf16 %v5241_v7, %v5235_v23  ;;  %v5255_v59 = vpop.eup %3267  ;;  %3287 = vpow2.f32 %v2562_v19  ;;  %v5631_v54 = vsub.f32 %v5630_v9, %v4837_v56 }
 0x962   : > { %v2570_v22 = vmul.f32 1.442695, %v5628_v6  ;;  %v2574_v15 = vmul.f32 1.442695, %v5629_v57  ;;  %v5260_v40 = vpop.eup %3269  ;;  %v2604_v37 = vadd.f32 %v5103_v26, %v2603_v55  ;;  %3289 = vpow2.f32 %v2566_v18 }
 0x963   : > { %v2578_v41 = vmul.f32 1.442695, %v5631_v54  ;;  %v2625_v33 = vadd.f32 %v5197_v21, %v2624_v58  ;;  %v2685_v32 = vpack.c.bf16 %v5255_v59, %v5249_v16  ;;  %v5266_v10 = vpop.eup %3271  ;;  %v5632_v18 = vpack.c.bf16 %v4960_v47, %v4953_v46 }
 0x964   : > { %3291 = vpow2.f32 %v2570_v22  ;;  %v5268_v24 = vpop.eup %3273  ;;  %v2605_v19 = vadd.f32 %v5111_v8, %v2604_v37  ;;  %v2687_v30 = vpack.c.bf16 %v5266_v10, %v5260_v40  ;;  %v5634_v11 = vpack.c.bf16 %v4990_v49, %v4983_v52 }
 0x965   : > { %3293 = vpow2.f32 %v2574_v15  ;;  %v2626_v56 = vadd.f32 %v5205_v17, %v2625_v33  ;;  %v5274_v43 = vpop.eup %3275  ;;  %v5635_v49 = vpack.c.bf16 %v5004_v28, %v4998_v25  ;;  %v5638_v28 = vld [vmem:[#allocation10_spill] sm:$0xff] }
 0x966   : > { %3295 = vpow2.f32 %v2578_v41  ;;  %v5279_v53 = vpop.eup %3277  ;;  %v2606_v50 = vadd.f32 %v5118_v42, %v2605_v19  ;;  %v2689_v22 = vpack.c.bf16 %v5274_v43, %v5268_v24 }
 0x967   : > { %v2627_v6 = vadd.f32 %v5210_v63, %v2626_v56  ;;  %v5285_v57 = vpop.eup %3279 }
 0x968   : > { %2705 = vmatpush1.bf16.xpose.msra.mxu0 %v5632_v18  ;;  %v5287_v15 = vpop.eup %3281  ;;  %v2607_v55 = vadd.f32 %v5126_v48, %v2606_v50 }
 0x969   : > { %2706 = vmatprep.subr.bf16.mxu0 %v2675_v36  ;;  %v2628_v58 = vadd.f32 %v5218_v44, %v2627_v6  ;;  %v5293_v46 = vpop.eup %3283  ;;  %v5633_v6 = vpack.c.bf16 %v4975_v14, %v4968_v12  ;;  %v5640_v44 = vpack.c.bf16 %v5017_v0, %v5010_v3  ;;  %v5641_v0 = vpack.c.bf16 %v5029_v1, %v5023_v39 }
 0x96a   : > { %v5295_v9 = vpop.eup %3285  ;;  %v2608_v36 = vadd.f32 %v5134_v45, %v2607_v55 }
 0x96b   : > { %v2629_v54 = vadd.f32 %v5224_v5, %v2628_v58  ;;  %v5301_v37 = vpop.eup %3287 }
 0x96c   : > { %v5303_v33 = vpop.eup %3289  ;;  %v2609_v19 = vadd.f32 %v5139_v13, %v2608_v36  ;;  %v1831_v36 = vpop.permute.xlu0 %1830 }
 0x96d   : > { %v2630_v56 = vadd.f32 %v5235_v23, %v2629_v54  ;;  %v1971_v25 = vadd.f32 %v5638_v28, %v1831_v36  ;;  %v5644_v28 = vpack.c.bf16 %v5051_v51, %v5045_v2  ;;  %v5650_v2 = vpack.c.bf16 %v5285_v57, %v5279_v53 }
 0x96e   : > { %v5309_v50 = vpop.eup %3291  ;;  %v2610_v58 = vadd.f32 %v5147_v61, %v2609_v19 }
 0x96f   : > { %v5314_v55 = vpop.eup %3293  ;;  %v2631_v41 = vadd.f32 %v5241_v7, %v2630_v56 }
 0x970   : > { %2707 = vmatpush1.bf16.xpose.msra.mxu0 %v5633_v6  ;;  %v5323_v54 = vpop.eup %3295  ;;  %v2611_v18 = vrot.slane %v2610_v58, 4 }
 0x971   : > { %2708 = vmatprep.subr.bf16.mxu0 %v2677_v27  ;;  %v2632_v47 = vadd.f32 %v5249_v16, %v2631_v41  ;;  %v5645_v16 = vld [vmem:[#allocation13_spill] sm:$0xff] }
 0x972   : > { %v2612_v12 = vadd.f32 %v2611_v18, %v2610_v58  ;;  %v1836_v58 = vpop.permute.xlu1 %1835 }
 0x973   : > { %v2633_v19 = vadd.f32 %v5255_v59, %v2632_v47  ;;  %v1977_v59 = vadd.f32 %v5645_v16, %v1836_v58 }
 0x974   : > { %v2613_v6 = vrot.slane %v2612_v12, 2 }
 0x975   : > { %v2634_v56 = vadd.f32 %v5260_v40, %v2633_v19 }
 0x976   : > { %v2614_v21 = vadd.f32 %v2613_v6, %v2612_v12  ;;  %v1846_v63 = vpop.permute.xlu1 %1845  ;;  %v5636_v6 = vld [vmem:[#allocation12_spill] sm:$0xff] }
 0x977   : > { %v2635_v27 = vadd.f32 %v5266_v10, %v2634_v56  ;;  %v1975_v56 = vadd.f32 %v5636_v6, %v1836_v58  ;;  %v5649_v10 = vpack.c.bf16 %v5068_v38, %v5059_v62  ;;  %v5652_v62 = vpack.c.bf16 %v5293_v46, %v5287_v15 }
 0x978   : > { %2709 = vmatpush1.bf16.xpose.msra.mxu0 %v5634_v11  ;;  %v2615_v41 = vrot.slane %v2614_v21, 1  ;;  %v5637_v11 = vld [vmem:[#allocation16_spill] sm:$0xff]  ;;  %v5653_v38 = vpack.c.bf16 %v5103_v26, %v5096_v35  ;;  %v5658_v35 = vpack.c.bf16 %v5323_v54, %v5314_v55  ;;  %v5659_v26 = vpack.c.bf16 %v5147_v61, %v5139_v13 }
 0x979   : > { %2710 = vmatprep.subr.bf16.mxu0 %v2679_v4  ;;  %v2636_v14 = vadd.f32 %v5268_v24, %v2635_v27  ;;  %v1841_v4 = vpop.permute.xlu0 %1840  ;;  %v5639_v27 = vld [vmem:[#allocation14_spill] sm:$0xff]  ;;  %v3313_v13 = vld [vmem:[%s5473_s6 + $0x10] sm:$0xff] }
 0x97a   : > { %v2616_v18 = vadd.f32 %v2615_v41, %v2614_v21  ;;  %v1985_v21 = vadd.f32 %v5637_v11, %v1846_v63  ;;  %v1981_v41 = vadd.f32 %v5639_v27, %v1841_v4 }
 0x97b   : > { %v2637_v47 = vadd.f32 %v5274_v43, %v2636_v14 }
 0x97c   : > { %3297 = vrcp.f32 %v2616_v18 }
 0x97d   : > { %v2638_v19 = vadd.f32 %v5279_v53, %v2637_v47  ;;  %v5654_v53 = vpack.c.bf16 %v5301_v37, %v5295_v9 }
 0x97f   : > { %v2639_v52 = vadd.f32 %v5285_v57, %v2638_v19  ;;  %v5655_v57 = vpack.c.bf16 %v5118_v42, %v5111_v8  ;;  %v3334_v42 = vmov 3   ;;  %v3311_v8 = vld [vmem:[%s5473_s6] sm:$0xff] }
 0x980   : > { %2711 = vmatpush1.bf16.xpose.msra.mxu0 %v5635_v49  ;;  %3063 = vset.pattern.permute.xlu0 %v3334_v42 }
 0x981   : > { %2712 = vmatprep.subr.bf16.mxu0 %v2681_v29  ;;  %v2640_v17 = vadd.f32 %v5287_v15, %v2639_v52  ;;  %3064 = vset.pattern.permute.xlu1 %v3334_v42 }
 0x982   : > { %2762 = vperm.xlu0 %3063, %v3311_v8  }
 0x983   : > { %v2641_v14 = vadd.f32 %v5293_v46, %v2640_v17 }
 0x985   : > { %v2642_v12 = vadd.f32 %v5295_v9, %v2641_v14 }
 0x986   : > { %v3298_v5 = vpop.eup %3297 }
 0x987   : > { %v2643_v29 = vadd.f32 %v5301_v37, %v2642_v12  ;;  %v2656_v18 = vmul.f32 %v3298_v5, %v1971_v25  ;;  %v2658_v47 = vmul.f32 %v3298_v5, %v1975_v56  ;;  %v2660_v19 = vmul.f32 %v3298_v5, %v1981_v41  ;;  %v5642_v56 = vld [vmem:[#allocation18_spill] sm:$0xff]  ;;  %v5647_v25 = vld [vmem:[#allocation11_spill] sm:$0xff] }
 0x988   : > { %2713 = vmatpush1.bf16.xpose.msra.mxu0 %v5640_v44  ;;  %v2662_v49 = vmul.f32 %v3298_v5, %v1985_v21  ;;  %v5643_v11 = vpack.c.bf16 %v5040_v60, %v5642_v56  ;;  %v5646_v60 = vld [vmem:[#allocation17_spill] sm:$0xff]  ;;  %v1973_v27 = vadd.f32 %v5647_v25, %v1831_v36  ;;  %v5648_v41 = vld [vmem:[#allocation15_spill] sm:$0xff]  ;;  %v5651_v36 = vpack.c.bf16 %v5088_v34, %v5079_v31 }
 0x989   : > { %2714 = vmatprep.subr.bf16.mxu0 %v2683_v20  ;;  %v2644_v52 = vadd.f32 %v5303_v33, %v2643_v29  ;;  %v2664_v17 = vpack.c.bf16 %v2658_v47, %v2656_v18  ;;  %v1983_v40 = vadd.f32 %v5648_v41, %v1841_v4  ;;  %v5656_v31 = vpack.c.bf16 %v5309_v50, %v5303_v33  ;;  %v3087_v29 = vld [vmem:[%s5476_s9] sm:$0xff]   ;;  %v3088_v47 = vld [vmem:[%s5476_s9 + $0x8] sm:$0xff]  }
 0x98a   : > { %v2666_v14 = vpack.c.bf16 %v2662_v49, %v2660_v19  ;;  %v5657_v34 = vpack.c.bf16 %v5134_v45, %v5126_v48  ;;  %v3312_v45 = vld [vmem:[%s5473_s6 + $0x8] sm:$0xff]  ;;  %v3314_v48 = vld [vmem:[%s5473_s6 + $0x18] sm:$0xff]  ;;  %v5660_v18 = vmov 0  }
 0x98b   : > { %v2645_v6 = vadd.f32 %v5309_v50, %v2644_v52  ;;  %2766 = vperm.xlu1 %3064, %v3312_v45   ;;  %2774 = vperm.xlu0 %3063, %v3314_v48  }
 0x98d   : > { %v2646_v3 = vadd.f32 %v5314_v55, %v2645_v6 }
 0x98f   : > { %v2647_v12 = vadd.f32 %v5323_v54, %v2646_v3  ;;  %2770 = vperm.xlu1 %3064, %v3313_v13  }
 0x990   : > { %2715 = vmatpush1.bf16.xpose.msra.mxu0 %v5641_v0  ;;  %v5661_v0 = vld [vmem:[#allocation5_spill] sm:$0xff] }
 0x991   : > { %2716 = vmatprep.subr.bf16.mxu0 %v2685_v32  ;;  %v2648_v23 = vrot.slane %v2647_v12, 4  ;;  %v1987_v32 = vadd.f32 %v5646_v60, %v1846_v63 }
 0x993   : > { %v2649_v7 = vadd.f32 %v2648_v23, %v2647_v12 }
 0x995   : > { %v2650_v20 = vrot.slane %v2649_v7, 2 }
 0x997   : > { %v2651_v21 = vadd.f32 %v2650_v20, %v2649_v7  ;;  %v5662_v20 = vld [vmem:[#allocation3_spill] sm:$0xff] }
 0x998   : > { %2717 = vmatpush1.bf16.xpose.msra.mxu0 %v5643_v11 }
 0x999   : > { %2718 = vmatprep.subr.bf16.mxu0 %v2687_v30  ;;  %v2652_v39 = vrot.slane %v2651_v21, 1 }
 0x99b   : > { %v2653_v1 = vadd.f32 %v2652_v39, %v2651_v21  ;;  %v5663_v21 = vld [vmem:[#allocation2_spill] sm:$0xff] }
 0x99d   : > { %3299 = vrcp.f32 %v2653_v1  ;;  %v5664_v1 = vld [vmem:[#allocation4_spill] sm:$0xff] }
 0x9a0   : > { %2719 = vmatpush1.bf16.xpose.msra.mxu0 %v5644_v28 }
 0x9a1   : > { %2720 = vmatprep.subr.bf16.mxu0 %v2689_v22 }
 0x9a7   : > { %v3300_v30 = vpop.eup %3299 }
 0x9a8   : > { %2721 = vmatpush1.bf16.xpose.msra.mxu0 %v5649_v10  ;;  %v2657_v51 = vmul.f32 %v3300_v30, %v1973_v27  ;;  %v2659_v24 = vmul.f32 %v3300_v30, %v1977_v59  ;;  %v2661_v43 = vmul.f32 %v3300_v30, %v1983_v40  ;;  %v2663_v22 = vmul.f32 %v3300_v30, %v1987_v32  ;;  %v5665_v40 = vld [vmem:[#allocation9_spill] sm:$0xff] }
 0x9a9   : > { %2722 = vmatprep.subr.bf16.mxu0 %v5650_v2 }
 0x9aa   : > { %v2665_v58 = vpack.c.bf16 %v2659_v24, %v2657_v51  ;;  %v2667_v44 = vpack.c.bf16 %v2663_v22, %v2661_v43  ;;  %v5666_v51 = vld [vmem:[#allocation7_spill] sm:$0xff]  ;;  %v5667_v22 = vld [vmem:[#allocation6_spill] sm:$0xff] }
 0x9ac   : > { %2732 = vmatprep.mubr.bf16.mxu0 %v2665_v58 }
 0x9b0   : > { %2723 = vmatpush1.bf16.xpose.msra.mxu0 %v5651_v36 }
 0x9b1   : > { %2724 = vmatprep.subr.bf16.mxu0 %v5652_v62 }
 0x9b8   : > { %2725 = vmatpush1.bf16.xpose.msra.mxu0 %v5653_v38 }
 0x9b9   : > { %2726 = vmatprep.subr.bf16.mxu0 %v5654_v53 }
 0x9c0   : > { %2727 = vmatpush1.bf16.xpose.msra.mxu0 %v5655_v57 }
 0x9c1   : > { %2728 = vmatprep.subr.bf16.mxu0 %v5656_v31 }
 0x9c8   : > { %2729 = vmatpush1.bf16.xpose.msra.mxu0 %v5657_v34 }
 0x9c9   : > { %2730 = vmatprep.subr.bf16.mxu0 %v5658_v35 }
 0x9d0   : > { %2731 = vmatpush1.bf16.xpose.msra.mxu0 %v5659_v26 }
 0x9d7   : > { %2733 = vmatmul.mubr.bf16.vlgmr.msra.gmra.mrb[32].mxu0 %v2664_v17 }
 0x9d8   : > { %2742 = vmatprep.mubr.bf16.mxu0 %v2667_v44  ;;  %v5668_v44 = vld [vmem:[#allocation8_spill] sm:$0xff] }
 0x9df   : > { %2743 = vmatmul.mubr.bf16.gmra.mrb[36].mxu0 %v2666_v14 }
 0xa01   : > { %v2763_v19 = vpop.permute.xlu0 %2762 }
 0xa0a   : > { %v2767_v52 = vpop.permute.xlu1 %2766  ;;  %v2775_v41 = vpop.permute.xlu0 %2774 }
 0xa0e   : > { %v2771_v16 = vpop.permute.xlu1 %2770 }
 0xaaa   : > { %v2734_v61 = vpop.f32.mrb[32].mxu0 }
 0xaab   : > { %v2736_v15 = vpop.f32.mrb[33].mxu0 }
 0xaac   : > { %v2738_v46 = vpop.f32.mrb[34].mxu0 }
 0xaad   : > { %v2753_v9 = vpack.c.bf16 %v2738_v46, %v2734_v61  ;;  %v2740_v37 = vpop.f32.mrb[35].mxu0 }
 0xaae   : > { %v2754_v33 = vpack.c.bf16 %v2740_v37, %v2736_v15 }
 0xab0   : > { %2793 = vmatprep.subr.bf16.mxu1 %v2754_v33 }
 0xab1   : > { %2794 = vmatpush1.bf16.msra.mxu1 %v2753_v9 }
 0xab2   : > { %v2744_v50 = vpop.f32.mrb[36].mxu0 }
 0xab3   : > { %v2746_v55 = vpop.f32.mrb[37].mxu0 }
 0xab4   : > { %v2748_v54 = vpop.f32.mrb[38].mxu0 }
 0xab5   : > { %v2755_v63 = vpack.c.bf16 %v2748_v54, %v2744_v50  ;;  %v2750_v4 = vpop.f32.mrb[39].mxu0 }
 0xab6   : > { %v2756_v5 = vpack.c.bf16 %v2750_v4, %v2746_v55 }
 0xab8   : > { %2795 = vmatprep.subr.bf16.mxu1 %v2756_v5 }
 0xab9   : > { %2796 = vmatpush1.bf16.msra.mxu1 %v2755_v63 }
 0xabc   : > { %2988 = vmatmul.mubr.msk.bf16.vlgmr.msra.gmra.mrb[72].mxu1 %vm1005_vm8, %v3087_v29 }
 0xabd   : > { %2835 = vmatprep.mubr.bf16.mxu1 %v5660_v18 }
 0xac4   : > { %2989 = vmatmul.mubr.msk.bf16.gmra.mrb[76].mxu1 %vm1005_vm8, %v3088_v47 }
 0xb8f   : > { %v2827_v49 = vpop.f32.mrb[72].mxu1 }
 0xb90   : > { %v2828_v17 = vadd.f32 %v2827_v49, %v2763_v19  ;;  %v2829_v14 = vpop.f32.mrb[73].mxu1 }
 0xb91   : > { %v2830_v6 = vadd.f32 %v2829_v14, %v2763_v19  ;;  %v2831_v3 = vpop.f32.mrb[74].mxu1 }
 0xb92   : > { %v2846_v12 = vadd.f32 %v2828_v17, %v5661_v0  ;;  %v2832_v23 = vadd.f32 %v2831_v3, %v2767_v52  ;;  %v2833_v7 = vpop.f32.mrb[75].mxu1 }
 0xb93   : > { %v2847_v56 = vadd.f32 %v2830_v6, %v5662_v20  ;;  %v2834_v11 = vadd.f32 %v2833_v7, %v2767_v52 }
 0xb94   : > { %2854 = vst [vmem:[%s5446_s27] sm:$0xff] %v2846_v12  ;;  %v2848_v39 = vadd.f32 %v2832_v23, %v5663_v21 }
 0xb95   : > { %2855 = vst [vmem:[%s5446_s27 + $0x8] sm:$0xff] %v2847_v56  ;;  %v2849_v28 = vadd.f32 %v2834_v11, %v5664_v1 }
 0xb96   : > { %2856 = vst [vmem:[%s5446_s27 + $0x10] sm:$0xff] %v2848_v39 }
 0xb97   : > { %2857 = vst [vmem:[%s5446_s27 + $0x18] sm:$0xff] %v2849_v28  ;;  %v2837_v59 = vpop.f32.mrb[76].mxu1 }
 0xb98   : > { %v2838_v60 = vadd.f32 %v2837_v59, %v2771_v16  ;;  %v2839_v32 = vpop.f32.mrb[77].mxu1 }
 0xb99   : > { %v2840_v25 = vadd.f32 %v2839_v32, %v2771_v16  ;;  %v2841_v27 = vpop.f32.mrb[78].mxu1 }
 0xb9a   : > { %v2850_v10 = vadd.f32 %v2838_v60, %v5665_v40  ;;  %v2842_v30 = vadd.f32 %v2841_v27, %v2775_v41  ;;  %v2843_v2 = vpop.f32.mrb[79].mxu1 }
 0xb9b   : > { %v2851_v24 = vadd.f32 %v2840_v25, %v5666_v51  ;;  %v2844_v43 = vadd.f32 %v2843_v2, %v2775_v41 }
 0xb9c   : > { %2858 = vst [vmem:[%s5446_s27 + $0x20] sm:$0xff] %v2850_v10  ;;  %v2852_v58 = vadd.f32 %v2842_v30, %v5667_v22 }
 0xb9d   : > { %2859 = vst [vmem:[%s5446_s27 + $0x28] sm:$0xff] %v2851_v24  ;;  %v2853_v36 = vadd.f32 %v2844_v43, %v5668_v44 }
 0xb9e   : > { %2860 = vst [vmem:[%s5446_s27 + $0x30] sm:$0xff] %v2852_v58 }
 0xb9f   : > { %2861 = vst [vmem:[%s5446_s27 + $0x38] sm:$0xff] %v2853_v36 }
 0xba0 PF: > { %s20_s13 = sadd.s32 1, %s3321_s13  }
 0xba1   : > { %p17_p4 = scmp.ge.s32.totalorder %s20_s13, 4  }
 0xba3   :  { %19 = sbr.rel (!%p17_p4) target bundleno = 1 (0x1), region = 93 }

</bundles_post_ra>
